<compile_context>
chip_gen: v7x
topology: tpu7x:2x2x1
jax: 0.10.0
libtpu: 0.0.40
codegen_flags: <defaults>
</compile_context>

<pallas_src>
import functools
import math

import jax
import jax.numpy as jnp
from jax.experimental import pallas as pl
from jax.experimental.pallas import tpu as pltpu


# ----------------------------------------------------------------------------- shared math

def _gelu_tanh(x):
    # TODO(synk): PyTorch nn.GELU() default is the exact erf form; the tanh
    # approximation (max abs deviation ~3e-4) is used so it lowers cleanly on Mosaic.
    c = 0.7978845608028654  # sqrt(2/pi)
    return 0.5 * x * (1.0 + jnp.tanh(c * (x + 0.044715 * x * x * x)))


# ----------------------------------------------------------------------------- kernel

def _roll_rows(x, k):
    """Circular roll along axis 0 (sublanes): out[n] = x[(n - k) mod N]."""
    n = x.shape[0]
    k = k % n
    if k == 0:
        return x
    return pltpu.roll(x, shift=k, axis=0)


def _shiftmlp_kernel(x_ref, w1_ref, b1_ref, wdw_ref, bdw_ref, w2_ref, b2_ref,
                     o_ref, *, H, W, shift_size, chunk):
    # x_ref   : (N, C)     f32   tokens of one image, n = h*W + w
    # w1_ref  : (C, hid)   bf16  fc1 weight^T
    # b1_ref  : (1, hid)   f32
    # wdw_ref : (9, hid)   f32   depthwise 3x3 weights, tap-major (kh*3+kw, channel)
    # bdw_ref : (1, hid)   f32
    # w2_ref  : (hid,cout) bf16  fc2 weight^T
    # b2_ref  : (1, cout)  f32
    # o_ref   : (N, cout)  f32
    N, C = x_ref.shape
    hid = w1_ref.shape[1]
    pad = shift_size // 2

    n_idx = jax.lax.broadcasted_iota(jnp.int32, (N, 1), 0)      # token index
    w_idx = n_idx % W                                            # column within image
    c_idx = jax.lax.broadcasted_iota(jnp.int32, (1, C), 1)       # channel index

    x = x_ref[...].astype(jnp.float32)                           # (N, C)

    # ---- shift block 1: zero-fill shift along H, per channel chunk.
    # In flat layout an H-shift by s rows is a sublane roll by s*W (tile aligned).
    x_sh = jnp.zeros((N, C), jnp.float32)
    for j in range(shift_size):
        s = j - pad
        k = s * W
        in_chunk = (c_idx >= j * chunk) & (c_idx < (j + 1) * chunk)
        valid = (n_idx >= k) & (n_idx < N + k)
        x_sh = jnp.where(in_chunk & valid, _roll_rows(x, k), x_sh)

    # ---- fc1 (bf16 operands, f32 accumulation on the MXU)
    h = jnp.dot(x_sh.astype(jnp.bfloat16), w1_ref[...],
                preferred_element_type=jnp.float32) + b1_ref[...]        # (N, hid)

    # ---- depthwise 3x3 conv on the flat (N, hid) layout:
    # tap (kh,kw) reads h[n + (kh-1)*W + (kw-1)]  -> sublane roll + boundary masks.
    wdw = wdw_ref[...]                                                   # (9, hid)
    acc = jnp.zeros((N, hid), jnp.float32)
    for kh in range(3):
        for kw in range(3):
            dn = (kh - 1) * W + (kw - 1)
            tap = _roll_rows(h, -dn)                                     # tap[n] = h[n+dn]
            valid = None
            if kh == 0:
                valid = n_idx >= W            # needs h-1 >= 0
            elif kh == 2:
                valid = n_idx < N - W         # needs h+1 <  H
            if kw == 0:
                vw = w_idx >= 1               # needs w-1 >= 0
                valid = vw if valid is None else (valid & vw)
            elif kw == 2:
                vw = w_idx < W - 1            # needs w+1 <  W
                valid = vw if valid is None else (valid & vw)
            if valid is not None:
                tap = jnp.where(valid, tap, 0.0)
            acc = acc + tap * wdw[kh * 3 + kw]
    acc = acc + bdw_ref[...]

    # TODO(synk): epilogue kept in f32 so it is cheap/exact on v5e (no bf16 VPU/EUP);
    # a bf16 epilogue would roughly halve EUP cost on v6e/v7x.
    y = _gelu_tanh(acc)                                                  # (N, hid)

    # ---- shift block 2: zero-fill shift along W, per channel chunk (hid == C).
    y_sh = jnp.zeros((N, hid), jnp.float32)
    hc_idx = jax.lax.broadcasted_iota(jnp.int32, (1, hid), 1)
    for j in range(shift_size):
        s = j - pad
        in_chunk = (hc_idx >= j * chunk) & (hc_idx < (j + 1) * chunk)
        if s > 0:
            cond = in_chunk & (w_idx >= s)
        elif s < 0:
            cond = in_chunk & (w_idx < W + s)
        else:
            cond = in_chunk
        y_sh = jnp.where(cond, _roll_rows(y, s), y_sh)

    # ---- fc2
    out = jnp.dot(y_sh.astype(jnp.bfloat16), w2_ref[...],
                  preferred_element_type=jnp.float32) + b2_ref[...]      # (N, cout)
    o_ref[...] = out.astype(o_ref.dtype)


# ----------------------------------------------------------------------------- params

def init_params(key, in_features, hidden_features, out_features):
    k1, k2, k3, k4, k5, k6 = jax.random.split(key, 6)

    def trunc_normal(k, shape, std=0.02):
        return jnp.clip(std * jax.random.normal(k, shape, jnp.float32), -2 * std, 2 * std)

    fan_out = 9  # 3*3*hidden / groups(=hidden), per the PyTorch conv init
    # NOTE: PyTorch inits the biases to 0; small random values are used here so the
    # bias-add paths are actually exercised by the numerical check.
    return {
        "fc1_w": trunc_normal(k1, (hidden_features, in_features)),        # (hid, Cin)
        "fc1_b": 0.02 * jax.random.normal(k2, (hidden_features,), jnp.float32),
        "dw_w": math.sqrt(2.0 / fan_out)
                * jax.random.normal(k3, (hidden_features, 1, 3, 3), jnp.float32),
        "dw_b": 0.02 * jax.random.normal(k4, (hidden_features,), jnp.float32),
        "fc2_w": trunc_normal(k5, (out_features, hidden_features)),       # (Cout, hid)
        "fc2_b": 0.02 * jax.random.normal(k6, (out_features,), jnp.float32),
    }


# ----------------------------------------------------------------------------- forward (Pallas)

@functools.partial(jax.jit, static_argnames=("H", "W", "shift_size"))
def shiftmlp_forward(x, params, H, W, shift_size=5):
    """x: (B, N, C) float32, N = H*W. Returns (B, N, out_features) float32."""
    B, N, C = x.shape
    assert N == H * W
    hid = params["fc1_w"].shape[0]
    cout = params["fc2_w"].shape[0]
    # The original module reuses C for the post-fc1 spatial view, so hidden must equal C.
    assert hid == C, "shiftmlp requires hidden_features == in_features"
    chunk = -(-C // shift_size)  # torch.chunk chunk size = ceil(C / shift_size)

    # Weight prep stays inside the jit so XLA constant-folds / fuses it.
    w1_t = params["fc1_w"].T.astype(jnp.bfloat16)                        # (C, hid)
    b1 = params["fc1_b"].reshape(1, hid).astype(jnp.float32)
    wdw9 = params["dw_w"][:, 0].reshape(hid, 9).T.astype(jnp.float32)    # (9, hid)
    bdw = params["dw_b"].reshape(1, hid).astype(jnp.float32)
    w2_t = params["fc2_w"].T.astype(jnp.bfloat16)                        # (hid, cout)
    b2 = params["fc2_b"].reshape(1, cout).astype(jnp.float32)

    kernel = functools.partial(_shiftmlp_kernel, H=H, W=W,
                               shift_size=shift_size, chunk=chunk)

    flops = B * (2 * N * C * hid + 2 * N * hid * cout + 18 * N * hid)
    bytes_accessed = (4 * B * N * C + 4 * B * N * cout
                      + 2 * C * hid + 2 * hid * cout
                      + 4 * (2 * hid + 9 * hid + cout))

    return pl.pallas_call(
        kernel,
        out_shape=jax.ShapeDtypeStruct((B, N, cout), jnp.float32),
        grid=(B,),
        in_specs=[
            pl.BlockSpec((None, N, C), lambda b: (b, 0, 0)),   # one image of tokens
            pl.BlockSpec((C, hid), lambda b: (0, 0)),          # fc1 weight^T (bf16)
            pl.BlockSpec((1, hid), lambda b: (0, 0)),          # fc1 bias
            pl.BlockSpec((9, hid), lambda b: (0, 0)),          # dw weights (tap-major)
            pl.BlockSpec((1, hid), lambda b: (0, 0)),          # dw bias
            pl.BlockSpec((hid, cout), lambda b: (0, 0)),       # fc2 weight^T (bf16)
            pl.BlockSpec((1, cout), lambda b: (0, 0)),         # fc2 bias
        ],
        out_specs=pl.BlockSpec((None, N, cout), lambda b: (b, 0, 0)),
        compiler_params=pltpu.CompilerParams(dimension_semantics=("parallel",)),
        cost_estimate=pl.CostEstimate(flops=flops, transcendentals=B * N * hid,
                                      bytes_accessed=bytes_accessed),
    )(x, w1_t, b1, wdw9, bdw, w2_t, b2)


# ----------------------------------------------------------------------------- reference (pure JAX, f32)

def _shift_chunks(x_bchw, shift_size, pad, axis):
    """Exact port of the torch shift block: F.pad -> chunk(C) -> roll(shift) -> cat -> crop."""
    B, C, H, W = x_bchw.shape
    xp = jnp.pad(x_bchw, ((0, 0), (0, 0), (pad, pad), (pad, pad)))
    chunk = -(-C // shift_size)                       # torch.chunk chunk size = ceil(C/chunks)
    shifts = range(-pad, pad + 1)
    pieces = []
    for start, s in zip(range(0, C, chunk), shifts):  # zip truncates, like the torch code
        pieces.append(jnp.roll(xp[:, start:start + chunk], s, axis=axis))
    xc = jnp.concatenate(pieces, axis=1)
    return xc[:, :, pad:pad + H, pad:pad + W]


def shiftmlp_ref(x, params, H, W, shift_size=5):
    B, N, C = x.shape
    pad = shift_size // 2
    hid = params["fc1_w"].shape[0]

    x_bchw = jnp.transpose(x, (0, 2, 1)).reshape(B, C, H, W)
    x_sh = _shift_chunks(x_bchw, shift_size, pad, axis=2)
    xr = jnp.transpose(x_sh.reshape(B, C, N), (0, 2, 1))                 # (B, N, C)

    h = xr @ params["fc1_w"].T + params["fc1_b"]                         # (B, N, hid)

    h_im = jnp.transpose(h, (0, 2, 1)).reshape(B, hid, H, W)
    conv = jax.lax.conv_general_dilated(
        h_im, params["dw_w"], window_strides=(1, 1),
        padding=((1, 1), (1, 1)),
        dimension_numbers=("NCHW", "OIHW", "NCHW"),
        feature_group_count=hid)
    conv = conv + params["dw_b"][None, :, None, None]
    h = jnp.transpose(conv.reshape(B, hid, N), (0, 2, 1))                # (B, N, hid)
    h = _gelu_tanh(h)

    h_im = jnp.transpose(h, (0, 2, 1)).reshape(B, hid, H, W)
    h_sh = _shift_chunks(h_im, shift_size, pad, axis=3)
    hr = jnp.transpose(h_sh.reshape(B, hid, N), (0, 2, 1))               # (B, N, hid)

    return hr @ params["fc2_w"].T + params["fc2_b"]


# ----------------------------------------------------------------------------- main

if __name__ == "__main__":
    key = jax.random.PRNGKey(0)
    kx, kp = jax.random.split(key)

    # Small shapes consistent with the module: hidden == in_features (required by the
    # original forward). C=128 is lane-aligned (unmasked stores on every chip) and
    # torch.chunk(128, 5) still yields exactly 5 chunks (26,26,26,26,24).
    B, H, W = 2, 16, 16
    C = 128                      # in_features == hidden_features == out_features
    N = H * W                    # 256 tokens per image -> >=256 MXU rows per grid step
    shift_size = 5

    x = jax.random.normal(kx, (B, N, C), jnp.float32)
    params = init_params(kp, C, C, C)

    out = shiftmlp_forward(x, params, H=H, W=W, shift_size=shift_size)
    out = jax.block_until_ready(out)
    ref = shiftmlp_ref(x, params, H, W, shift_size=shift_size)

    assert out.shape == (B, N, C)
    max_err = float(jnp.max(jnp.abs(out - ref)))
    assert jnp.allclose(out, ref, atol=1e-2, rtol=2e-2), f"mismatch, max abs err {max_err}"
    print("KERNEL_OK")
</pallas_src>

<mosaic_0001>
module attributes {stable_mosaic.version = 11 : i64} {
  func.func @_shiftmlp_kernel(%arg0: i32, %arg1: memref<1x256x128xf32, #tpu.memory_space<vmem>>, %arg2: memref<128x128xbf16, #tpu.memory_space<vmem>>, %arg3: memref<1x128xf32, #tpu.memory_space<vmem>>, %arg4: memref<9x128xf32, #tpu.memory_space<vmem>>, %arg5: memref<1x128xf32, #tpu.memory_space<vmem>>, %arg6: memref<128x128xbf16, #tpu.memory_space<vmem>>, %arg7: memref<1x128xf32, #tpu.memory_space<vmem>>, %arg8: memref<1x256x128xf32, #tpu.memory_space<vmem>>) attributes {dimension_semantics = [#tpu.dimension_semantics<parallel>], iteration_bounds = array<i64: 2>, scalar_prefetch = 0 : i64, scratch_operands = 0 : i64, tpu.core_type = #tpu.core_type<tc>, window_params = [{transform_indices = @transform_0, window_bounds = array<i64: 1, 256, 128>}, {pipeline_mode = #tpu.pipeline_mode<synchronous>, transform_indices = @transform_1, window_bounds = array<i64: 128, 128>}, {pipeline_mode = #tpu.pipeline_mode<synchronous>, transform_indices = @transform_2, window_bounds = array<i64: 1, 128>}, {pipeline_mode = #tpu.pipeline_mode<synchronous>, transform_indices = @transform_3, window_bounds = array<i64: 9, 128>}, {pipeline_mode = #tpu.pipeline_mode<synchronous>, transform_indices = @transform_4, window_bounds = array<i64: 1, 128>}, {pipeline_mode = #tpu.pipeline_mode<synchronous>, transform_indices = @transform_5, window_bounds = array<i64: 128, 128>}, {pipeline_mode = #tpu.pipeline_mode<synchronous>, transform_indices = @transform_6, window_bounds = array<i64: 1, 128>}, {transform_indices = @transform_7, window_bounds = array<i64: 1, 256, 128>}]} {
    %0 = tpu.iota {dimensions = array<i32: 0>} : vector<256x1xi32>
    %c16_i32 = arith.constant 16 : i32
    %c0_i32 = arith.constant 0 : i32
    %1 = arith.cmpi eq, %c16_i32, %c0_i32 : i32
    %c1_i32 = arith.constant 1 : i32
    %2 = arith.select %1, %c1_i32, %c16_i32 : i32
    %3 = vector.broadcast %2 : i32 to vector<256x1xi32>
    %4 = arith.remsi %0, %3 : vector<256x1xi32>
    %c0_i32_0 = arith.constant 0 : i32
    %5 = vector.broadcast %c0_i32_0 : i32 to vector<256x1xi32>
    %6 = arith.cmpi ne, %4, %5 : vector<256x1xi32>
    %c0_i32_1 = arith.constant 0 : i32
    %7 = vector.broadcast %c0_i32_1 : i32 to vector<256x1xi32>
    %8 = arith.cmpi slt, %4, %7 : vector<256x1xi32>
    %c0_i32_2 = arith.constant 0 : i32
    %9 = arith.cmpi slt, %2, %c0_i32_2 : i32
    %10 = vector.broadcast %9 : i1 to vector<256x1xi1>
    %11 = vector.broadcast %10 : vector<256x1xi1> to vector<256x1xi1>
    %12 = arith.xori %8, %11 : vector<256x1xi1>
    %13 = arith.andi %12, %6 : vector<256x1xi1>
    %14 = vector.broadcast %2 : i32 to vector<256x1xi32>
    %15 = arith.addi %4, %14 : vector<256x1xi32>
    %16 = arith.select %13, %15, %4 : vector<256x1xi1>, vector<256x1xi32>
    %17 = tpu.iota {dimensions = array<i32: 1>} : vector<1x128xi32>
    %c0 = arith.constant 0 : index
    %c0_3 = arith.constant 0 : index
    %c0_4 = arith.constant 0 : index
    %18 = vector.load %arg1[%c0, %c0_3, %c0_4] : memref<1x256x128xf32, #tpu.memory_space<vmem>>, vector<1x256x128xf32>
    %19 = vector.shape_cast %18 : vector<1x256x128xf32> to vector<256x128xf32>
    %cst = arith.constant 0.000000e+00 : f32
    %20 = vector.broadcast %cst : f32 to vector<256x128xf32>
    %c0_i32_5 = arith.constant 0 : i32
    %21 = vector.broadcast %c0_i32_5 : i32 to vector<1x128xi32>
    %22 = arith.cmpi sge, %17, %21 : vector<1x128xi32>
    %c26_i32 = arith.constant 26 : i32
    %23 = vector.broadcast %c26_i32 : i32 to vector<1x128xi32>
    %24 = arith.cmpi slt, %17, %23 : vector<1x128xi32>
    %25 = arith.andi %22, %24 : vector<1x128xi1>
    %c-32_i32 = arith.constant -32 : i32
    %26 = vector.broadcast %c-32_i32 : i32 to vector<256x1xi32>
    %27 = arith.cmpi sge, %0, %26 : vector<256x1xi32>
    %c224_i32 = arith.constant 224 : i32
    %28 = vector.broadcast %c224_i32 : i32 to vector<256x1xi32>
    %29 = arith.cmpi slt, %0, %28 : vector<256x1xi32>
    %30 = arith.andi %27, %29 : vector<256x1xi1>
    %31 = vector.broadcast %25 : vector<1x128xi1> to vector<256x128xi1>
    %32 = vector.broadcast %30 : vector<256x1xi1> to vector<256x128xi1>
    %33 = arith.andi %31, %32 : vector<256x128xi1>
    %c224_i32_6 = arith.constant 224 : i32
    %34 = tpu.dynamic_rotate %19 by %c224_i32_6 dim 0 : vector<256x128xf32>, i32 -> vector<256x128xf32>
    %35 = arith.select %33, %34, %20 : vector<256x128xi1>, vector<256x128xf32>
    %c26_i32_7 = arith.constant 26 : i32
    %36 = vector.broadcast %c26_i32_7 : i32 to vector<1x128xi32>
    %37 = arith.cmpi sge, %17, %36 : vector<1x128xi32>
    %c52_i32 = arith.constant 52 : i32
    %38 = vector.broadcast %c52_i32 : i32 to vector<1x128xi32>
    %39 = arith.cmpi slt, %17, %38 : vector<1x128xi32>
    %40 = arith.andi %37, %39 : vector<1x128xi1>
    %c-16_i32 = arith.constant -16 : i32
    %41 = vector.broadcast %c-16_i32 : i32 to vector<256x1xi32>
    %42 = arith.cmpi sge, %0, %41 : vector<256x1xi32>
    %c240_i32 = arith.constant 240 : i32
    %43 = vector.broadcast %c240_i32 : i32 to vector<256x1xi32>
    %44 = arith.cmpi slt, %0, %43 : vector<256x1xi32>
    %45 = arith.andi %42, %44 : vector<256x1xi1>
    %46 = vector.broadcast %40 : vector<1x128xi1> to vector<256x128xi1>
    %47 = vector.broadcast %45 : vector<256x1xi1> to vector<256x128xi1>
    %48 = arith.andi %46, %47 : vector<256x128xi1>
    %c240_i32_8 = arith.constant 240 : i32
    %49 = tpu.dynamic_rotate %19 by %c240_i32_8 dim 0 : vector<256x128xf32>, i32 -> vector<256x128xf32>
    %50 = arith.select %48, %49, %35 : vector<256x128xi1>, vector<256x128xf32>
    %c52_i32_9 = arith.constant 52 : i32
    %51 = vector.broadcast %c52_i32_9 : i32 to vector<1x128xi32>
    %52 = arith.cmpi sge, %17, %51 : vector<1x128xi32>
    %c78_i32 = arith.constant 78 : i32
    %53 = vector.broadcast %c78_i32 : i32 to vector<1x128xi32>
    %54 = arith.cmpi slt, %17, %53 : vector<1x128xi32>
    %55 = arith.andi %52, %54 : vector<1x128xi1>
    %c0_i32_10 = arith.constant 0 : i32
    %56 = vector.broadcast %c0_i32_10 : i32 to vector<256x1xi32>
    %57 = arith.cmpi sge, %0, %56 : vector<256x1xi32>
    %c256_i32 = arith.constant 256 : i32
    %58 = vector.broadcast %c256_i32 : i32 to vector<256x1xi32>
    %59 = arith.cmpi slt, %0, %58 : vector<256x1xi32>
    %60 = arith.andi %57, %59 : vector<256x1xi1>
    %61 = vector.broadcast %55 : vector<1x128xi1> to vector<256x128xi1>
    %62 = vector.broadcast %60 : vector<256x1xi1> to vector<256x128xi1>
    %63 = arith.andi %61, %62 : vector<256x128xi1>
    %64 = arith.select %63, %19, %50 : vector<256x128xi1>, vector<256x128xf32>
    %c78_i32_11 = arith.constant 78 : i32
    %65 = vector.broadcast %c78_i32_11 : i32 to vector<1x128xi32>
    %66 = arith.cmpi sge, %17, %65 : vector<1x128xi32>
    %c104_i32 = arith.constant 104 : i32
    %67 = vector.broadcast %c104_i32 : i32 to vector<1x128xi32>
    %68 = arith.cmpi slt, %17, %67 : vector<1x128xi32>
    %69 = arith.andi %66, %68 : vector<1x128xi1>
    %c16_i32_12 = arith.constant 16 : i32
    %70 = vector.broadcast %c16_i32_12 : i32 to vector<256x1xi32>
    %71 = arith.cmpi sge, %0, %70 : vector<256x1xi32>
    %c272_i32 = arith.constant 272 : i32
    %72 = vector.broadcast %c272_i32 : i32 to vector<256x1xi32>
    %73 = arith.cmpi slt, %0, %72 : vector<256x1xi32>
    %74 = arith.andi %71, %73 : vector<256x1xi1>
    %75 = vector.broadcast %69 : vector<1x128xi1> to vector<256x128xi1>
    %76 = vector.broadcast %74 : vector<256x1xi1> to vector<256x128xi1>
    %77 = arith.andi %75, %76 : vector<256x128xi1>
    %c16_i32_13 = arith.constant 16 : i32
    %78 = tpu.dynamic_rotate %19 by %c16_i32_13 dim 0 : vector<256x128xf32>, i32 -> vector<256x128xf32>
    %79 = arith.select %77, %78, %64 : vector<256x128xi1>, vector<256x128xf32>
    %c104_i32_14 = arith.constant 104 : i32
    %80 = vector.broadcast %c104_i32_14 : i32 to vector<1x128xi32>
    %81 = arith.cmpi sge, %17, %80 : vector<1x128xi32>
    %c130_i32 = arith.constant 130 : i32
    %82 = vector.broadcast %c130_i32 : i32 to vector<1x128xi32>
    %83 = arith.cmpi slt, %17, %82 : vector<1x128xi32>
    %84 = arith.andi %81, %83 : vector<1x128xi1>
    %c32_i32 = arith.constant 32 : i32
    %85 = vector.broadcast %c32_i32 : i32 to vector<256x1xi32>
    %86 = arith.cmpi sge, %0, %85 : vector<256x1xi32>
    %c288_i32 = arith.constant 288 : i32
    %87 = vector.broadcast %c288_i32 : i32 to vector<256x1xi32>
    %88 = arith.cmpi slt, %0, %87 : vector<256x1xi32>
    %89 = arith.andi %86, %88 : vector<256x1xi1>
    %90 = vector.broadcast %84 : vector<1x128xi1> to vector<256x128xi1>
    %91 = vector.broadcast %89 : vector<256x1xi1> to vector<256x128xi1>
    %92 = arith.andi %90, %91 : vector<256x128xi1>
    %c32_i32_15 = arith.constant 32 : i32
    %93 = tpu.dynamic_rotate %19 by %c32_i32_15 dim 0 : vector<256x128xf32>, i32 -> vector<256x128xf32>
    %94 = arith.select %92, %93, %79 : vector<256x128xi1>, vector<256x128xf32>
    %95 = arith.truncf %94 : vector<256x128xf32> to vector<256x128xbf16>
    %c0_16 = arith.constant 0 : index
    %c0_17 = arith.constant 0 : index
    %96 = vector.load %arg2[%c0_16, %c0_17] : memref<128x128xbf16, #tpu.memory_space<vmem>>, vector<128x128xbf16>
    %cst_18 = arith.constant dense<0.000000e+00> : vector<256x128xf32>
    %97 = tpu.matmul %95, %96, %cst_18 {dimension_numbers = #tpu.dot_dimension_numbers<[1], [0], [0], [1], [0, 0, 1, 1], [], []>} : vector<256x128xbf16>, vector<128x128xbf16>, vector<256x128xf32> -> vector<256x128xf32>
    %c0_19 = arith.constant 0 : index
    %c0_20 = arith.constant 0 : index
    %98 = vector.load %arg3[%c0_19, %c0_20] : memref<1x128xf32, #tpu.memory_space<vmem>>, vector<1x128xf32>
    %99 = vector.broadcast %98 : vector<1x128xf32> to vector<256x128xf32>
    %100 = arith.addf %97, %99 : vector<256x128xf32>
    %c0_21 = arith.constant 0 : index
    %c0_22 = arith.constant 0 : index
    %101 = vector.load %arg4[%c0_21, %c0_22] : memref<9x128xf32, #tpu.memory_space<vmem>>, vector<9x128xf32>
    %cst_23 = arith.constant 0.000000e+00 : f32
    %102 = vector.broadcast %cst_23 : f32 to vector<256x128xf32>
    %c17_i32 = arith.constant 17 : i32
    %103 = tpu.dynamic_rotate %100 by %c17_i32 dim 0 : vector<256x128xf32>, i32 -> vector<256x128xf32>
    %c16_i32_24 = arith.constant 16 : i32
    %104 = vector.broadcast %c16_i32_24 : i32 to vector<256x1xi32>
    %105 = arith.cmpi sge, %0, %104 : vector<256x1xi32>
    %c1_i32_25 = arith.constant 1 : i32
    %106 = vector.broadcast %c1_i32_25 : i32 to vector<256x1xi32>
    %107 = arith.cmpi sge, %16, %106 : vector<256x1xi32>
    %108 = arith.andi %105, %107 : vector<256x1xi1>
    %cst_26 = arith.constant 0.000000e+00 : f32
    %109 = vector.shape_cast %108 : vector<256x1xi1> to vector<256x1xi1>
    %110 = vector.broadcast %109 : vector<256x1xi1> to vector<256x128xi1>
    %111 = vector.broadcast %cst_26 : f32 to vector<256x128xf32>
    %112 = arith.select %110, %103, %111 : vector<256x128xi1>, vector<256x128xf32>
    %113 = vector.extract_strided_slice %101 {offsets = [0, 0], sizes = [1, 128], strides = [1, 1]} : vector<9x128xf32> to vector<1x128xf32>
    %114 = vector.shape_cast %113 : vector<1x128xf32> to vector<128xf32>
    %115 = vector.shape_cast %114 : vector<128xf32> to vector<1x128xf32>
    %116 = vector.broadcast %115 : vector<1x128xf32> to vector<256x128xf32>
    %117 = arith.mulf %112, %116 : vector<256x128xf32>
    %118 = arith.addf %102, %117 : vector<256x128xf32>
    %c16_i32_27 = arith.constant 16 : i32
    %119 = tpu.dynamic_rotate %100 by %c16_i32_27 dim 0 : vector<256x128xf32>, i32 -> vector<256x128xf32>
    %c16_i32_28 = arith.constant 16 : i32
    %120 = vector.broadcast %c16_i32_28 : i32 to vector<256x1xi32>
    %121 = arith.cmpi sge, %0, %120 : vector<256x1xi32>
    %cst_29 = arith.constant 0.000000e+00 : f32
    %122 = vector.shape_cast %121 : vector<256x1xi1> to vector<256x1xi1>
    %123 = vector.broadcast %122 : vector<256x1xi1> to vector<256x128xi1>
    %124 = vector.broadcast %cst_29 : f32 to vector<256x128xf32>
    %125 = arith.select %123, %119, %124 : vector<256x128xi1>, vector<256x128xf32>
    %126 = vector.extract_strided_slice %101 {offsets = [1, 0], sizes = [1, 128], strides = [1, 1]} : vector<9x128xf32> to vector<1x128xf32>
    %127 = vector.shape_cast %126 : vector<1x128xf32> to vector<128xf32>
    %128 = vector.shape_cast %127 : vector<128xf32> to vector<1x128xf32>
    %129 = vector.broadcast %128 : vector<1x128xf32> to vector<256x128xf32>
    %130 = arith.mulf %125, %129 : vector<256x128xf32>
    %131 = arith.addf %118, %130 : vector<256x128xf32>
    %c15_i32 = arith.constant 15 : i32
    %132 = tpu.dynamic_rotate %100 by %c15_i32 dim 0 : vector<256x128xf32>, i32 -> vector<256x128xf32>
    %c16_i32_30 = arith.constant 16 : i32
    %133 = vector.broadcast %c16_i32_30 : i32 to vector<256x1xi32>
    %134 = arith.cmpi sge, %0, %133 : vector<256x1xi32>
    %c15_i32_31 = arith.constant 15 : i32
    %135 = vector.broadcast %c15_i32_31 : i32 to vector<256x1xi32>
    %136 = arith.cmpi slt, %16, %135 : vector<256x1xi32>
    %137 = arith.andi %134, %136 : vector<256x1xi1>
    %cst_32 = arith.constant 0.000000e+00 : f32
    %138 = vector.shape_cast %137 : vector<256x1xi1> to vector<256x1xi1>
    %139 = vector.broadcast %138 : vector<256x1xi1> to vector<256x128xi1>
    %140 = vector.broadcast %cst_32 : f32 to vector<256x128xf32>
    %141 = arith.select %139, %132, %140 : vector<256x128xi1>, vector<256x128xf32>
    %142 = vector.extract_strided_slice %101 {offsets = [2, 0], sizes = [1, 128], strides = [1, 1]} : vector<9x128xf32> to vector<1x128xf32>
    %143 = vector.shape_cast %142 : vector<1x128xf32> to vector<128xf32>
    %144 = vector.shape_cast %143 : vector<128xf32> to vector<1x128xf32>
    %145 = vector.broadcast %144 : vector<1x128xf32> to vector<256x128xf32>
    %146 = arith.mulf %141, %145 : vector<256x128xf32>
    %147 = arith.addf %131, %146 : vector<256x128xf32>
    %c1_i32_33 = arith.constant 1 : i32
    %148 = tpu.dynamic_rotate %100 by %c1_i32_33 dim 0 : vector<256x128xf32>, i32 -> vector<256x128xf32>
    %c1_i32_34 = arith.constant 1 : i32
    %149 = vector.broadcast %c1_i32_34 : i32 to vector<256x1xi32>
    %150 = arith.cmpi sge, %16, %149 : vector<256x1xi32>
    %cst_35 = arith.constant 0.000000e+00 : f32
    %151 = vector.shape_cast %150 : vector<256x1xi1> to vector<256x1xi1>
    %152 = vector.broadcast %151 : vector<256x1xi1> to vector<256x128xi1>
    %153 = vector.broadcast %cst_35 : f32 to vector<256x128xf32>
    %154 = arith.select %152, %148, %153 : vector<256x128xi1>, vector<256x128xf32>
    %155 = vector.extract_strided_slice %101 {offsets = [3, 0], sizes = [1, 128], strides = [1, 1]} : vector<9x128xf32> to vector<1x128xf32>
    %156 = vector.shape_cast %155 : vector<1x128xf32> to vector<128xf32>
    %157 = vector.shape_cast %156 : vector<128xf32> to vector<1x128xf32>
    %158 = vector.broadcast %157 : vector<1x128xf32> to vector<256x128xf32>
    %159 = arith.mulf %154, %158 : vector<256x128xf32>
    %160 = arith.addf %147, %159 : vector<256x128xf32>
    %161 = vector.extract_strided_slice %101 {offsets = [4, 0], sizes = [1, 128], strides = [1, 1]} : vector<9x128xf32> to vector<1x128xf32>
    %162 = vector.shape_cast %161 : vector<1x128xf32> to vector<128xf32>
    %163 = vector.shape_cast %162 : vector<128xf32> to vector<1x128xf32>
    %164 = vector.broadcast %163 : vector<1x128xf32> to vector<256x128xf32>
    %165 = arith.mulf %100, %164 : vector<256x128xf32>
    %166 = arith.addf %160, %165 : vector<256x128xf32>
    %c255_i32 = arith.constant 255 : i32
    %167 = tpu.dynamic_rotate %100 by %c255_i32 dim 0 : vector<256x128xf32>, i32 -> vector<256x128xf32>
    %c15_i32_36 = arith.constant 15 : i32
    %168 = vector.broadcast %c15_i32_36 : i32 to vector<256x1xi32>
    %169 = arith.cmpi slt, %16, %168 : vector<256x1xi32>
    %cst_37 = arith.constant 0.000000e+00 : f32
    %170 = vector.shape_cast %169 : vector<256x1xi1> to vector<256x1xi1>
    %171 = vector.broadcast %170 : vector<256x1xi1> to vector<256x128xi1>
    %172 = vector.broadcast %cst_37 : f32 to vector<256x128xf32>
    %173 = arith.select %171, %167, %172 : vector<256x128xi1>, vector<256x128xf32>
    %174 = vector.extract_strided_slice %101 {offsets = [5, 0], sizes = [1, 128], strides = [1, 1]} : vector<9x128xf32> to vector<1x128xf32>
    %175 = vector.shape_cast %174 : vector<1x128xf32> to vector<128xf32>
    %176 = vector.shape_cast %175 : vector<128xf32> to vector<1x128xf32>
    %177 = vector.broadcast %176 : vector<1x128xf32> to vector<256x128xf32>
    %178 = arith.mulf %173, %177 : vector<256x128xf32>
    %179 = arith.addf %166, %178 : vector<256x128xf32>
    %c241_i32 = arith.constant 241 : i32
    %180 = tpu.dynamic_rotate %100 by %c241_i32 dim 0 : vector<256x128xf32>, i32 -> vector<256x128xf32>
    %c240_i32_38 = arith.constant 240 : i32
    %181 = vector.broadcast %c240_i32_38 : i32 to vector<256x1xi32>
    %182 = arith.cmpi slt, %0, %181 : vector<256x1xi32>
    %c1_i32_39 = arith.constant 1 : i32
    %183 = vector.broadcast %c1_i32_39 : i32 to vector<256x1xi32>
    %184 = arith.cmpi sge, %16, %183 : vector<256x1xi32>
    %185 = arith.andi %182, %184 : vector<256x1xi1>
    %cst_40 = arith.constant 0.000000e+00 : f32
    %186 = vector.shape_cast %185 : vector<256x1xi1> to vector<256x1xi1>
    %187 = vector.broadcast %186 : vector<256x1xi1> to vector<256x128xi1>
    %188 = vector.broadcast %cst_40 : f32 to vector<256x128xf32>
    %189 = arith.select %187, %180, %188 : vector<256x128xi1>, vector<256x128xf32>
    %190 = vector.extract_strided_slice %101 {offsets = [6, 0], sizes = [1, 128], strides = [1, 1]} : vector<9x128xf32> to vector<1x128xf32>
    %191 = vector.shape_cast %190 : vector<1x128xf32> to vector<128xf32>
    %192 = vector.shape_cast %191 : vector<128xf32> to vector<1x128xf32>
    %193 = vector.broadcast %192 : vector<1x128xf32> to vector<256x128xf32>
    %194 = arith.mulf %189, %193 : vector<256x128xf32>
    %195 = arith.addf %179, %194 : vector<256x128xf32>
    %c240_i32_41 = arith.constant 240 : i32
    %196 = tpu.dynamic_rotate %100 by %c240_i32_41 dim 0 : vector<256x128xf32>, i32 -> vector<256x128xf32>
    %c240_i32_42 = arith.constant 240 : i32
    %197 = vector.broadcast %c240_i32_42 : i32 to vector<256x1xi32>
    %198 = arith.cmpi slt, %0, %197 : vector<256x1xi32>
    %cst_43 = arith.constant 0.000000e+00 : f32
    %199 = vector.shape_cast %198 : vector<256x1xi1> to vector<256x1xi1>
    %200 = vector.broadcast %199 : vector<256x1xi1> to vector<256x128xi1>
    %201 = vector.broadcast %cst_43 : f32 to vector<256x128xf32>
    %202 = arith.select %200, %196, %201 : vector<256x128xi1>, vector<256x128xf32>
    %203 = vector.extract_strided_slice %101 {offsets = [7, 0], sizes = [1, 128], strides = [1, 1]} : vector<9x128xf32> to vector<1x128xf32>
    %204 = vector.shape_cast %203 : vector<1x128xf32> to vector<128xf32>
    %205 = vector.shape_cast %204 : vector<128xf32> to vector<1x128xf32>
    %206 = vector.broadcast %205 : vector<1x128xf32> to vector<256x128xf32>
    %207 = arith.mulf %202, %206 : vector<256x128xf32>
    %208 = arith.addf %195, %207 : vector<256x128xf32>
    %c239_i32 = arith.constant 239 : i32
    %209 = tpu.dynamic_rotate %100 by %c239_i32 dim 0 : vector<256x128xf32>, i32 -> vector<256x128xf32>
    %c240_i32_44 = arith.constant 240 : i32
    %210 = vector.broadcast %c240_i32_44 : i32 to vector<256x1xi32>
    %211 = arith.cmpi slt, %0, %210 : vector<256x1xi32>
    %c15_i32_45 = arith.constant 15 : i32
    %212 = vector.broadcast %c15_i32_45 : i32 to vector<256x1xi32>
    %213 = arith.cmpi slt, %16, %212 : vector<256x1xi32>
    %214 = arith.andi %211, %213 : vector<256x1xi1>
    %cst_46 = arith.constant 0.000000e+00 : f32
    %215 = vector.shape_cast %214 : vector<256x1xi1> to vector<256x1xi1>
    %216 = vector.broadcast %215 : vector<256x1xi1> to vector<256x128xi1>
    %217 = vector.broadcast %cst_46 : f32 to vector<256x128xf32>
    %218 = arith.select %216, %209, %217 : vector<256x128xi1>, vector<256x128xf32>
    %219 = vector.extract_strided_slice %101 {offsets = [8, 0], sizes = [1, 128], strides = [1, 1]} : vector<9x128xf32> to vector<1x128xf32>
    %220 = vector.shape_cast %219 : vector<1x128xf32> to vector<128xf32>
    %221 = vector.shape_cast %220 : vector<128xf32> to vector<1x128xf32>
    %222 = vector.broadcast %221 : vector<1x128xf32> to vector<256x128xf32>
    %223 = arith.mulf %218, %222 : vector<256x128xf32>
    %224 = arith.addf %208, %223 : vector<256x128xf32>
    %c0_47 = arith.constant 0 : index
    %c0_48 = arith.constant 0 : index
    %225 = vector.load %arg5[%c0_47, %c0_48] : memref<1x128xf32, #tpu.memory_space<vmem>>, vector<1x128xf32>
    %226 = vector.broadcast %225 : vector<1x128xf32> to vector<256x128xf32>
    %227 = arith.addf %224, %226 : vector<256x128xf32>
    %cst_49 = arith.constant 5.000000e-01 : f32
    %228 = vector.broadcast %cst_49 : f32 to vector<256x128xf32>
    %229 = arith.mulf %228, %227 : vector<256x128xf32>
    %cst_50 = arith.constant 4.471500e-02 : f32
    %230 = vector.broadcast %cst_50 : f32 to vector<256x128xf32>
    %231 = arith.mulf %230, %227 : vector<256x128xf32>
    %232 = arith.mulf %231, %227 : vector<256x128xf32>
    %233 = arith.mulf %232, %227 : vector<256x128xf32>
    %234 = arith.addf %227, %233 : vector<256x128xf32>
    %cst_51 = arith.constant 0.797884583 : f32
    %235 = vector.broadcast %cst_51 : f32 to vector<256x128xf32>
    %236 = arith.mulf %235, %234 : vector<256x128xf32>
    %237 = math.tanh %236 : vector<256x128xf32>
    %cst_52 = arith.constant 1.000000e+00 : f32
    %238 = vector.broadcast %cst_52 : f32 to vector<256x128xf32>
    %239 = arith.addf %238, %237 : vector<256x128xf32>
    %240 = arith.mulf %229, %239 : vector<256x128xf32>
    %cst_53 = arith.constant 0.000000e+00 : f32
    %241 = vector.broadcast %cst_53 : f32 to vector<256x128xf32>
    %242 = tpu.iota {dimensions = array<i32: 1>} : vector<1x128xi32>
    %c0_i32_54 = arith.constant 0 : i32
    %243 = vector.broadcast %c0_i32_54 : i32 to vector<1x128xi32>
    %244 = arith.cmpi sge, %242, %243 : vector<1x128xi32>
    %c26_i32_55 = arith.constant 26 : i32
    %245 = vector.broadcast %c26_i32_55 : i32 to vector<1x128xi32>
    %246 = arith.cmpi slt, %242, %245 : vector<1x128xi32>
    %247 = arith.andi %244, %246 : vector<1x128xi1>
    %c14_i32 = arith.constant 14 : i32
    %248 = vector.broadcast %c14_i32 : i32 to vector<256x1xi32>
    %249 = arith.cmpi slt, %16, %248 : vector<256x1xi32>
    %250 = vector.broadcast %247 : vector<1x128xi1> to vector<256x128xi1>
    %251 = vector.broadcast %249 : vector<256x1xi1> to vector<256x128xi1>
    %252 = arith.andi %250, %251 : vector<256x128xi1>
    %c254_i32 = arith.constant 254 : i32
    %253 = tpu.dynamic_rotate %240 by %c254_i32 dim 0 : vector<256x128xf32>, i32 -> vector<256x128xf32>
    %254 = arith.select %252, %253, %241 : vector<256x128xi1>, vector<256x128xf32>
    %c26_i32_56 = arith.constant 26 : i32
    %255 = vector.broadcast %c26_i32_56 : i32 to vector<1x128xi32>
    %256 = arith.cmpi sge, %242, %255 : vector<1x128xi32>
    %c52_i32_57 = arith.constant 52 : i32
    %257 = vector.broadcast %c52_i32_57 : i32 to vector<1x128xi32>
    %258 = arith.cmpi slt, %242, %257 : vector<1x128xi32>
    %259 = arith.andi %256, %258 : vector<1x128xi1>
    %c15_i32_58 = arith.constant 15 : i32
    %260 = vector.broadcast %c15_i32_58 : i32 to vector<256x1xi32>
    %261 = arith.cmpi slt, %16, %260 : vector<256x1xi32>
    %262 = vector.broadcast %259 : vector<1x128xi1> to vector<256x128xi1>
    %263 = vector.broadcast %261 : vector<256x1xi1> to vector<256x128xi1>
    %264 = arith.andi %262, %263 : vector<256x128xi1>
    %c255_i32_59 = arith.constant 255 : i32
    %265 = tpu.dynamic_rotate %240 by %c255_i32_59 dim 0 : vector<256x128xf32>, i32 -> vector<256x128xf32>
    %266 = arith.select %264, %265, %254 : vector<256x128xi1>, vector<256x128xf32>
    %c52_i32_60 = arith.constant 52 : i32
    %267 = vector.broadcast %c52_i32_60 : i32 to vector<1x128xi32>
    %268 = arith.cmpi sge, %242, %267 : vector<1x128xi32>
    %c78_i32_61 = arith.constant 78 : i32
    %269 = vector.broadcast %c78_i32_61 : i32 to vector<1x128xi32>
    %270 = arith.cmpi slt, %242, %269 : vector<1x128xi32>
    %271 = arith.andi %268, %270 : vector<1x128xi1>
    %272 = vector.shape_cast %271 : vector<1x128xi1> to vector<1x128xi1>
    %273 = vector.broadcast %272 : vector<1x128xi1> to vector<256x128xi1>
    %274 = arith.select %273, %240, %266 : vector<256x128xi1>, vector<256x128xf32>
    %c78_i32_62 = arith.constant 78 : i32
    %275 = vector.broadcast %c78_i32_62 : i32 to vector<1x128xi32>
    %276 = arith.cmpi sge, %242, %275 : vector<1x128xi32>
    %c104_i32_63 = arith.constant 104 : i32
    %277 = vector.broadcast %c104_i32_63 : i32 to vector<1x128xi32>
    %278 = arith.cmpi slt, %242, %277 : vector<1x128xi32>
    %279 = arith.andi %276, %278 : vector<1x128xi1>
    %c1_i32_64 = arith.constant 1 : i32
    %280 = vector.broadcast %c1_i32_64 : i32 to vector<256x1xi32>
    %281 = arith.cmpi sge, %16, %280 : vector<256x1xi32>
    %282 = vector.broadcast %279 : vector<1x128xi1> to vector<256x128xi1>
    %283 = vector.broadcast %281 : vector<256x1xi1> to vector<256x128xi1>
    %284 = arith.andi %282, %283 : vector<256x128xi1>
    %c1_i32_65 = arith.constant 1 : i32
    %285 = tpu.dynamic_rotate %240 by %c1_i32_65 dim 0 : vector<256x128xf32>, i32 -> vector<256x128xf32>
    %286 = arith.select %284, %285, %274 : vector<256x128xi1>, vector<256x128xf32>
    %c104_i32_66 = arith.constant 104 : i32
    %287 = vector.broadcast %c104_i32_66 : i32 to vector<1x128xi32>
    %288 = arith.cmpi sge, %242, %287 : vector<1x128xi32>
    %c130_i32_67 = arith.constant 130 : i32
    %289 = vector.broadcast %c130_i32_67 : i32 to vector<1x128xi32>
    %290 = arith.cmpi slt, %242, %289 : vector<1x128xi32>
    %291 = arith.andi %288, %290 : vector<1x128xi1>
    %c2_i32 = arith.constant 2 : i32
    %292 = vector.broadcast %c2_i32 : i32 to vector<256x1xi32>
    %293 = arith.cmpi sge, %16, %292 : vector<256x1xi32>
    %294 = vector.broadcast %291 : vector<1x128xi1> to vector<256x128xi1>
    %295 = vector.broadcast %293 : vector<256x1xi1> to vector<256x128xi1>
    %296 = arith.andi %294, %295 : vector<256x128xi1>
    %c2_i32_68 = arith.constant 2 : i32
    %297 = tpu.dynamic_rotate %240 by %c2_i32_68 dim 0 : vector<256x128xf32>, i32 -> vector<256x128xf32>
    %298 = arith.select %296, %297, %286 : vector<256x128xi1>, vector<256x128xf32>
    %299 = arith.truncf %298 : vector<256x128xf32> to vector<256x128xbf16>
    %c0_69 = arith.constant 0 : index
    %c0_70 = arith.constant 0 : index
    %300 = vector.load %arg6[%c0_69, %c0_70] : memref<128x128xbf16, #tpu.memory_space<vmem>>, vector<128x128xbf16>
    %cst_71 = arith.constant dense<0.000000e+00> : vector<256x128xf32>
    %301 = tpu.matmul %299, %300, %cst_71 {dimension_numbers = #tpu.dot_dimension_numbers<[1], [0], [0], [1], [0, 0, 1, 1], [], []>} : vector<256x128xbf16>, vector<128x128xbf16>, vector<256x128xf32> -> vector<256x128xf32>
    %c0_72 = arith.constant 0 : index
    %c0_73 = arith.constant 0 : index
    %302 = vector.load %arg7[%c0_72, %c0_73] : memref<1x128xf32, #tpu.memory_space<vmem>>, vector<1x128xf32>
    %303 = vector.broadcast %302 : vector<1x128xf32> to vector<256x128xf32>
    %304 = arith.addf %301, %303 : vector<256x128xf32>
    %c0_74 = arith.constant 0 : index
    %c0_75 = arith.constant 0 : index
    %c0_76 = arith.constant 0 : index
    %305 = vector.load %arg8[%c0_74, %c0_75, %c0_76] : memref<1x256x128xf32, #tpu.memory_space<vmem>>, vector<1x256x128xf32>
    %306 = vector.shape_cast %305 : vector<1x256x128xf32> to vector<256x128xf32>
    %307 = vector.shape_cast %304 : vector<256x128xf32> to vector<1x256x128xf32>
    tpu.vector_store %arg8[%c0_74, %c0_75, %c0_76], %307 {strides = array<i32>} : memref<1x256x128xf32, #tpu.memory_space<vmem>>, vector<1x256x128xf32>,
    return
  }
  func.func @transform_0(%arg0: i32) -> (i32, i32, i32) {
    %c0_i32 = arith.constant 0 : i32
    %c0_i32_0 = arith.constant 0 : i32
    %c0_i32_1 = arith.constant 0 : i32
    return %arg0, %c0_i32, %c0_i32_0 : i32, i32, i32
  }
  func.func @transform_1(%arg0: i32) -> (i32, i32) {
    %c0_i32 = arith.constant 0 : i32
    %c0_i32_0 = arith.constant 0 : i32
    %c0_i32_1 = arith.constant 0 : i32
    return %c0_i32, %c0_i32_0 : i32, i32
  }
  func.func @transform_2(%arg0: i32) -> (i32, i32) {
    %c0_i32 = arith.constant 0 : i32
    %c0_i32_0 = arith.constant 0 : i32
    %c0_i32_1 = arith.constant 0 : i32
    return %c0_i32, %c0_i32_0 : i32, i32
  }
  func.func @transform_3(%arg0: i32) -> (i32, i32) {
    %c0_i32 = arith.constant 0 : i32
    %c0_i32_0 = arith.constant 0 : i32
    %c0_i32_1 = arith.constant 0 : i32
    return %c0_i32, %c0_i32_0 : i32, i32
  }
  func.func @transform_4(%arg0: i32) -> (i32, i32) {
    %c0_i32 = arith.constant 0 : i32
    %c0_i32_0 = arith.constant 0 : i32
    %c0_i32_1 = arith.constant 0 : i32
    return %c0_i32, %c0_i32_0 : i32, i32
  }
  func.func @transform_5(%arg0: i32) -> (i32, i32) {
    %c0_i32 = arith.constant 0 : i32
    %c0_i32_0 = arith.constant 0 : i32
    %c0_i32_1 = arith.constant 0 : i32
    return %c0_i32, %c0_i32_0 : i32, i32
  }
  func.func @transform_6(%arg0: i32) -> (i32, i32) {
    %c0_i32 = arith.constant 0 : i32
    %c0_i32_0 = arith.constant 0 : i32
    %c0_i32_1 = arith.constant 0 : i32
    return %c0_i32, %c0_i32_0 : i32, i32
  }
  func.func @transform_7(%arg0: i32) -> (i32, i32, i32) {
    %c0_i32 = arith.constant 0 : i32
    %c0_i32_0 = arith.constant 0 : i32
    %c0_i32_1 = arith.constant 0 : i32
    return %arg0, %c0_i32, %c0_i32_0 : i32, i32, i32
  }
}

</mosaic_0001>

<bundles_post_ra>
// kernel: squeeze.1
= control target key start
LH: loop header
LB: loop body
LE: loop exit
PB: predicated region body
PF: predicated region fallthrough
CT: control target
= control target key end

     0   :  { %s58_s0 = inlined_call_operand.vmem [shape: f32[128,3,3], index: 0, kind: input, shape index: {}]   ;;  %s59_s1 = inlined_call_operand.vmem [shape: f32[128,9], index: 1, kind: output, shape index: {}]  }
   0x1   :  { %v26_v0 = vld [vmem:[%s58_s0 + $0x8] sm:$0xf]  ;;  %v27_v1 = vld [vmem:[%s58_s0 + $0x4] sm:$0xf]  ;;  %v13_v2 = vld [vmem:[%s58_s0] sm:$0xf] }
   0x2   :  { %8 = vst [vmem:[#allocation0 + $0x10] sm:$0xf] %v26_v0  ;;  %12 = vst [vmem:[#allocation0 + $0x8] sm:$0xf] %v27_v1 }
   0x3   :  { %14 = vst [vmem:[#allocation0] sm:$0xf] %v13_v2 }
   0x9   :  { %v18_v4 = vld [vmem:[#allocation0 + $0x8] sm:$0x7]   ;;  %v22_v5 = vld [vmem:[#allocation0 + $0x10] sm:$0x7]  }
   0xa   :  { %v15_v3 = vld [vmem:[#allocation0] sm:$0x7]   ;;  %28 = vst [vmem:[%s59_s1 + $0x3] sm:$0x7] %v18_v4   ;;  %29 = vst [vmem:[%s59_s1 + $0x6] sm:$0x7] %v22_v5  }
   0xb   :  { %16 = vst [vmem:[%s59_s1] sm:$0x7] %v15_v3  }

// kernel: shiftmlp_forward.1
= control target key start
LH: loop header
LB: loop body
LE: loop exit
PB: predicated region body
PF: predicated region fallthrough
CT: control target
= control target key end

     0   :  { %12 = vsyncpa [#allocation3], 0  ;;  %s10079_s0 = inlined_call_operand.hbm [shape: f32[2,256,128], index: 0, kind: input, shape index: {}]   ;;  %s10080_s1 = inlined_call_operand.vmem [shape: bf16[128,128], index: 1, kind: input, shape index: {}]   ;;  %s10081_s2 = inlined_call_operand.vmem [shape: f32[1,128], index: 2, kind: input, shape index: {}]   ;;  %s10082_s3 = inlined_call_operand.vmem [shape: f32[9,128], index: 3, kind: input, shape index: {}]   ;;  %s10083_s4 = inlined_call_operand.vmem [shape: f32[1,128], index: 4, kind: input, shape index: {}]   ;;  %s10084_s5 = inlined_call_operand.vmem [shape: bf16[128,128], index: 5, kind: input, shape index: {}]   ;;  %s10085_s6 = inlined_call_operand.vmem [shape: f32[1,128], index: 6, kind: input, shape index: {}]   ;;  %s10086_s7 = inlined_call_operand.hbm [shape: f32[2,256,128], index: 7, kind: output, shape index: {}]  }
   0x1   :  { %14 = vsyncpa [#allocation3 + $0x1], 0 }
   0x2   :  { %15 = vsyncpa [#allocation4], 0 }
   0x3   :  { %17 = vsyncpa [#allocation4 + $0x1], 0  ;;  %s5736_s24 = smov 0   ;;  %s5738_s25 = smov 0  }
   0x4   :  { %s5740_s26 = smov 0   ;;  %s5742_s27 = smov 0  }
   0x5 LB: > { %s5757_s28 = sadd.s32 4294967295, %s5688_s27   ;;  %s5278_s29 = sadd.s32 4294967294, %s5688_s27   ;;  %s5688_s27 = sphi %s5742_s27, %s11178_s27   ;;  %s5684_s26 = sphi %s5740_s26, %s11177_s26   ;;  %s5680_s25 = sphi %s5738_s25, %s11176_s25   ;;  %s5676_s24 = sphi %s5736_s24, %s11175_s24  }
   0x6   : > { %s5761_s30 = sadd.s32 1, %s5688_s27   ;;  %s30_s8 = sadd.s32 1, %s5684_s26 }
   0x7   : > { %s27_s9 = ssub.s32 %s5688_s27, %s5761_s30  ;;  %p37_p0 = scmp.ne.s32.totalorder %s5684_s26, %s5680_s25 }
   0x8   : > { %p28_p1 = scmp.eq.s32.totalorder %s27_s9, 0  ;;  %p38_p2 = scmp.eq.s32.totalorder %s5688_s27, 0 }
   0x9   : > { %p43_p3 = scmp.ne.s32.totalorder %s5680_s25, %s5676_s24  ;;  %p44_p4 = scmp.eq.s32.totalorder %s5757_s28, 0 }
   0xa   : > { %s5773_s10 = scalar_select %p28_p1, %s5684_s26, %s30_s8  }
   0xb   : > { %p5775_p5 = por %p38_p2, %p37_p0  ;;  %p5779_p6 = por %p44_p4, %p43_p3 }
   0xc   : > { %p193_p7 = scmp.eq.s32.totalorder %s5757_s28, 1  ;;  %p199_p8 = scmp.eq.s32.totalorder %s5278_s29, 1 }
   0xd   : > { %p5470_p10 = scmp.lt.s32.totalorder %s5688_s27, 2  ;;  %s237_s15 = sand.u32 1, %s5684_s26  }
   0xe   : > { %p5786_p11 = por %p193_p7, %p37_p0  ;;  %p5790_p12 = por %p199_p8, %p43_p3 }
   0xf   : > { %s5312_s16 = sshll.u32 %s5688_s27, 12  ;;  %s5281_s17 = sshll.u32 %s237_s15, 8 }
  0x10   : > { %s10309_s13 = scalar_select %p5786_p11, 1, 0 }
  0x11   : > { %s10310_s14 = scalar_select %p5790_p12, 1, 0 }
  0x12   : > { %s5799_s20 = scalar_lea.hbm %s10079_s0, %s5312_s16  ;;  %s241_s21 = scalar_lea.vmem [#allocation2], %s5281_s17 }
  0x13   : > { %s248_s22 = sshll.u32 %s241_s21, 4  ;;  %p5803_p13 = pnand %p5470_p10, %p5775_p5  ;;  %s5807_s22 = int_to_ptr.vmem [resolvable:$true] %s248_s22 }
  0x14   : > { %s5809_s29 = scalar_lea.sflag [#allocation3], %s237_s15  ;;  %s5592_s8 = scalar_lea.hbm %s5799_s20, 4096 }
  0x15   : > { %p5593_p0 = scmp.ne.s32.totalorder %s5799_s20, %s5592_s8  ;;  %p5594_p1 = pneg %p5803_p13 }
  0x16   : > { %s5597_s16 = scalar_lea.hbm %s10079_s0, 8192  ;;  %p5598_p4 = scmp.lt.u32.totalorder %s5799_s20, %s10079_s0 }
  0x17   : > { %p5595_p2 = pnand %p5594_p1, %p5593_p0  ;;  %p5599_p5 = scmp.lt.u32.totalorder %s5597_s16, %s5592_s8 }
  0x18   : > { %p5601_p8 = scmp.lt.u32.totalorder %s5592_s8, %s5799_s20 }
  0x19   : > { %p5596_p3 = pneg %p5595_p2  ;;  %p5600_p7 = por %p5599_p5, %p5598_p4 }
  0x1b   : > { %p5602_p10 = por %p5601_p8, %p5600_p7 }
  0x1d   : > { %p5603_p9 = pnand %p5602_p10, %p5596_p3 }
  0x1f   : > { %5606 = shalt.err (!%p5603_p9)
}
  0x20   : > { %s5607_s15 = scalar_lea.vmem %s5807_s22, 4096  ;;  %s5690_s19 = smov [#allocation2]  }
  0x21   : > { %p5608_p0 = scmp.ne.s32.totalorder %s5807_s22, %s5607_s15  ;;  %s5612_s21 = sshll.u32 %s5690_s19, 4  ;;  %s5613_s21 = int_to_ptr.vmem [resolvable:$false] %s5612_s21 }
  0x22   : > { %s5614_s9 = scalar_lea.vmem %s5613_s21, 8192  ;;  %p5615_p11 = scmp.lt.s32.totalorder %s5807_s22, %s5613_s21 }
  0x23   : > { %p5610_p2 = pnand %p5608_p0, %p5594_p1  ;;  %p5616_p4 = scmp.lt.s32.totalorder %s5614_s9, %s5607_s15 }
  0x25   : > { %p5611_p12 = pneg %p5610_p2  ;;  %p5617_p5 = por %p5616_p4, %p5615_p11 }
  0x27   : > { %p5618_p7 = pnand %p5617_p5, %p5611_p12 }
  0x29   : > { %5621 = shalt.err (!%p5618_p7)
}
  0x2a   : > { %s5691_s8 = smov 128   ;;  %s5692_s11 = smov 8  }
  0x2b   : > { %5465 = dma.hbm_to_vmem [thread:$0]  (!%p5803_p13), %s5799_s20, 4096, %s5807_s22, %s5809_s29, %s5691_s8, %s5691_s8, %s5692_s11  }
  0x2c   : > { %p5284_p9 = scmp.ge.s32.totalorder %s5688_s27, 1  ;;  %p256_p1 = scmp.lt.s32.totalorder %s5688_s27, 3 }
  0x2e   : > { %p257_p3 = pnand %p5284_p9, %p256_p1 }
  0x30   : > { %260 = sbr.rel (%p257_p3) target bundleno = 1025 (0x401), region = 48 }
  0x37   : > { %s5840_s16 = sand.u32 1, %s5680_s25  }
  0x38   : > { %s5285_s17 = sshll.u32 %s5840_s16, 8  ;;  %s263_s18 = scalar_lea.sflag [#allocation3], %s5840_s16 }
  0x39   : > { %s5846_s15 = scalar_lea.vmem [#allocation2], %s5285_s17 }
  0x3a   : > { %5667 = dma.done.wait (%p5779_p6), %s263_s18, 4096  }
  0x3b   : > { %5669 = vsyncadd (%p5779_p6), %s263_s18, 4294963200  ;;  %v298_v0 = vlaneseq  ;;  %v5508_v2 = vld [vmem:[%s10080_s1] sm:$0xff]   ;;  %v5509_v3 = vld [vmem:[%s10080_s1 + $0x8] sm:$0xff]   ;;  %v10313_v5 = vmov 0  ;;  %v10316_v6 = vmov 0  ;;  %v10319_v47 = vmov 0 }
  0x3c   : > { %5362 = vmatprep.subr.bf16.mxu0 %v5508_v2  ;;  %v5510_v4 = vld [vmem:[%s10080_s1 + $0x10] sm:$0xff]   ;;  %v5511_v7 = vld [vmem:[%s10080_s1 + $0x18] sm:$0xff]   ;;  %v5881_v8 = vld [vmem:[%s5846_s15] sm:$0xff]  ;;  %s9964_s29 = scalar_lea.vmem [#allocation5], %s5285_s17  ;;  %s5313_s17 = sshll.u32 %s5757_s28, 12 }
  0x3d   : > { %v5853_v1 = vand.u32 127, %v298_v0  ;;  %5363 = vmatpush3.bf16.msra.mxu0 %v5508_v2  ;;  %v5884_v9 = vld [vmem:[%s5846_s15 + $0x8] sm:$0xff]  ;;  %v5887_v10 = vld [vmem:[%s5846_s15 + $0x10] sm:$0xff]  ;;  %v5890_v11 = vld [vmem:[%s5846_s15 + $0x18] sm:$0xff]  ;;  %s5205_s12 = sshll.u32 %s9964_s29, 4  ;;  %s10029_s21 = scalar_lea.hbm %s10086_s7, %s5313_s17  ;;  %s10031_s12 = int_to_ptr.vmem [resolvable:$true] %s5205_s12 }
  0x3e   : > { %5364 = vmatprep.subr.bf16.mxu0 %v5509_v3  ;;  %v5893_v12 = vld [vmem:[%s5846_s15 + $0x20] sm:$0xff]  ;;  %v5896_v13 = vld [vmem:[%s5846_s15 + $0x28] sm:$0xff]  ;;  %v5926_v24 = vld [vmem:[%s5846_s15 + $0x30] sm:$0xff]  ;;  %s5192_s28 = scalar_lea.sflag [#allocation4], %s5840_s16  ;;  %s5622_s9 = scalar_lea.vmem %s10031_s12, 4096 }
  0x3f   : > { %10312 = vst [vmem:[#allocation8_spill] sm:$0xff] %v5853_v1  ;;  %vm978_vm0 = vcmp.ge.s32.totalorder %v5853_v1, 26  ;;  %vm979_vm1 = vcmp.lt.s32.totalorder %v5853_v1, 52  ;;  %vm1207_vm2 = vcmp.ge.s32.totalorder %v5853_v1, 52  ;;  %vm1208_vm3 = vcmp.lt.s32.totalorder %v5853_v1, 78  ;;  %v5512_v18 = vld [vmem:[%s10080_s1 + $0x20] sm:$0xff]   ;;  %p5623_p6 = scmp.ne.s32.totalorder %s10031_s12, %s5622_s9 }
  0x40   : > { %vm5868_vm4 = vmand %vm978_vm0, %vm979_vm1  ;;  %vm10156_vm6 = vcmp.lt.s32.totalorder %v5853_v1, 26  ;;  %v5920_v22 = vld [vmem:[%s5846_s15 + $0x40] sm:$0xff]  ;;  %v5923_v23 = vld [vmem:[%s5846_s15 + $0x48] sm:$0xff]  ;;  %vm1436_vm7 = vcmp.ge.s32.totalorder %v5853_v1, 78  ;;  %vm1437_vm8 = vcmp.lt.s32.totalorder %v5853_v1, 104  ;;  %vm10155_vm10 = vcmp.ge.s32.totalorder %v5853_v1, 104 }
  0x41   : > { %v10314_v5 = vsel %vm5868_vm4, 4294967295, %v10313_v5  ;;  %vm5872_vm5 = vmand %vm1207_vm2, %vm1208_vm3  ;;  %5365 = vmatpush3.bf16.msra.mxu0 %v5509_v3  ;;  %v946_v14 = vsel %vm10156_vm6, %v5893_v12, 0.0  ;;  %v947_v15 = vsel %vm10156_vm6, %v5896_v13, 0.0  ;;  %v5929_v25 = vld [vmem:[%s5846_s15 + $0x38] sm:$0xff]  ;;  %v5513_v26 = vld [vmem:[%s10080_s1 + $0x28] sm:$0xff]   ;;  %v950_v27 = vsel %vm10156_vm6, %v5920_v22, 0.0 }
  0x42   : > { %10315 = vst [vmem:[#allocation9_spill] sm:$0xff] %v10314_v5  ;;  %v10317_v6 = vsel %vm5872_vm5, 4294967295, %v10316_v6  ;;  %5366 = vmatprep.subr.bf16.mxu0 %v5510_v4  ;;  %v1175_v16 = vsel %vm5868_vm4, %v5887_v10, %v946_v14  ;;  %v1176_v17 = vsel %vm5868_vm4, %v5890_v11, %v947_v15  ;;  %v951_v28 = vsel %vm10156_vm6, %v5923_v23, 0.0  ;;  %v5514_v29 = vld [vmem:[%s10080_s1 + $0x30] sm:$0xff]   ;;  %v5953_v33 = vld [vmem:[%s5846_s15 + $0x58] sm:$0xff]  ;;  %v5963_v36 = vld [vmem:[%s5846_s15 + $0x60] sm:$0xff] }
  0x43   : > { %10318 = vst [vmem:[#allocation10_spill] sm:$0xff] %v10317_v6  ;;  %v1404_v19 = vsel %vm5872_vm5, %v5881_v8, %v1175_v16  ;;  %v1405_v20 = vsel %vm5872_vm5, %v5884_v9, %v1176_v17  ;;  %v948_v30 = vsel %vm10156_vm6, %v5926_v24, 0.0  ;;  %v949_v31 = vsel %vm10156_vm6, %v5929_v25, 0.0  ;;  %v5950_v32 = vld [vmem:[%s5846_s15 + $0x50] sm:$0xff]  ;;  %v5967_v37 = vld [vmem:[%s5846_s15 + $0x68] sm:$0xff]  ;;  %v5515_v42 = vld [vmem:[%s10080_s1 + $0x38] sm:$0xff]  }
  0x44   : > { %v1894_v21 = vpack.c.bf16 %v1405_v20, %v1404_v19  ;;  %v1179_v34 = vsel %vm5868_vm4, %v5926_v24, %v950_v27  ;;  %v1180_v35 = vsel %vm5868_vm4, %v5929_v25, %v951_v28  ;;  %v1177_v38 = vsel %vm5868_vm4, %v5893_v12, %v948_v30  ;;  %vm5998_vm9 = vmand %vm1436_vm7, %vm1437_vm8  ;;  %v6040_v60 = vld [vmem:[%s5846_s15 + $0x70] sm:$0xff]  ;;  %v6043_v61 = vld [vmem:[%s5846_s15 + $0x78] sm:$0xff]  ;;  %p11172_p11 = scmp.ne.s32.totalorder %s10309_s13, 0  ;;  %s5693_s8 = smov [#allocation5]  }
  0x45   : > { %5367 = vmatpush3.bf16.msra.mxu0 %v5510_v4  ;;  %v1178_v39 = vsel %vm5868_vm4, %v5896_v13, %v949_v31  ;;  %v952_v40 = vsel %vm10156_vm6, %v5950_v32, 0.0  ;;  %v953_v41 = vsel %vm10156_vm6, %v5953_v33, 0.0  ;;  %v1408_v43 = vsel %vm5872_vm5, %v5893_v12, %v1179_v34  ;;  %v6052_v2 = vld [vmem:[%s5846_s15 + $0x80] sm:$0xff]  ;;  %v6055_v3 = vld [vmem:[%s5846_s15 + $0x88] sm:$0xff]  ;;  %s5626_s11 = sshll.u32 %s5693_s8, 4  ;;  %s5627_s11 = int_to_ptr.vmem [resolvable:$false] %s5626_s11 }
  0x46   : > { %5368 = vmatprep.subr.bf16.mxu0 %v5511_v7  ;;  %5378 = vmatprep.mubr.bf16.mxu0 %v1894_v21  ;;  %v1409_v44 = vsel %vm5872_vm5, %v5896_v13, %v1180_v35  ;;  %v1406_v45 = vsel %vm5872_vm5, %v5887_v10, %v1177_v38  ;;  %v1407_v46 = vsel %vm5872_vm5, %v5890_v11, %v1178_v39  ;;  %v10320_v47 = vsel %vm5998_vm9, 4294967295, %v10319_v47  ;;  %v6112_v35 = vld [vmem:[%s5846_s15 + $0x90] sm:$0xff]  ;;  %v6115_v38 = vld [vmem:[%s5846_s15 + $0x98] sm:$0xff]  ;;  %p5624_p12 = pnand %p5623_p6, %p11172_p11  ;;  %s5628_s18 = scalar_lea.vmem %s5627_s11, 8192 }
  0x47   : > { %10321 = vst [vmem:[#allocation11_spill] sm:$0xff] %v10320_v47  ;;  %v954_v48 = vsel %vm10156_vm6, %v5963_v36, 0.0  ;;  %v955_v49 = vsel %vm10156_vm6, %v5967_v37, 0.0  ;;  %v1637_v50 = vsel %vm5998_vm9, %v5887_v10, %v1408_v43  ;;  %v1638_v51 = vsel %vm5998_vm9, %v5890_v11, %v1409_v44  ;;  %p5629_p8 = scmp.lt.s32.totalorder %s10031_s12, %s5627_s11  ;;  %p5630_p10 = scmp.lt.s32.totalorder %s5628_s18, %s5622_s9 }
  0x48   : > { %v1181_v52 = vsel %vm5868_vm4, %v5920_v22, %v952_v40  ;;  %v1182_v53 = vsel %vm5868_vm4, %v5923_v23, %v953_v41  ;;  %v1635_v54 = vsel %vm5998_vm9, %v5881_v8, %v1406_v45  ;;  %v1636_v55 = vsel %vm5998_vm9, %v5884_v9, %v1407_v46  ;;  %v6124_v40 = vld [vmem:[%s5846_s15 + $0xa0] sm:$0xff]  ;;  %v6127_v41 = vld [vmem:[%s5846_s15 + $0xa8] sm:$0xff]  ;;  %p5625_p13 = pneg %p5624_p12 }
  0x49   : > { %5369 = vmatpush3.bf16.msra.mxu0 %v5511_v7  ;;  %v1183_v56 = vsel %vm5868_vm4, %v5950_v32, %v954_v48  ;;  %v1184_v57 = vsel %vm5868_vm4, %v5953_v33, %v955_v49  ;;  %v1866_v58 = vsel %vm10155_vm10, %v5881_v8, %v1637_v50  ;;  %v1867_v59 = vsel %vm10155_vm10, %v5884_v9, %v1638_v51  ;;  %p5631_p0 = por %p5630_p10, %p5629_p8 }
  0x4a   : > { %5370 = vmatprep.subr.bf16.mxu0 %v5512_v18  ;;  %v1410_v62 = vsel %vm5872_vm5, %v5926_v24, %v1181_v52  ;;  %v1411_v63 = vsel %vm5872_vm5, %v5929_v25, %v1182_v53  ;;  %v1895_v4 = vpack.c.bf16 %v1636_v55, %v1635_v54  ;;  %v1412_v7 = vsel %vm5872_vm5, %v5920_v22, %v1183_v56 }
  0x4b   : > { %v1413_v8 = vsel %vm5872_vm5, %v5923_v23, %v1184_v57  ;;  %v1896_v9 = vpack.c.bf16 %v1867_v59, %v1866_v58  ;;  %v956_v14 = vsel %vm10156_vm6, %v6040_v60, 0.0  ;;  %v957_v15 = vsel %vm10156_vm6, %v6043_v61, 0.0  ;;  %p5632_p2 = pnand %p5631_p0, %p5625_p13 }
  0x4c   : > { %v1639_v16 = vsel %vm5998_vm9, %v5893_v12, %v1410_v62  ;;  %v1640_v17 = vsel %vm5998_vm9, %v5896_v13, %v1411_v63  ;;  %v959_v19 = vsel %vm10156_vm6, %v6055_v3, 0.0  ;;  %v1641_v20 = vsel %vm5998_vm9, %v5926_v24, %v1412_v7  ;;  %v6184_v62 = vld [vmem:[%s5846_s15 + $0xb0] sm:$0xff]  ;;  %v6187_v63 = vld [vmem:[%s5846_s15 + $0xb8] sm:$0xff]  ;;  %v6196_v7 = vld [vmem:[%s5846_s15 + $0xc0] sm:$0xff] }
  0x4d   : > { %5371 = vmatpush3.bf16.msra.mxu0 %v5512_v18  ;;  %v958_v18 = vsel %vm10156_vm6, %v6052_v2, 0.0  ;;  %v1642_v21 = vsel %vm5998_vm9, %v5929_v25, %v1413_v8  ;;  %v1186_v27 = vsel %vm5868_vm4, %v5967_v37, %v957_v15  ;;  %v1868_v28 = vsel %vm10155_vm10, %v5887_v10, %v1639_v16  ;;  %v6199_v8 = vld [vmem:[%s5846_s15 + $0xc8] sm:$0xff] }
  0x4e   : > { %5372 = vmatprep.subr.bf16.mxu0 %v5513_v26  ;;  %v1187_v30 = vsel %vm5868_vm4, %v6040_v60, %v958_v18  ;;  %v1188_v31 = vsel %vm5868_vm4, %v6043_v61, %v959_v19  ;;  %v1870_v34 = vsel %vm10155_vm10, %v5893_v12, %v1641_v20  ;;  %v1871_v10 = vsel %vm10155_vm10, %v5896_v13, %v1642_v21 }
  0x4f   : > { %v1415_v39 = vsel %vm5872_vm5, %v5953_v33, %v1186_v27  ;;  %v1416_v13 = vsel %vm5872_vm5, %v5963_v36, %v1187_v30  ;;  %v1898_v43 = vpack.c.bf16 %v1871_v10, %v1870_v34  ;;  %v960_v44 = vsel %vm10156_vm6, %v6112_v35, 0.0 }
  0x50   : > { %v961_v45 = vsel %vm10156_vm6, %v6115_v38, 0.0  ;;  %v1644_v48 = vsel %vm5998_vm9, %v5923_v23, %v1415_v39  ;;  %v962_v49 = vsel %vm10156_vm6, %v6124_v40, 0.0  ;;  %v963_v50 = vsel %vm10156_vm6, %v6127_v41, 0.0  ;;  %v6259_v39 = vld [vmem:[%s5846_s15 + $0xd8] sm:$0xff] }
  0x51   : > { %5373 = vmatpush3.bf16.msra.mxu0 %v5513_v26  ;;  %v1185_v26 = vsel %vm5868_vm4, %v5963_v36, %v956_v14  ;;  %v1645_v51 = vsel %vm5998_vm9, %v5950_v32, %v1416_v13  ;;  %v1189_v53 = vsel %vm5868_vm4, %v6052_v2, %v960_v44  ;;  %v1190_v54 = vsel %vm5868_vm4, %v6055_v3, %v961_v45  ;;  %v6268_v13 = vld [vmem:[%s5846_s15 + $0xe0] sm:$0xff] }
  0x52   : > { %5374 = vmatprep.subr.bf16.mxu0 %v5514_v29  ;;  %v1873_v56 = vsel %vm10155_vm10, %v5929_v25, %v1644_v48  ;;  %v1191_v57 = vsel %vm5868_vm4, %v6112_v35, %v962_v49  ;;  %v1192_v58 = vsel %vm5868_vm4, %v6115_v38, %v963_v50  ;;  %v1874_v59 = vsel %vm10155_vm10, %v5920_v22, %v1645_v51 }
  0x53   : > { %v1418_v25 = vsel %vm5872_vm5, %v6040_v60, %v1189_v53  ;;  %v964_v15 = vsel %vm10156_vm6, %v6184_v62, 0.0  ;;  %v965_v16 = vsel %vm10156_vm6, %v6187_v63, 0.0  ;;  %v966_v19 = vsel %vm10156_vm6, %v6196_v7, 0.0 }
  0x54   : > { %v967_v20 = vsel %vm10156_vm6, %v6199_v8, 0.0  ;;  %v1193_v27 = vsel %vm5868_vm4, %v6124_v40, %v964_v15  ;;  %v970_v50 = vsel %vm10156_vm6, %v6268_v13, 0.0 }
  0x55   : > { %5375 = vmatpush3.bf16.msra.mxu0 %v5514_v29  ;;  %v1869_v29 = vsel %vm10155_vm10, %v5890_v11, %v1640_v17  ;;  %v1414_v11 = vsel %vm5872_vm5, %v5950_v32, %v1185_v26  ;;  %v1647_v17 = vsel %vm5998_vm9, %v5963_v36, %v1418_v25  ;;  %v1196_v34 = vsel %vm5868_vm4, %v6187_v63, %v967_v20  ;;  %v747_v25 = vld [vmem:[%s5846_s15 + $0xf0] sm:$0xff] }
  0x56   : > { %5376 = vmatprep.subr.bf16.mxu0 %v5515_v42  ;;  %v1897_v12 = vpack.c.bf16 %v1869_v29, %v1868_v28  ;;  %v1643_v46 = vsel %vm5998_vm9, %v5920_v22, %v1414_v11  ;;  %v1194_v28 = vsel %vm5868_vm4, %v6127_v41, %v965_v16  ;;  %v1876_v29 = vsel %vm10155_vm10, %v5950_v32, %v1647_v17  ;;  %v6256_v11 = vld [vmem:[%s5846_s15 + $0xd0] sm:$0xff] }
  0x57   : > { %v1872_v55 = vsel %vm10155_vm10, %v5926_v24, %v1643_v46  ;;  %v968_v45 = vsel %vm10156_vm6, %v6256_v11, 0.0  ;;  %v969_v46 = vsel %vm10156_vm6, %v6259_v39, 0.0 }
  0x58   : > { %v1899_v22 = vpack.c.bf16 %v1873_v56, %v1872_v55  ;;  %v1198_v55 = vsel %vm5868_vm4, %v6199_v8, %v969_v46  ;;  %v1434_v46 = vsel %vm5872_vm5, %v747_v25, 0.0 }
  0x59   : > { %5377 = vmatpush3.bf16.msra.mxu0 %v5515_v42  ;;  %v1417_v42 = vsel %vm5872_vm5, %v5967_v37, %v1188_v31  ;;  %v1195_v31 = vsel %vm5868_vm4, %v6184_v62, %v966_v19 }
  0x5a   : > { %v1646_v52 = vsel %vm5998_vm9, %v5953_v33, %v1417_v42  ;;  %v6271_v42 = vld [vmem:[%s5846_s15 + $0xe8] sm:$0xff] }
  0x5b   : > { %v1875_v24 = vsel %vm10155_vm10, %v5923_v23, %v1646_v52  ;;  %v1420_v23 = vsel %vm5872_vm5, %v6052_v2, %v1191_v57  ;;  %v971_v51 = vsel %vm10156_vm6, %v6271_v42, 0.0 }
  0x5c   : > { %5379 = vmatmul.mubr.bf16.vlgmr.msra.gmra.mrb[0].mxu0 %v1895_v4  ;;  %v1419_v4 = vsel %vm5872_vm5, %v6043_v61, %v1190_v54  ;;  %v1900_v14 = vpack.c.bf16 %v1875_v24, %v1874_v59  ;;  %v1649_v21 = vsel %vm5998_vm9, %v6040_v60, %v1420_v23  ;;  %v1197_v54 = vsel %vm5868_vm4, %v6196_v7, %v968_v45 }
  0x5d   : > { %5382 = vmatprep.mubr.bf16.mxu0 %v1896_v9  ;;  %v1421_v9 = vsel %vm5872_vm5, %v6055_v3, %v1192_v58  ;;  %v1648_v18 = vsel %vm5998_vm9, %v5967_v37, %v1419_v4  ;;  %v1878_v10 = vsel %vm10155_vm10, %v5963_v36, %v1649_v21  ;;  %v1199_v58 = vsel %vm5868_vm4, %v6256_v11, %v970_v50  ;;  %v748_v4 = vld [vmem:[%s5846_s15 + $0xf8] sm:$0xff] }
  0x5e   : > { %v1650_v26 = vsel %vm5998_vm9, %v6043_v61, %v1421_v9  ;;  %v1877_v30 = vsel %vm10155_vm10, %v5953_v33, %v1648_v18  ;;  %v1422_v33 = vsel %vm5872_vm5, %v6112_v35, %v1193_v27  ;;  %v1200_v59 = vsel %vm5868_vm4, %v6259_v39, %v971_v51 }
  0x5f   : > { %v1879_v32 = vsel %vm10155_vm10, %v5967_v37, %v1650_v26  ;;  %v1901_v36 = vpack.c.bf16 %v1877_v30, %v1876_v29  ;;  %v1424_v37 = vsel %vm5872_vm5, %v6124_v40, %v1195_v31  ;;  %v1651_v48 = vsel %vm5998_vm9, %v6052_v2, %v1422_v33 }
  0x60   : > { %v1902_v44 = vpack.c.bf16 %v1879_v32, %v1878_v10  ;;  %v1653_v52 = vsel %vm5998_vm9, %v6112_v35, %v1424_v37  ;;  %v1880_v56 = vsel %vm10155_vm10, %v6040_v60, %v1651_v48  ;;  %v1428_v9 = vsel %vm5872_vm5, %v6196_v7, %v1199_v58 }
  0x61   : > { %v1882_v24 = vsel %vm10155_vm10, %v6052_v2, %v1653_v52  ;;  %v1429_v2 = vsel %vm5872_vm5, %v6199_v8, %v1200_v59  ;;  %v973_v15 = vsel %vm10156_vm6, %v748_v4, 0.0  ;;  %v1657_v18 = vsel %vm5998_vm9, %v6184_v62, %v1428_v9 }
  0x62   : > { %v1658_v19 = vsel %vm5998_vm9, %v6187_v63, %v1429_v2  ;;  %v1202_v21 = vsel %vm5868_vm4, %v6271_v42, %v973_v15  ;;  %v1204_v29 = vsel %vm5868_vm4, %v748_v4, 0.0  ;;  %v1886_v30 = vsel %vm10155_vm10, %v6124_v40, %v1657_v18 }
  0x63   : > { %v1887_v31 = vsel %vm10155_vm10, %v6127_v41, %v1658_v19  ;;  %v1435_v48 = vsel %vm5872_vm5, %v748_v4, 0.0  ;;  %v6432_v52 = vshrl.u32 %v298_v0, 7 }
  0x64   : > { %5383 = vmatmul.mubr.bf16.gmra.mrb[4].mxu0 %v1897_v12  ;;  %v1423_v12 = vsel %vm5872_vm5, %v6115_v38, %v1194_v28  ;;  %v1203_v28 = vsel %vm5868_vm4, %v747_v25, 0.0  ;;  %v1906_v32 = vpack.c.bf16 %v1887_v31, %v1886_v30 }
  0x65   : > { %5386 = vmatprep.mubr.bf16.mxu0 %v1898_v43  ;;  %v1425_v43 = vsel %vm5872_vm5, %v6127_v41, %v1196_v34  ;;  %v1652_v49 = vsel %vm5998_vm9, %v6055_v3, %v1423_v12  ;;  %v1432_v10 = vsel %vm5872_vm5, %v6268_v13, %v1203_v28  ;;  %v3584_v0 = vsub.s32 7, %v6432_v52 }
  0x66   : > { %v1654_v53 = vsel %vm5998_vm9, %v6115_v38, %v1425_v43  ;;  %v1881_v57 = vsel %vm10155_vm10, %v6043_v61, %v1652_v49  ;;  %v1426_v61 = vsel %vm5872_vm5, %v6184_v62, %v1197_v54  ;;  %v1661_v12 = vsel %vm5998_vm9, %v6256_v11, %v1432_v10 }
  0x67   : > { %v1883_v60 = vsel %vm10155_vm10, %v6055_v3, %v1654_v53  ;;  %v1903_v23 = vpack.c.bf16 %v1881_v57, %v1880_v56  ;;  %v1655_v16 = vsel %vm5998_vm9, %v6124_v40, %v1426_v61  ;;  %v1433_v40 = vsel %vm5872_vm5, %v6271_v42, %v1204_v29 }
  0x68   : > { %v1904_v3 = vpack.c.bf16 %v1883_v60, %v1882_v24  ;;  %v1884_v26 = vsel %vm10155_vm10, %v6112_v35, %v1655_v16  ;;  %v2535_v53 = vsub.s32 1, %v6432_v52  ;;  %v6446_v56 = vadd.s32 24, %v6432_v52  ;;  %v6475_v16 = vld [vmem:[%s10081_s2] ss:$0 sm:$0xff] }
  0x69   : > { %v3224_v24 = vsub.s32 5, %v6432_v52  ;;  %v3420_v60 = vsub.s32 6, %v6432_v52  ;;  %v2992_v4 = vsub.s32 3, %v6432_v52  ;;  %vm10157_vm11 = vcmp.lt.s32.totalorder %v6432_v52, 1 }
  0x6a   : > { %10322 = vst [vmem:[#allocation12_spill] sm:$0xff] %v6446_v56  ;;  %v6464_v2 = vadd.s32 48, %v6432_v52  ;;  %vm10162_vm12 = vcmp.lt.s32.totalorder %v6432_v52, 7  ;;  %v6481_v18 = vadd.s32 64, %v6432_v52  ;;  %v6484_v19 = vadd.s32 80, %v6432_v52 }
  0x6b   : > { %v6497_v28 = vadd.s32 72, %v6432_v52  ;;  %v6502_v31 = vadd.s32 88, %v6432_v52 }
  0x6c   : > { %5387 = vmatmul.mubr.bf16.gmra.mrb[8].mxu0 %v1899_v22  ;;  %v1427_v22 = vsel %vm5872_vm5, %v6187_v63, %v1198_v55  ;;  %10323 = vst [vmem:[#allocation13_spill] sm:$0xff] %v6464_v2  ;;  %10326 = vst [vmem:[#allocation16_spill] sm:$0xff] %v6481_v18 }
  0x6d   : > { %5390 = vmatprep.mubr.bf16.mxu0 %v1900_v14  ;;  %v972_v14 = vsel %vm10156_vm6, %v747_v25, 0.0  ;;  %v1656_v17 = vsel %vm5998_vm9, %v6127_v41, %v1427_v22  ;;  %v10089_v25 = vand.u32 15, %v6446_v56  ;;  %10327 = vst [vmem:[#allocation17_spill] sm:$0xff] %v6484_v19  ;;  %10331 = vst [vmem:[#allocation19_spill] sm:$0xff] %v6497_v28 }
  0x6e   : > { %v1201_v20 = vsel %vm5868_vm4, %v6268_v13, %v972_v14  ;;  %v1885_v27 = vsel %vm10155_vm10, %v6115_v38, %v1656_v17  ;;  %v1431_v38 = vsel %vm5872_vm5, %v6259_v39, %v1202_v21  ;;  %v6470_v14 = vadd.s32 56, %v6432_v52  ;;  %10333 = vst [vmem:[#allocation21_spill] sm:$0xff] %v6502_v31 }
  0x6f   : > { %v1430_v35 = vsel %vm5872_vm5, %v6256_v11, %v1201_v20  ;;  %v1905_v34 = vpack.c.bf16 %v1885_v27, %v1884_v26  ;;  %v1660_v33 = vsel %vm5998_vm9, %v6199_v8, %v1431_v38  ;;  %vm6490_vm13 = vcmp.lt.s32.totalorder %v10089_v25, 15 }
  0x70   : > { %v1659_v41 = vsel %vm5998_vm9, %v6196_v7, %v1430_v35  ;;  %v1889_v43 = vsel %vm10155_vm10, %v6187_v63, %v1660_v33  ;;  %v1663_v63 = vsel %vm5998_vm9, %v6268_v13, %v1434_v46  ;;  %v2371_v13 = vsub.s32 0, %v6432_v52  ;;  %10325 = vst [vmem:[#allocation15_spill] sm:$0xff] %v6470_v14 }
  0x71   : > { %v1888_v37 = vsel %vm10155_vm10, %v6184_v62, %v1659_v41  ;;  %v10328_v26 = vmov 0  ;;  %v6505_v35 = vadd.s32 96, %v6432_v52  ;;  %v6508_v38 = vadd.s32 112, %v6432_v52 }
  0x72   : > { %v1907_v49 = vpack.c.bf16 %v1889_v43, %v1888_v37  ;;  %v10329_v26 = vsel %vm6490_vm13, 4294967295, %v10328_v26  ;;  %v10099_v33 = vand.u32 15, %v6481_v18  ;;  %v6522_v37 = vadd.s32 120, %v6432_v52 }
  0x73   : > { %10330 = vst [vmem:[#allocation18_spill] sm:$0xff] %v10329_v26  ;;  %10334 = vst [vmem:[#allocation22_spill] sm:$0xff] %v6505_v35 }
  0x74   : > { %5391 = vmatmul.mubr.bf16.gmra.mrb[12].mxu0 %v1901_v36  ;;  %v1662_v36 = vsel %vm5998_vm9, %v6259_v39, %v1433_v40  ;;  %10335 = vst [vmem:[#allocation23_spill] sm:$0xff] %v6508_v38  ;;  %v10088_v40 = vand.u32 15, %v6464_v2  ;;  %10338 = vst [vmem:[#allocation26_spill] sm:$0xff] %v6522_v37  ;;  %vm6640_vm0 = vcmp.ge.s32.totalorder %v10099_v33, 1  ;;  %v6710_v37 = vadd.s32 184, %v6432_v52 }
  0x75   : > { %5394 = vmatprep.mubr.bf16.mxu0 %v1902_v44  ;;  %v1890_v44 = vsel %vm10155_vm10, %v6196_v7, %v1661_v12  ;;  %v1891_v45 = vsel %vm10155_vm10, %v6199_v8, %v1662_v36  ;;  %v1664_v7 = vsel %vm5998_vm9, %v6271_v42, %v1435_v48  ;;  %v1892_v8 = vsel %vm10155_vm10, %v6256_v11, %v1663_v63  ;;  %v2142_v42 = vld [vmem:[%s10082_s3] sm:$0xff] }
  0x76   : > { %v1908_v62 = vpack.c.bf16 %v1891_v45, %v1890_v44  ;;  %v1893_v50 = vsel %vm10155_vm10, %v6259_v39, %v1664_v7  ;;  %v6439_v54 = vrot.slane %v2142_v42, %v2371_v13  ;;  %v2828_v11 = vsub.s32 2, %v6432_v52  ;;  %10372 = vst [vmem:[#allocation49_spill] sm:$0xff] %v6710_v37 }
  0x77   : > { %v1909_v51 = vpack.c.bf16 %v1893_v50, %v1892_v8  ;;  %v6442_v55 = vrot.slane %v2142_v42, %v2535_v53  ;;  %v3060_v39 = vsub.s32 4, %v6432_v52  ;;  %v6459_v22 = vrot.slane %v2142_v42, %v3584_v0 }
  0x78   : > { %v6449_v57 = vrot.slane %v2142_v42, %v2828_v11  ;;  %v2373_v58 = vmul.f32 0.0, %v6439_v54  ;;  %v6478_v17 = vrot.slane %v2142_v42, %v3224_v24  ;;  %v6486_v21 = vrot.slane %v2142_v42, %v3420_v60 }
  0x79   : > { %v2537_v59 = vmul.f32 0.0, %v6442_v55  ;;  %v6457_v61 = vrot.slane %v2142_v42, %v3060_v39  ;;  %v6494_v27 = vrot.slane %v2142_v42, %v2992_v4  ;;  %v6519_v36 = vadd.s32 104, %v6432_v52 }
  0x7a   : > { %v2830_v9 = vmul.f32 0.0, %v6449_v57  ;;  %v6538_v63 = vadd.s32 128, %v6432_v52  ;;  %vm6562_vm14 = vcmp.ge.s32.totalorder %v10088_v40, 1  ;;  %v10344_v4 = vmov 0 }
  0x7b   : > { %10337 = vst [vmem:[#allocation25_spill] sm:$0xff] %v6519_v36  ;;  %v10345_v4 = vsel %vm6562_vm14, 4294967295, %v10344_v4  ;;  %v6604_v48 = vadd.s32 136, %v6432_v52 }
  0x7c   : > { %5395 = vmatmul.mubr.bf16.gmra.mrb[16].mxu0 %v1903_v23  ;;  %v2569_v23 = vadd.f32 %v2537_v59, %v2373_v58  ;;  %10341 = vst [vmem:[#allocation29_spill] sm:$0xff] %v6538_v63  ;;  %10346 = vst [vmem:[#allocation32_spill] sm:$0xff] %v10345_v4 }
  0x7d   : > { %5398 = vmatprep.mubr.bf16.mxu0 %v1904_v3  ;;  %v6467_v3 = vadd.s32 40, %v6432_v52  ;;  %10350 = vst [vmem:[#allocation36_spill] sm:$0xff] %v6604_v48 }
  0x7e   : > { %v6499_v30 = vadd.f32 %v2830_v9, %v2569_v23 }
  0x7f   : > { %10324 = vst [vmem:[#allocation14_spill] sm:$0xff] %v6467_v3 }
  0x80   : > { %10332 = vst [vmem:[#allocation20_spill] sm:$0xff] %v6499_v30 }
  0x84   : > { %5399 = vmatmul.mubr.bf16.gmra.mrb[20].mxu0 %v1905_v34 }
  0x85   : > { %5402 = vmatprep.mubr.bf16.mxu0 %v1906_v32  ;;  %v10094_v32 = vand.u32 15, %v6467_v3 }
  0x87   : > { %vm6611_vm15 = vcmp.lt.s32.totalorder %v10094_v32, 15 }
  0x8c   : > { %5403 = vmatmul.mubr.bf16.gmra.mrb[24].mxu0 %v1907_v49 }
  0x8d   : > { %5406 = vmatprep.mubr.bf16.mxu0 %v1908_v62 }
  0x94   : > { %5407 = vmatmul.mubr.bf16.gmra.mrb[28].mxu0 %v1909_v51 }
 0x12f   : > { %v5380_v15 = vpop.f32.mrb[0].mxu0 }
 0x130   : > { %v2015_v20 = vpop.f32.mrb[1].mxu0  ;;  %v6511_v34 = vadd.f32 %v5380_v15, %v6475_v16 }
 0x131   : > { %v5381_v29 = vpop.f32.mrb[2].mxu0  ;;  %v6525_v43 = vadd.f32 %v6475_v16, %v2015_v20 }
 0x132   : > { %10336 = vst [vmem:[#allocation24_spill] sm:$0xff] %v6511_v34  ;;  %v2018_v10 = vpop.f32.mrb[3].mxu0  ;;  %v6528_v44 = vadd.f32 %v5381_v29, %v6475_v16  ;;  %v10090_v7 = vrot.slane %v6511_v34, 7  ;;  %v2603_v8 = vrot.slane %v6511_v34, 1  ;;  %v6572_v29 = vadd.s32 144, %v6432_v52 }
 0x133   : > { %10339 = vst [vmem:[#allocation27_spill] sm:$0xff] %v6525_v43  ;;  %v6531_v45 = vadd.f32 %v6475_v16, %v2018_v10  ;;  %v10091_v0 = vrot.slane %v6525_v43, 7  ;;  %v10093_v58 = vrot.slane %v6525_v43, 1 }
 0x134   : > { %v2147_v50 = vrot.slane %v6528_v44, 7  ;;  %v2604_v51 = vrot.slane %v6528_v44, 1  ;;  %v2542_v9 = vmul.f32 %v6442_v55, %v6528_v44  ;;  %10347 = vst [vmem:[#allocation33_spill] sm:$0xff] %v6572_v29  ;;  %v3065_v49 = vmul.f32 %v6457_v61, %v6528_v44 }
 0x135   : > { %10340 = vst [vmem:[#allocation28_spill] sm:$0xff] %v6531_v45  ;;  %v10092_v13 = vrot.slane %v6531_v45, 7  ;;  %v2602_v53 = vrot.slane %v6531_v45, 1  ;;  %v2540_v40 = vmul.f32 %v6442_v55, %v6531_v45 }
 0x136   : > { %v6554_v59 = vsel %vm10157_vm11, %v10090_v7, %v2147_v50  ;;  %v6558_v24 = vsel %vm10162_vm12, %v2603_v8, %v2604_v51 }
 0x137   : > { %v5384_v42 = vpop.f32.mrb[4].mxu0  ;;  %10342 = vst [vmem:[#allocation30_spill] sm:$0xff] %v6554_v59  ;;  %10343 = vst [vmem:[#allocation31_spill] sm:$0xff] %v6558_v24  ;;  %v2378_v23 = vmul.f32 %v6439_v54, %v6554_v59  ;;  %v2207_v10 = vsel %vm10157_vm11, %v10091_v0, %v10092_v13  ;;  %v6584_v25 = vsel %vm10162_vm12, %v2602_v53, %v2603_v8 }
 0x138   : > { %v2031_v60 = vpop.f32.mrb[5].mxu0  ;;  %10348 = vst [vmem:[#allocation34_spill] sm:$0xff] %v6584_v25  ;;  %v6590_v7 = vsel %vm10162_vm12, %v10093_v58, %v2602_v53  ;;  %v2376_v11 = vmul.f32 %v6439_v54, %v2207_v10  ;;  %v2797_v0 = vsel %vm6490_vm13, %v6584_v25, 0.0  ;;  %v6599_v13 = vadd.f32 %v5384_v42, %v6475_v16 }
 0x139   : > { %v5385_v15 = vpop.f32.mrb[6].mxu0  ;;  %10349 = vst [vmem:[#allocation35_spill] sm:$0xff] %v6590_v7  ;;  %v6592_v20 = vadd.f32 %v2542_v9, %v2378_v23  ;;  %v2833_v8 = vmul.f32 %v6449_v57, %v2797_v0  ;;  %v2995_v62 = vmul.f32 %v6494_v27, %v2207_v10  ;;  %v6607_v53 = vadd.s32 152, %v6432_v52 }
 0x13a   : > { %v2034_v39 = vpop.f32.mrb[7].mxu0  ;;  %v2572_v23 = vadd.f32 %v2540_v40, %v2376_v11  ;;  %v10352_v9 = vmov 0  ;;  %v6616_v42 = vadd.s32 160, %v6432_v52  ;;  %v6619_v0 = vadd.s32 176, %v6432_v52 }
 0x13b   : > { %10351 = vst [vmem:[#allocation37_spill] sm:$0xff] %v6607_v53  ;;  %v10353_v9 = vsel %vm6611_vm15, 4294967295, %v10352_v9  ;;  %v6622_v10 = vadd.s32 168, %v6432_v52  ;;  %v3027_v58 = vadd.f32 %v2995_v62, %v6499_v30  ;;  %v3063_v40 = vmul.f32 %v6457_v61, %v6531_v45 }
 0x13c   : > { %10354 = vst [vmem:[#allocation38_spill] sm:$0xff] %v10353_v9  ;;  %10355 = vst [vmem:[#allocation39_spill] sm:$0xff] %v6616_v42  ;;  %v6628_v11 = vadd.f32 %v6475_v16, %v2031_v60  ;;  %v6631_v32 = vadd.f32 %v5385_v15, %v6475_v16  ;;  %v2865_v46 = vadd.f32 %v2833_v8, %v2572_v23  ;;  %v2150_v41 = vrot.slane %v6599_v13, 7 }
 0x13d   : > { %10356 = vst [vmem:[#allocation40_spill] sm:$0xff] %v6619_v0  ;;  %10357 = vst [vmem:[#allocation41_spill] sm:$0xff] %v6622_v10  ;;  %v2997_v12 = vmul.f32 %v6494_v27, %v6554_v59  ;;  %v10359_v62 = vmov 0  ;;  %v10362_v60 = vand.u32 15, %v6470_v14  ;;  %v10363_v15 = vmov 0 }
 0x13e   : > { %10358 = vst [vmem:[#allocation42_spill] sm:$0xff] %v6628_v11  ;;  %v10360_v62 = vsel %vm6640_vm0, 4294967295, %v10359_v62  ;;  %v6652_v8 = vadd.f32 %v3063_v40, %v3027_v58  ;;  %v2607_v23 = vrot.slane %v6599_v13, 1  ;;  %v2148_v6 = vrot.slane %v6628_v11, 7 }
 0x13f   : > { %10361 = vst [vmem:[#allocation43_spill] sm:$0xff] %v10360_v62  ;;  %vm6646_vm1 = vcmp.lt.s32.totalorder %v10362_v60, 15  ;;  %v6650_v2 = vpop.f32.mrb[8].mxu0  ;;  %v2605_v18 = vrot.slane %v6628_v11, 1  ;;  %v3029_v1 = vadd.f32 %v2997_v12, %v2865_v46  ;;  %v2543_v14 = vmul.f32 %v6442_v55, %v6628_v11 }
 0x140   : > { %v10364_v15 = vsel %vm6646_vm1, 4294967295, %v10363_v15  ;;  %10366 = vst [vmem:[#allocation45_spill] sm:$0xff] %v6652_v8  ;;  %v6657_v33 = vpop.f32.mrb[9].mxu0  ;;  %v6663_v47 = vadd.f32 %v6475_v16, %v2034_v39  ;;  %v6669_v58 = vsel %vm10157_vm11, %v2147_v50, %v2148_v6  ;;  %v2546_v12 = vmul.f32 %v6442_v55, %v6631_v32 }
 0x141   : > { %10365 = vst [vmem:[#allocation44_spill] sm:$0xff] %v10364_v15  ;;  %v6665_v5 = vpop.f32.mrb[10].mxu0  ;;  %10367 = vst [vmem:[#allocation46_spill] sm:$0xff] %v6669_v58  ;;  %v6673_v40 = vsel %vm10162_vm12, %v2604_v51, %v2605_v18  ;;  %v3097_v60 = vadd.f32 %v3065_v49, %v3029_v1  ;;  %v2343_v39 = vsel %vm6562_vm14, %v6669_v58, 0.0  ;;  %v10369_v56 = vrot.slane %v6631_v32, 7 }
 0x142   : > { %10368 = vst [vmem:[#allocation47_spill] sm:$0xff] %v6673_v40  ;;  %v6678_v3 = vpop.f32.mrb[11].mxu0  ;;  %v3193_v50 = vsel %vm6490_vm13, %v6673_v40, 0.0  ;;  %v2379_v8 = vmul.f32 %v6439_v54, %v2343_v39  ;;  %v10370_v49 = vrot.slane %v6631_v32, 1  ;;  %v2149_v7 = vrot.slane %v6663_v47, 7 }
 0x143   : > { %v6690_v51 = vsel %vm10157_vm11, %v2150_v41, %v10369_v56  ;;  %v3229_v46 = vmul.f32 %v6478_v17, %v3193_v50  ;;  %v6717_v58 = vadd.s32 192, %v6432_v52  ;;  %v10378_v42 = vand.u32 15, %v6484_v19 }
 0x144   : > { %v2382_v1 = vmul.f32 %v6439_v54, %v6690_v51  ;;  %v6700_v30 = vsel %vm10162_vm12, %v2607_v23, %v10370_v49  ;;  %v2575_v39 = vadd.f32 %v2543_v14, %v2379_v8  ;;  %v2606_v49 = vrot.slane %v6663_v47, 1 }
 0x145   : > { %10371 = vst [vmem:[#allocation48_spill] sm:$0xff] %v6700_v30  ;;  %10373 = vst [vmem:[#allocation50_spill] sm:$0xff] %v6717_v58  ;;  %v2545_v14 = vmul.f32 %v6442_v55, %v6599_v13  ;;  %v2544_v8 = vmul.f32 %v6442_v55, %v6663_v47  ;;  %v6731_v45 = vsel %vm10157_vm11, %v2149_v7, %v2150_v41  ;;  %vm6762_vm2 = vcmp.ge.s32.totalorder %v10378_v42, 1 }
 0x146   : > { %v6706_v11 = vadd.f32 %v2546_v12, %v2382_v1  ;;  %v2799_v12 = vsel %vm6611_vm15, %v6673_v40, 0.0  ;;  %v3261_v1 = vadd.f32 %v3229_v46, %v3097_v60  ;;  %10374 = vst [vmem:[#allocation51_spill] sm:$0xff] %v6731_v45  ;;  %v2203_v56 = vsel %vm10157_vm11, %v2148_v6, %v2149_v7 }
 0x147   : > { %v6714_v63 = vpop.f32.mrb[12].mxu0  ;;  %v2659_v25 = vsel %vm10162_vm12, %v2606_v49, %v2607_v23  ;;  %v6739_v10 = vsel %vm10162_vm12, %v2605_v18, %v2606_v49  ;;  %v2345_v60 = vsel %vm6640_vm0, %v6731_v45, 0.0  ;;  %v2380_v46 = vmul.f32 %v6439_v54, %v2203_v56 }
 0x148   : > { %v6727_v50 = vpop.f32.mrb[13].mxu0  ;;  %10375 = vst [vmem:[#allocation52_spill] sm:$0xff] %v6739_v10  ;;  %v2801_v41 = vsel %vm6646_vm1, %v2659_v25, 0.0  ;;  %v2835_v6 = vmul.f32 %v6449_v57, %v2799_v12  ;;  %v3001_v23 = vmul.f32 %v6494_v27, %v6690_v51  ;;  %v2836_v18 = vmul.f32 %v6449_v57, %v6739_v10 }
 0x149   : > { %v6741_v0 = vpop.f32.mrb[14].mxu0  ;;  %v2837_v49 = vmul.f32 %v6449_v57, %v2801_v41  ;;  %v2964_v40 = vsel %vm6562_vm14, %v6731_v45, 0.0  ;;  %v10379_v53 = vmov 0  ;;  %v2381_v12 = vmul.f32 %v6439_v54, %v2345_v60 }
 0x14a   : > { %10376 = vst [vmem:[#allocation53_spill] sm:$0xff] %v6741_v0  ;;  %v6750_v7 = vpop.f32.mrb[15].mxu0  ;;  %v10380_v53 = vsel %vm6762_vm2, 4294967295, %v10379_v53  ;;  %v2576_v48 = vadd.f32 %v2544_v8, %v2380_v46  ;;  %v2867_v29 = vadd.f32 %v2835_v6, %v6592_v20  ;;  %v2868_v10 = vadd.f32 %v2836_v18, %v2575_v39 }
 0x14b   : > { %10377 = vst [vmem:[#allocation54_spill] sm:$0xff] %v6750_v7  ;;  %10381 = vst [vmem:[#allocation55_spill] sm:$0xff] %v10380_v53  ;;  %v2999_v7 = vmul.f32 %v6494_v27, %v2203_v56  ;;  %v3000_v41 = vmul.f32 %v6494_v27, %v2964_v40  ;;  %v3195_v0 = vsel %vm6611_vm15, %v2659_v25, 0.0  ;;  %v3425_v45 = vmul.f32 %v6486_v21, %v2203_v56 }
 0x14c   : > { %v2869_v19 = vadd.f32 %v2837_v49, %v2576_v48  ;;  %v3067_v59 = vmul.f32 %v6457_v61, %v6663_v47  ;;  %v3749_v8 = vsel %vm6490_vm13, %v2659_v25, 0.0  ;;  %v3068_v20 = vmul.f32 %v6457_v61, %v6599_v13  ;;  %v6786_v48 = vld [vmem:[%s10082_s3 + $0x8] ss:$0 sm:$0xff] }
 0x14d   : > { %v3031_v42 = vadd.f32 %v2999_v7, %v2867_v29  ;;  %v3032_v60 = vadd.f32 %v3000_v41, %v2868_v10  ;;  %v3457_v39 = vadd.f32 %v3425_v45, %v3261_v1  ;;  %v3589_v40 = vmul.f32 %v6459_v22, %v6663_v47 }
 0x14e   : > { %v6788_v29 = vadd.f32 %v3001_v23, %v2869_v19  ;;  %v3231_v25 = vmul.f32 %v6478_v17, %v3195_v0  ;;  %v6793_v6 = vadd.f32 %v6475_v16, %v6657_v33  ;;  %v3785_v47 = vmul.f32 %v6786_v48, %v3749_v8 }
 0x14f   : > { %v6781_v46 = vpop.f32.mrb[16].mxu0  ;;  %v3099_v56 = vadd.f32 %v3067_v59, %v3031_v42  ;;  %v3621_v10 = vadd.f32 %v3589_v40, %v3457_v39  ;;  %v2577_v1 = vadd.f32 %v2545_v14, %v2381_v12  ;;  %v3100_v7 = vadd.f32 %v3068_v20, %v3032_v60 }
 0x150   : > { %10382 = vst [vmem:[#allocation56_spill] sm:$0xff] %v6781_v46  ;;  %v6795_v45 = vpop.f32.mrb[17].mxu0  ;;  %v2838_v19 = vmul.f32 %v6449_v57, %v6700_v30  ;;  %v3427_v59 = vmul.f32 %v6486_v21, %v6690_v51  ;;  %v3232_v49 = vmul.f32 %v6478_v17, %v6700_v30  ;;  %v3591_v14 = vmul.f32 %v6459_v22, %v6631_v32 }
 0x151   : > { %10383 = vst [vmem:[#allocation57_spill] sm:$0xff] %v6795_v45  ;;  %v6798_v18 = vpop.f32.mrb[18].mxu0  ;;  %v3263_v0 = vadd.f32 %v3231_v25, %v3099_v56  ;;  %v6811_v12 = vadd.f32 %v3785_v47, %v3621_v10  ;;  %v10140_v41 = vrot.slane %v6793_v6, 7  ;;  %v6816_v8 = vadd.f32 %v6650_v2, %v6475_v16 }
 0x152   : > { %10384 = vst [vmem:[#allocation58_spill] sm:$0xff] %v6798_v18  ;;  %v6804_v23 = vpop.f32.mrb[19].mxu0  ;;  %v10139_v51 = vrot.slane %v6793_v6, 1  ;;  %v2870_v20 = vadd.f32 %v2838_v19, %v2577_v1  ;;  %v10386_v60 = vrot.slane %v6631_v32, 7  ;;  %v3264_v40 = vadd.f32 %v3232_v49, %v3100_v7 }
 0x153   : > { %10385 = vst [vmem:[#allocation59_spill] sm:$0xff] %v6804_v23  ;;  %v3459_v42 = vadd.f32 %v3427_v59, %v3263_v0  ;;  %v6827_v56 = vadd.f32 %v6665_v5, %v6475_v16  ;;  %v10387_v25 = vand.u32 15, %v6497_v28  ;;  %v10388_v2 = vmov 0 }
 0x154   : > { %v2200_v39 = vsel %vm10157_vm11, %v10386_v60, %v10140_v41  ;;  %v10391_v7 = vrot.slane %v6631_v32, 1  ;;  %v6848_v59 = vmul.f32 %v6442_v55, %v6511_v34  ;;  %v2547_v49 = vmul.f32 %v6442_v55, %v6793_v6 }
 0x155   : > { %vm6831_vm3 = vcmp.lt.s32.totalorder %v10387_v25, 15  ;;  %v3623_v47 = vadd.f32 %v3591_v14, %v3459_v42  ;;  %v2347_v1 = vsel %vm6762_vm2, %v2200_v39, 0.0  ;;  %v2966_v19 = vsel %vm6640_vm0, %v2200_v39, 0.0 }
 0x156   : > { %v10389_v2 = vsel %vm6831_vm3, 4294967295, %v10388_v2  ;;  %v2657_v5 = vsel %vm10162_vm12, %v10391_v7, %v10139_v51  ;;  %10392 = vst [vmem:[#allocation61_spill] sm:$0xff] %v6848_v59  ;;  %v2383_v0 = vmul.f32 %v6439_v54, %v2347_v1  ;;  %v3002_v14 = vmul.f32 %v6494_v27, %v2966_v19 }
 0x157   : > { %10390 = vst [vmem:[#allocation60_spill] sm:$0xff] %v10389_v2  ;;  %v10393_v42 = vand.u32 15, %v6505_v35  ;;  %v10394_v60 = vmov 0  ;;  %v10397_v25 = vand.u32 15, %v6502_v31  ;;  %v10398_v7 = vmov 0  ;;  %v6866_v33 = vpop.f32.mrb[20].mxu0 }
 0x158   : > { %10401 = vst [vmem:[#allocation64_spill] sm:$0xff] %v6866_v33  ;;  %v6870_v1 = vmul.f32 %v6457_v61, %v6511_v34  ;;  %v2154_v19 = vrot.slane %v6816_v8, 7  ;;  %v3751_v10 = vsel %vm6611_vm15, %v2657_v5, 0.0  ;;  %v6877_v51 = vpop.f32.mrb[21].mxu0  ;;  %v3034_v41 = vadd.f32 %v3002_v14, %v2870_v20 }
 0x159   : > { %vm6856_vm7 = vcmp.ge.s32.totalorder %v10393_v42, 1  ;;  %vm6862_vm8 = vcmp.lt.s32.totalorder %v10397_v25, 15  ;;  %v3392_v42 = vsel %vm6562_vm14, %v2200_v39, 0.0  ;;  %10403 = vst [vmem:[#allocation66_spill] sm:$0xff] %v6877_v51  ;;  %v2579_v25 = vadd.f32 %v2547_v49, %v2383_v0  ;;  %v6882_v28 = vpop.f32.mrb[22].mxu0 }
 0x15a   : > { %v10395_v60 = vsel %vm6856_vm7, 4294967295, %v10394_v60  ;;  %v10399_v7 = vsel %vm6862_vm8, 4294967295, %v10398_v7  ;;  %10402 = vst [vmem:[#allocation65_spill] sm:$0xff] %v6870_v1  ;;  %v3070_v35 = vmul.f32 %v6457_v61, %v6793_v6  ;;  %v3428_v31 = vmul.f32 %v6486_v21, %v3392_v42  ;;  %10404 = vst [vmem:[#allocation67_spill] sm:$0xff] %v6882_v28  ;;  %v6888_v9 = vpop.f32.mrb[23].mxu0 }
 0x15b   : > { %10396 = vst [vmem:[#allocation62_spill] sm:$0xff] %v10395_v60  ;;  %10400 = vst [vmem:[#allocation63_spill] sm:$0xff] %v10399_v7  ;;  %v2611_v26 = vrot.slane %v6816_v8, 1  ;;  %v3787_v1 = vmul.f32 %v6786_v48, %v3751_v10  ;;  %v10148_v39 = vrot.slane %v6827_v56, 7  ;;  %v10147_v4 = vrot.slane %v6827_v56, 1 }
 0x15c   : > { %10405 = vst [vmem:[#allocation68_spill] sm:$0xff] %v6888_v9  ;;  %v3102_v59 = vadd.f32 %v3070_v35, %v3034_v41  ;;  %v3197_v20 = vsel %vm6646_vm1, %v2657_v5, 0.0  ;;  %v3460_v0 = vadd.f32 %v3428_v31, %v3264_v40  ;;  %v3592_v49 = vmul.f32 %v6459_v22, %v6793_v6 }
 0x15d   : > { %v6894_v14 = vadd.f32 %v3787_v1, %v3623_v47  ;;  %v2197_v10 = vsel %vm10157_vm11, %v2154_v19, %v10148_v39  ;;  %v6904_v42 = vsel %vm10162_vm12, %v2611_v26, %v10147_v4  ;;  %v2051_v35 = vadd.f32 %v6475_v16, %v6678_v3 }
 0x15e   : > { %v6910_v31 = vmul.f32 %v6459_v22, %v6511_v34  ;;  %v3624_v41 = vadd.f32 %v3592_v49, %v3460_v0  ;;  %v2386_v40 = vmul.f32 %v6439_v54, %v2197_v10  ;;  %v2550_v47 = vmul.f32 %v6442_v55, %v6827_v56 }
 0x15f   : > { %10406 = vst [vmem:[#allocation69_spill] sm:$0xff] %v6894_v14  ;;  %v3069_v1 = vmul.f32 %v6457_v61, %v6631_v32  ;;  %v2549_v4 = vmul.f32 %v6442_v55, %v6816_v8  ;;  %v3594_v39 = vmul.f32 %v6459_v22, %v6816_v8  ;;  %v3233_v3 = vmul.f32 %v6478_v17, %v3197_v20  ;;  %v6925_v34 = vpop.f32.mrb[24].mxu0 }
 0x160   : > { %10407 = vst [vmem:[#allocation70_spill] sm:$0xff] %v6910_v31  ;;  %v6922_v9 = vadd.f32 %v2550_v47, %v2386_v40  ;;  %v3005_v0 = vmul.f32 %v6494_v27, %v2197_v10  ;;  %v2153_v49 = vrot.slane %v2051_v35, 7  ;;  %v2610_v31 = vrot.slane %v2051_v35, 1  ;;  %10408 = vst [vmem:[#allocation71_spill] sm:$0xff] %v6925_v34  ;;  %v6932_v33 = vpop.f32.mrb[25].mxu0 }
 0x161   : > { %v2548_v28 = vmul.f32 %v6442_v55, %v2051_v35  ;;  %v2803_v32 = vsel %vm6831_vm3, %v2657_v5, 0.0  ;;  %v3071_v37 = vmul.f32 %v6457_v61, %v2051_v35  ;;  %v3101_v58 = vadd.f32 %v3069_v1, %v6788_v29  ;;  %10409 = vst [vmem:[#allocation72_spill] sm:$0xff] %v6932_v33  ;;  %v6946_v51 = vpop.f32.mrb[26].mxu0 }
 0x162   : > { %v2198_v20 = vsel %vm10157_vm11, %v2153_v49, %v2154_v19  ;;  %v10410_v40 = vrot.slane %v6793_v6, 7  ;;  %v2655_v34 = vsel %vm10162_vm12, %v2610_v31, %v2611_v26  ;;  %v10411_v14 = vrot.slane %v6793_v6, 1  ;;  %10412 = vst [vmem:[#allocation73_spill] sm:$0xff] %v6946_v51 }
 0x163   : > { %v2349_v29 = vsel %vm6856_vm7, %v2198_v20, 0.0  ;;  %v2805_v1 = vsel %vm6862_vm8, %v2655_v34, 0.0  ;;  %v10414_v30 = vand.u32 15, %v6508_v38  ;;  %vm10728_vm15 = vcmp.lt.s32.totalorder %v6432_v52, 1 }
 0x164   : > { %v2199_v47 = vsel %vm10157_vm11, %v10410_v40, %v2153_v49  ;;  %v2656_v5 = vsel %vm10162_vm12, %v10411_v14, %v2610_v31  ;;  %v2839_v49 = vmul.f32 %v6449_v57, %v2803_v32  ;;  %v6954_v40 = vpop.f32.mrb[27].mxu0  ;;  %v2385_v26 = vmul.f32 %v6439_v54, %v2349_v29 }
 0x165   : > { %v2384_v19 = vmul.f32 %v6439_v54, %v2199_v47  ;;  %10413 = vst [vmem:[#allocation74_spill] sm:$0xff] %v6954_v40  ;;  %v2840_v6 = vmul.f32 %v6449_v57, %v2656_v5  ;;  %v2841_v14 = vmul.f32 %v6449_v57, %v2805_v1  ;;  %v2968_v31 = vsel %vm6762_vm2, %v2198_v20, 0.0 }
 0x166   : > { %v2871_v33 = vadd.f32 %v2839_v49, %v6706_v11  ;;  %v3003_v23 = vmul.f32 %v6494_v27, %v2199_v47  ;;  %v3004_v18 = vmul.f32 %v6494_v27, %v2968_v31  ;;  %v3199_v32 = vsel %vm6831_vm3, %v2655_v34, 0.0 }
 0x167   : > { %v2580_v51 = vadd.f32 %v2548_v28, %v2384_v19  ;;  %v2872_v46 = vadd.f32 %v2840_v6, %v2579_v25  ;;  %v3234_v29 = vmul.f32 %v6478_v17, %v2656_v5  ;;  %v3265_v40 = vadd.f32 %v3233_v3, %v3101_v58  ;;  %v6978_v58 = vpop.f32.mrb[28].mxu0 }
 0x168   : > { %vm6969_vm10 = vcmp.ge.s32.totalorder %v10414_v30, 1  ;;  %v10415_v1 = vmov 0  ;;  %v3035_v19 = vadd.f32 %v3003_v23, %v2871_v33  ;;  %v3235_v11 = vmul.f32 %v6478_v17, %v3199_v32  ;;  %10418 = vst [vmem:[#allocation76_spill] sm:$0xff] %v6978_v58  ;;  %v6985_v33 = vpop.f32.mrb[29].mxu0 }
 0x169   : > { %v10416_v1 = vsel %vm6969_vm10, 4294967295, %v10415_v1  ;;  %v2873_v28 = vadd.f32 %v2841_v14, %v2580_v51  ;;  %v3394_v49 = vsel %vm6640_vm0, %v2198_v20, 0.0  ;;  %v3036_v25 = vadd.f32 %v3004_v18, %v2872_v46  ;;  %10419 = vst [vmem:[#allocation77_spill] sm:$0xff] %v6985_v33 }
 0x16a   : > { %10417 = vst [vmem:[#allocation75_spill] sm:$0xff] %v10416_v1  ;;  %v3266_v6 = vadd.f32 %v3234_v29, %v3102_v59  ;;  %v3429_v31 = vmul.f32 %v6486_v21, %v2199_v47  ;;  %v3430_v45 = vmul.f32 %v6486_v21, %v3394_v49  ;;  %v3103_v30 = vadd.f32 %v3071_v37, %v3035_v19  ;;  %v6989_v47 = vpop.f32.mrb[30].mxu0 }
 0x16b   : > { %v6980_v3 = vadd.f32 %v3005_v0, %v2873_v28  ;;  %v3753_v51 = vsel %vm6646_vm1, %v2655_v34, 0.0  ;;  %v3788_v23 = vmul.f32 %v6786_v48, %v2656_v5  ;;  %v3431_v20 = vmul.f32 %v6486_v21, %v2197_v10  ;;  %10420 = vst [vmem:[#allocation78_spill] sm:$0xff] %v6989_v47  ;;  %v6997_v0 = vpop.f32.mrb[31].mxu0 }
 0x16c   : > { %v3461_v46 = vadd.f32 %v3429_v31, %v3265_v40  ;;  %v3462_v18 = vadd.f32 %v3430_v45, %v3266_v6  ;;  %v3593_v59 = vmul.f32 %v6459_v22, %v2051_v35  ;;  %v3267_v14 = vadd.f32 %v3235_v11, %v3103_v30  ;;  %10421 = vst [vmem:[#allocation79_spill] sm:$0xff] %v6997_v0 }
 0x16d   : > { %v6991_v32 = vadd.f32 %v3788_v23, %v3624_v41  ;;  %v6995_v37 = vadd.f32 %v6475_v16, %v6727_v50  ;;  %v2581_v34 = vadd.f32 %v2549_v4, %v2385_v26  ;;  %v3790_v5 = vmul.f32 %v6786_v48, %v6904_v42 }
 0x16e   : > { %v3625_v10 = vadd.f32 %v3593_v59, %v3461_v46  ;;  %v3626_v40 = vadd.f32 %v3594_v39, %v3462_v18  ;;  %v3789_v45 = vmul.f32 %v6786_v48, %v3753_v51  ;;  %v7004_v35 = vmul.f32 %v6442_v55, %v6525_v43 }
 0x16f   : > { %v7008_v41 = vmul.f32 %v6457_v61, %v6525_v43  ;;  %v3595_v4 = vmul.f32 %v6459_v22, %v6827_v56  ;;  %v3463_v50 = vadd.f32 %v3431_v20, %v3267_v14  ;;  %v2842_v26 = vmul.f32 %v6449_v57, %v6904_v42 }
 0x170   : > { %10422 = vst [vmem:[#allocation80_spill] sm:$0xff] %v7004_v35  ;;  %v7014_v29 = vadd.f32 %v3789_v45, %v3625_v10  ;;  %v7016_v39 = vadd.f32 %v3790_v5, %v3626_v40  ;;  %v10159_v28 = vrot.slane %v6995_v37, 7  ;;  %v7021_v19 = vmul.f32 %v6449_v57, %v6558_v24  ;;  %v10433_v5 = vld [vmem:[#allocation30_spill] sm:$0xff] }
 0x171   : > { %10423 = vst [vmem:[#allocation81_spill] sm:$0xff] %v7008_v41  ;;  %v7025_v11 = vmul.f32 %v6459_v22, %v6528_v44  ;;  %v3627_v49 = vadd.f32 %v3595_v4, %v3463_v50  ;;  %v10158_v6 = vrot.slane %v6995_v37, 1  ;;  %v7030_v31 = vmul.f32 %v6478_v17, %v6558_v24  ;;  %v10435_v4 = vld [vmem:[#allocation29_spill] sm:$0xff] }
 0x172   : > { %10424 = vst [vmem:[#allocation82_spill] sm:$0xff] %v7021_v19  ;;  %v3072_v30 = vmul.f32 %v6457_v61, %v6816_v8  ;;  %v10427_v51 = vrot.slane %v6827_v56, 7  ;;  %v2874_v20 = vadd.f32 %v2842_v26, %v2581_v34  ;;  %v10428_v44 = vand.u32 15, %v6519_v36 }
 0x173   : > { %10425 = vst [vmem:[#allocation83_spill] sm:$0xff] %v7025_v11  ;;  %10426 = vst [vmem:[#allocation84_spill] sm:$0xff] %v7030_v31  ;;  %v10429_v46 = vmov 0  ;;  %v7048_v18 = vadd.f32 %v6714_v63, %v6475_v16  ;;  %v10432_v59 = vrot.slane %v6827_v56, 1  ;;  %v7062_v10 = vmul.f32 %v6486_v21, %v10433_v5 }
 0x174   : > { %v2196_v23 = vsel %vm10157_vm11, %v10427_v51, %v10159_v28  ;;  %vm7042_vm6 = vcmp.lt.s32.totalorder %v10428_v44, 15  ;;  %v2551_v40 = vmul.f32 %v6442_v55, %v6995_v37  ;;  %v10436_v50 = vand.u32 15, %v10435_v4  ;;  %v10440_v51 = vld [vmem:[#allocation35_spill] sm:$0xff] }
 0x175   : > { %v10430_v46 = vsel %vm7042_vm6, 4294967295, %v10429_v46  ;;  %v2351_v8 = vsel %vm6969_vm10, %v2196_v23, 0.0  ;;  %v2653_v14 = vsel %vm10162_vm12, %v10432_v59, %v10158_v6  ;;  %v2970_v34 = vsel %vm6856_vm7, %v2196_v23, 0.0  ;;  %10434 = vst [vmem:[#allocation30_spill] sm:$0xff] %v7062_v10 }
 0x176   : > { %10431 = vst [vmem:[#allocation85_spill] sm:$0xff] %v10430_v46  ;;  %v2387_v63 = vmul.f32 %v6439_v54, %v2351_v8  ;;  %v3006_v45 = vmul.f32 %v6494_v27, %v2970_v34  ;;  %vm7070_vm11 = vcmp.ge.s32.totalorder %v10436_v50, 1  ;;  %v10437_v26 = vmov 0 }
 0x177   : > { %v10438_v26 = vsel %vm7070_vm11, 4294967295, %v10437_v26  ;;  %v7076_v44 = vmul.f32 %v6449_v57, %v10440_v51  ;;  %v7080_v59 = vmul.f32 %v6478_v17, %v10440_v51  ;;  %v3236_v8 = vmul.f32 %v6478_v17, %v6904_v42  ;;  %v10444_v42 = vld [vmem:[#allocation26_spill] sm:$0xff] }
 0x178   : > { %10439 = vst [vmem:[#allocation86_spill] sm:$0xff] %v10438_v26  ;;  %v3104_v5 = vadd.f32 %v3072_v30, %v3036_v25  ;;  %v7086_v34 = vmul.f32 %v6459_v22, %v6599_v13  ;;  %v2583_v50 = vadd.f32 %v2551_v40, %v2387_v63  ;;  %v3038_v6 = vadd.f32 %v3006_v45, %v2874_v20 }
 0x179   : > { %10441 = vst [vmem:[#allocation35_spill] sm:$0xff] %v7076_v44  ;;  %10442 = vst [vmem:[#allocation87_spill] sm:$0xff] %v7080_v59  ;;  %v3074_v28 = vmul.f32 %v6457_v61, %v6995_v37  ;;  %v3073_v4 = vmul.f32 %v6457_v61, %v6827_v56  ;;  %v2158_v38 = vrot.slane %v7048_v18, 7  ;;  %v3396_v36 = vsel %vm6762_vm2, %v2196_v23, 0.0  ;;  %v10449_v56 = vld [vmem:[#allocation53_spill] sm:$0xff] }
 0x17a   : > { %10443 = vst [vmem:[#allocation88_spill] sm:$0xff] %v7086_v34  ;;  %v3268_v51 = vadd.f32 %v3236_v8, %v3104_v5  ;;  %v10445_v25 = vand.u32 15, %v10444_v42  ;;  %v10446_v30 = vmov 0  ;;  %v3432_v20 = vmul.f32 %v6486_v21, %v3396_v36  ;;  %v10450_v8 = vld [vmem:[#allocation54_spill] sm:$0xff]  ;;  %v7116_v36 = vld [vmem:[%s10083_s4] ss:$0 sm:$0xff] }
 0x17b   : > { %v3106_v13 = vadd.f32 %v3074_v28, %v3038_v6  ;;  %v3755_v63 = vsel %vm6831_vm3, %v2653_v14, 0.0  ;;  %v7106_v40 = vadd.f32 %v10449_v56, %v6475_v16  ;;  %v2615_v45 = vrot.slane %v7048_v18, 1 }
 0x17c   : > { %vm7097_vm12 = vcmp.lt.s32.totalorder %v10445_v25, 15  ;;  %v3791_v23 = vmul.f32 %v6786_v48, %v3755_v63  ;;  %v2067_v5 = vadd.f32 %v6475_v16, %v10450_v8  ;;  %v3105_v25 = vadd.f32 %v3073_v4, %v6980_v3 }
 0x17d   : > { %v10447_v30 = vsel %vm7097_vm12, 4294967295, %v10446_v30  ;;  %v3464_v28 = vadd.f32 %v3432_v20, %v3268_v51  ;;  %v3596_v6 = vmul.f32 %v6459_v22, %v6995_v37  ;;  %v10167_v56 = vrot.slane %v7106_v40, 7 }
 0x17e   : > { %10448 = vst [vmem:[#allocation89_spill] sm:$0xff] %v10447_v30  ;;  %v10170_v42 = vrot.slane %v7106_v40, 1  ;;  %v7124_v63 = vadd.f32 %v7116_v36, %v6811_v12  ;;  %v3201_v3 = vsel %vm6862_vm8, %v2653_v14, 0.0  ;;  %v7128_v4 = vadd.f32 %v3791_v23, %v3627_v49 }
 0x17f   : > { %v2157_v8 = vrot.slane %v2067_v5, 7  ;;  %v2553_v51 = vmul.f32 %v6442_v55, %v7048_v18  ;;  %v3628_v20 = vadd.f32 %v3596_v6, %v3464_v28  ;;  %vm10452_vm2 = vcmp.lt.s32.totalorder %v6432_v52, 1 }
 0x180   : > { %10451 = vst [vmem:[#allocation53_spill] sm:$0xff] %v7124_v63  ;;  %v2193_v53 = vsel %vm10452_vm2, %v2158_v38, %v10167_v56  ;;  %vm10453_vm0 = vcmp.lt.s32.totalorder %v6432_v52, 7  ;;  %v3598_v49 = vmul.f32 %v6459_v22, %v7048_v18  ;;  %v2554_v62 = vmul.f32 %v6442_v55, %v7106_v40 }
 0x181   : > { %v7140_v12 = vsel %vm10453_vm0, %v2615_v45, %v10170_v42  ;;  %v2390_v23 = vmul.f32 %v6439_v54, %v2193_v53  ;;  %v2807_v28 = vsel %vm7042_vm6, %v2653_v14, 0.0  ;;  %v3237_v6 = vmul.f32 %v6478_v17, %v3201_v3  ;;  %vm10455_vm0 = vmmov %vm10452_vm2 }
 0x182   : > { %v3009_v56 = vmul.f32 %v6494_v27, %v2193_v53  ;;  %v2194_v2 = vsel %vm10452_vm2, %v2157_v8, %v2158_v38  ;;  %v2552_v42 = vmul.f32 %v6442_v55, %v2067_v5  ;;  %v10454_v34 = vrot.slane %v6995_v37, 7 }
 0x183   : > { %v7154_v15 = vadd.f32 %v2554_v62, %v2390_v23  ;;  %v2353_v31 = vsel %vm7070_vm11, %v2194_v2, 0.0  ;;  %v2614_v14 = vrot.slane %v2067_v5, 1  ;;  %v2843_v59 = vmul.f32 %v6449_v57, %v2807_v28 }
 0x184   : > { %v2195_v24 = vsel %vm10455_vm0, %v10454_v34, %v2157_v8  ;;  %v2389_v11 = vmul.f32 %v6439_v54, %v2353_v31  ;;  %v2972_v38 = vsel %vm6969_vm10, %v2194_v2, 0.0  ;;  %vm10456_vm2 = vcmp.lt.s32.totalorder %v6432_v52, 7 }
 0x185   : > { %v2388_v3 = vmul.f32 %v6439_v54, %v2195_v24  ;;  %v2651_v62 = vsel %vm10456_vm2, %v2614_v14, %v2615_v45  ;;  %v10457_v23 = vrot.slane %v6995_v37, 1  ;;  %vm10458_vm0 = vmmov %vm10456_vm2  ;;  %v3007_v8 = vmul.f32 %v6494_v27, %v2195_v24 }
 0x186   : > { %v3008_v10 = vmul.f32 %v6494_v27, %v2972_v38  ;;  %v2809_v31 = vsel %vm7097_vm12, %v2651_v62, 0.0  ;;  %v2875_v19 = vadd.f32 %v2843_v59, %v6922_v9  ;;  %v3075_v45 = vmul.f32 %v6457_v61, %v2067_v5  ;;  %v10459_v38 = vld [vmem:[#allocation33_spill] sm:$0xff] }
 0x187   : > { %v2652_v34 = vsel %vm10458_vm0, %v10457_v23, %v2614_v14  ;;  %v2584_v41 = vadd.f32 %v2552_v42, %v2388_v3  ;;  %v2845_v44 = vmul.f32 %v6449_v57, %v2809_v31  ;;  %v3203_v37 = vsel %vm7042_vm6, %v2651_v62, 0.0 }
 0x188   : > { %v2844_v28 = vmul.f32 %v6449_v57, %v2652_v34  ;;  %v3238_v14 = vmul.f32 %v6478_v17, %v2652_v34  ;;  %v3039_v35 = vadd.f32 %v3007_v8, %v2875_v19  ;;  %v3239_v42 = vmul.f32 %v6478_v17, %v3203_v37 }
 0x189   : > { %v3269_v3 = vadd.f32 %v3237_v6, %v3105_v25  ;;  %v10460_v43 = vand.u32 15, %v10459_v38  ;;  %v10461_v0 = vmov 0  ;;  %v2877_v9 = vadd.f32 %v2845_v44, %v2584_v41  ;;  %v10493_v38 = vld [vmem:[#allocation39_spill] sm:$0xff] }
 0x18a   : > { %v2876_v23 = vadd.f32 %v2844_v28, %v2583_v50  ;;  %v3270_v59 = vadd.f32 %v3238_v14, %v3106_v13  ;;  %v3398_v31 = vsel %vm6856_vm7, %v2194_v2, 0.0  ;;  %v3433_v47 = vmul.f32 %v6486_v21, %v2195_v24 }
 0x18b   : > { %vm7187_vm2 = vcmp.ge.s32.totalorder %v10460_v43, 1  ;;  %v3107_v33 = vadd.f32 %v3075_v45, %v3039_v35  ;;  %v3434_v19 = vmul.f32 %v6486_v21, %v3398_v31  ;;  %v3597_v50 = vmul.f32 %v6459_v22, %v2067_v5  ;;  %v5516_v35 = vld [vmem:[%s10084_s5] sm:$0xff]   ;;  %v10465_v45 = vld [vmem:[#allocation42_spill] sm:$0xff] }
 0x18c   : > { %v10462_v0 = vsel %vm7187_vm2, 4294967295, %v10461_v0  ;;  %v3040_v58 = vadd.f32 %v3008_v10, %v2876_v23  ;;  %v7196_v25 = vadd.f32 %v3009_v56, %v2877_v9  ;;  %v3465_v6 = vadd.f32 %v3433_v47, %v3269_v3  ;;  %v5517_v10 = vld [vmem:[%s10084_s5 + $0x8] sm:$0xff]   ;;  %5410 = vmatprep.subr.bf16.mxu1 %v5516_v35  ;;  %v5518_v31 = vld [vmem:[%s10084_s5 + $0x10] sm:$0xff]  }
 0x18d   : > { %10463 = vst [vmem:[#allocation54_spill] sm:$0xff] %v10462_v0  ;;  %v3757_v43 = vsel %vm6862_vm8, %v2651_v62, 0.0  ;;  %v3792_v41 = vmul.f32 %v6786_v48, %v2652_v34  ;;  %v3435_v44 = vmul.f32 %v6486_v21, %v2193_v53  ;;  %v3271_v13 = vadd.f32 %v3239_v42, %v3107_v33  ;;  %v10464_v56 = vld [vmem:[#allocation57_spill] sm:$0xff]  ;;  %5411 = vmatpush3.bf16.msra.mxu1 %v5516_v35 }
 0x18e   : > { %v3466_v2 = vadd.f32 %v3434_v19, %v3270_v59  ;;  %v3793_v24 = vmul.f32 %v6786_v48, %v3757_v43  ;;  %v3629_v47 = vadd.f32 %v3597_v50, %v3465_v6  ;;  %v7213_v62 = vadd.f32 %v6475_v16, %v10464_v56  ;;  %5412 = vmatprep.subr.bf16.mxu1 %v5517_v10  ;;  %v10474_v19 = vld [vmem:[#allocation48_spill] sm:$0xff] }
 0x18f   : > { %v7209_v5 = vadd.f32 %v3792_v41, %v3628_v20  ;;  %v2585_v53 = vadd.f32 %v2553_v51, %v2389_v11  ;;  %v3599_v33 = vmul.f32 %v6459_v22, %v7106_v40  ;;  %v3794_v34 = vmul.f32 %v6786_v48, %v7140_v12  ;;  %v10468_v11 = vld [vmem:[#allocation36_spill] sm:$0xff] }
 0x190   : > { %v3467_v8 = vadd.f32 %v3435_v44, %v3271_v13  ;;  %v3630_v28 = vadd.f32 %v3598_v49, %v3466_v2  ;;  %v7221_v37 = vmul.f32 %v6457_v61, %v10465_v45  ;;  %v7225_v20 = vmul.f32 %v6459_v22, %v10465_v45  ;;  %v10477_v44 = vld [vmem:[#allocation52_spill] sm:$0xff] }
 0x191   : > { %v7227_v14 = vadd.f32 %v3793_v24, %v3629_v47  ;;  %v10469_v51 = vand.u32 15, %v10468_v11  ;;  %v10470_v23 = vmov 0  ;;  %v7236_v42 = vadd.s32 208, %v6432_v52  ;;  %v10481_v56 = vld [vmem:[#allocation56_spill] sm:$0xff]  ;;  %5413 = vmatpush3.bf16.msra.mxu1 %v5517_v10 }
 0x192   : > { %10466 = vst [vmem:[#allocation57_spill] sm:$0xff] %v7221_v37  ;;  %10467 = vst [vmem:[#allocation42_spill] sm:$0xff] %v7225_v20  ;;  %v2846_v49 = vmul.f32 %v6449_v57, %v7140_v12  ;;  %v3631_v3 = vadd.f32 %v3599_v33, %v3467_v8  ;;  %v7240_v9 = vadd.f32 %v3794_v34, %v3630_v28  ;;  %v10179_v59 = vrot.slane %v7213_v62, 7 }
 0x193   : > { %vm7231_vm0 = vcmp.lt.s32.totalorder %v10469_v51, 15  ;;  %10473 = vst [vmem:[#allocation91_spill] sm:$0xff] %v7236_v42  ;;  %v7248_v50 = vmul.f32 %v6786_v48, %v10474_v19  ;;  %v3920_v6 = vmul.f32 0.044715, %v7124_v63  ;;  %v7253_v43 = vadd.f32 %v7116_v36, %v6991_v32  ;;  %5414 = vmatprep.subr.bf16.mxu1 %v5518_v31  ;;  %v5519_v51 = vld [vmem:[%s10084_s5 + $0x18] sm:$0xff]  }
 0x194   : > { %v10471_v23 = vsel %vm7231_vm0, 4294967295, %v10470_v23  ;;  %v10178_v41 = vrot.slane %v7213_v62, 1  ;;  %v7258_v13 = vmul.f32 %v6478_v17, %v10477_v44  ;;  %v3076_v2 = vmul.f32 %v6457_v61, %v7048_v18 }
 0x195   : > { %10472 = vst [vmem:[#allocation90_spill] sm:$0xff] %v10471_v23  ;;  %10475 = vst [vmem:[#allocation48_spill] sm:$0xff] %v7248_v50  ;;  %v10479_v24 = vrot.slane %v7106_v40, 7  ;;  %vm10480_vm7 = vcmp.lt.s32.totalorder %v6432_v52, 1  ;;  %v2878_v47 = vadd.f32 %v2846_v49, %v2585_v53  ;;  %v3240_v32 = vmul.f32 %v6478_v17, %v7140_v12  ;;  %5415 = vmatpush3.bf16.msra.mxu1 %v5518_v31 }
 0x196   : > { %10476 = vst [vmem:[#allocation92_spill] sm:$0xff] %v7253_v43  ;;  %10478 = vst [vmem:[#allocation52_spill] sm:$0xff] %v7258_v13  ;;  %v7272_v33 = vadd.f32 %v10481_v56, %v6475_v16  ;;  %v10482_v18 = vrot.slane %v7106_v40, 1  ;;  %vm10483_vm8 = vcmp.lt.s32.totalorder %v6432_v52, 7  ;;  %v2555_v12 = vmul.f32 %v6442_v55, %v7213_v62  ;;  %v10486_v56 = vld [vmem:[#allocation37_spill] sm:$0xff]  ;;  %5416 = vmatprep.subr.bf16.mxu1 %v5519_v51 }
 0x197   : > { %v2192_v35 = vsel %vm10480_vm7, %v10479_v24, %v10179_v59  ;;  %v3108_v45 = vadd.f32 %v3076_v2, %v3040_v58  ;;  %v7292_v49 = vmul.f32 %v6786_v48, %v10477_v44  ;;  %v7295_v10 = vmul.f32 %v3920_v6, %v7124_v63 }
 0x198   : > { %v2355_v34 = vsel %vm7187_vm2, %v2192_v35, 0.0  ;;  %v2649_v8 = vsel %vm10483_vm8, %v10482_v18, %v10178_v41  ;;  %v2974_v28 = vsel %vm7070_vm11, %v2192_v35, 0.0  ;;  %v3923_v19 = vmul.f32 0.044715, %v7253_v43 }
 0x199   : > { %v2391_v53 = vmul.f32 %v6439_v54, %v2355_v34  ;;  %10484 = vst [vmem:[#allocation56_spill] sm:$0xff] %v7292_v49  ;;  %10485 = vst [vmem:[#allocation93_spill] sm:$0xff] %v7295_v10  ;;  %v3010_v24 = vmul.f32 %v6494_v27, %v2974_v28  ;;  %v10487_v34 = vand.u32 15, %v10486_v56  ;;  %v10488_v58 = vmov 0  ;;  %5417 = vmatpush3.bf16.msra.mxu1 %v5519_v51  ;;  %v5521_v51 = vld [vmem:[%s10084_s5 + $0x28] sm:$0xff]  }
 0x19a   : > { %v7307_v2 = vadd.f32 %v7116_v36, %v7014_v29  ;;  %v3272_v44 = vadd.f32 %v3240_v32, %v3108_v45  ;;  %v3400_v6 = vsel %vm6969_vm10, %v2192_v35, 0.0  ;;  %v7313_v41 = vadd.f32 %v7116_v36, %v7016_v39  ;;  %v10498_v39 = vld [vmem:[#allocation58_spill] sm:$0xff]  ;;  %v5520_v45 = vld [vmem:[%s10084_s5 + $0x20] sm:$0xff]  }
 0x19b   : > { %vm7301_vm7 = vcmp.lt.s32.totalorder %v10487_v34, 15  ;;  %v2587_v18 = vadd.f32 %v2555_v12, %v2391_v53  ;;  %v3042_v28 = vadd.f32 %v3010_v24, %v2878_v47  ;;  %v3078_v34 = vmul.f32 %v6457_v61, %v7213_v62  ;;  %v10499_v53 = vld [vmem:[#allocation59_spill] sm:$0xff]  ;;  %5418 = vmatprep.subr.bf16.mxu1 %v5520_v45 }
 0x19c   : > { %v10489_v58 = vsel %vm7301_vm7, 4294967295, %v10488_v58  ;;  %10491 = vst [vmem:[#allocation95_spill] sm:$0xff] %v7307_v2  ;;  %10492 = vst [vmem:[#allocation96_spill] sm:$0xff] %v7313_v41  ;;  %v3436_v59 = vmul.f32 %v6486_v21, %v3400_v6  ;;  %v10494_v56 = vand.u32 15, %v10493_v38  ;;  %v10495_v29 = vmov 0 }
 0x19d   : > { %10490 = vst [vmem:[#allocation94_spill] sm:$0xff] %v10489_v58  ;;  %v2162_v32 = vrot.slane %v7272_v33, 7  ;;  %v3759_v35 = vsel %vm7042_vm6, %v2649_v8, 0.0  ;;  %v7329_v47 = vadd.f32 %v10498_v39, %v6475_v16  ;;  %v7333_v12 = vadd.f32 %v6475_v16, %v10499_v53  ;;  %5419 = vmatpush3.bf16.msra.mxu1 %v5520_v45 }
 0x19e   : > { %vm7320_vm8 = vcmp.ge.s32.totalorder %v10494_v56, 1  ;;  %v3110_v24 = vadd.f32 %v3078_v34, %v3042_v28  ;;  %v3468_v31 = vadd.f32 %v3436_v59, %v3272_v44  ;;  %v3600_v56 = vmul.f32 %v6459_v22, %v7213_v62  ;;  %5420 = vmatprep.subr.bf16.mxu1 %v5521_v51 }
 0x19f   : > { %v10496_v29 = vsel %vm7320_vm8, 4294967295, %v10495_v29  ;;  %v3795_v6 = vmul.f32 %v6786_v48, %v3759_v35  ;;  %v2619_v38 = vrot.slane %v7272_v33, 1  ;;  %v10187_v39 = vrot.slane %v7329_v47, 7 }
 0x1a0   : > { %10497 = vst [vmem:[#allocation97_spill] sm:$0xff] %v10496_v29  ;;  %v10186_v11 = vrot.slane %v7329_v47, 1  ;;  %v2811_v16 = vsel %vm7231_vm0, %v2649_v8, 0.0  ;;  %v3205_v53 = vsel %vm7097_vm12, %v2649_v8, 0.0  ;;  %v7348_v1 = vadd.f32 %v3600_v56, %v3468_v31 }
 0x1a1   : > { %v7350_v59 = vadd.f32 %v3795_v6, %v3631_v3  ;;  %v2161_v44 = vrot.slane %v7333_v12, 7  ;;  %v7354_v28 = vmul.f32 %v3923_v19, %v7253_v43  ;;  %vm10501_vm10 = vcmp.lt.s32.totalorder %v6432_v52, 1  ;;  %5421 = vmatpush3.bf16.msra.mxu1 %v5521_v51 }
 0x1a2   : > { %v2189_v34 = vsel %vm10501_vm10, %v2162_v32, %v10187_v39  ;;  %vm10502_vm6 = vcmp.lt.s32.totalorder %v6432_v52, 7  ;;  %v2618_v3 = vrot.slane %v7333_v12, 1  ;;  %v3077_v19 = vmul.f32 %v6457_v61, %v7106_v40 }
 0x1a3   : > { %10500 = vst [vmem:[#allocation58_spill] sm:$0xff] %v7350_v59  ;;  %v7364_v8 = vsel %vm10502_vm6, %v2619_v38, %v10186_v11  ;;  %v2394_v35 = vmul.f32 %v6439_v54, %v2189_v34  ;;  %v2558_v31 = vmul.f32 %v6442_v55, %v7329_v47  ;;  %v2847_v56 = vmul.f32 %v6449_v57, %v2811_v16  ;;  %vm10503_vm6 = vmmov %vm10501_vm10 }
 0x1a4   : > { %v3602_v6 = vmul.f32 %v6459_v22, %v7272_v33  ;;  %v3241_v11 = vmul.f32 %v6478_v17, %v3205_v53  ;;  %v2190_v39 = vsel %vm10503_vm6, %v2161_v44, %v2162_v32  ;;  %v2556_v60 = vmul.f32 %v6442_v55, %v7333_v12  ;;  %vm10505_vm10 = vmmov %vm10503_vm6 }
 0x1a5   : > { %v7383_v46 = vadd.f32 %v2558_v31, %v2394_v35  ;;  %v3013_v40 = vmul.f32 %v6494_v27, %v2189_v34  ;;  %v10504_v7 = vrot.slane %v7213_v62, 7  ;;  %vm10506_vm3 = vcmp.lt.s32.totalorder %v6432_v52, 7 }
 0x1a6   : > { %v2647_v50 = vsel %vm10506_vm3, %v2618_v3, %v2619_v38  ;;  %v3439_v53 = vmul.f32 %v6486_v21, %v2189_v34  ;;  %v10507_v49 = vrot.slane %v7213_v62, 1  ;;  %vm10508_vm6 = vmmov %vm10506_vm3  ;;  %v2976_v62 = vsel %vm7187_vm2, %v2190_v39, 0.0 }
 0x1a7   : > { %v2191_v16 = vsel %vm10505_vm10, %v10504_v7, %v2161_v44  ;;  %v2813_v31 = vsel %vm7301_vm7, %v2647_v50, 0.0  ;;  %v5522_v7 = vld [vmem:[%s10084_s5 + $0x30] sm:$0xff]   ;;  %v2879_v44 = vadd.f32 %v2847_v56, %v7154_v15  ;;  %v3012_v20 = vmul.f32 %v6494_v27, %v2976_v62  ;;  %v10509_v15 = vld [vmem:[#allocation40_spill] sm:$0xff] }
 0x1a8   : > { %v2392_v32 = vmul.f32 %v6439_v54, %v2191_v16  ;;  %v2648_v35 = vsel %vm10508_vm6, %v10507_v49, %v2618_v3  ;;  %v2849_v45 = vmul.f32 %v6449_v57, %v2813_v31  ;;  %v2357_v49 = vsel %vm7320_vm8, %v2190_v39, 0.0  ;;  %5422 = vmatprep.subr.bf16.mxu1 %v5522_v7 }
 0x1a9   : > { %v2848_v38 = vmul.f32 %v6449_v57, %v2648_v35  ;;  %v3011_v3 = vmul.f32 %v6494_v27, %v2191_v16  ;;  %v3109_v63 = vadd.f32 %v3077_v19, %v7196_v25  ;;  %v3207_v13 = vsel %vm7231_vm0, %v2647_v50, 0.0  ;;  %5423 = vmatpush3.bf16.msra.mxu1 %v5522_v7 }
 0x1aa   : > { %v2588_v34 = vadd.f32 %v2556_v60, %v2392_v32  ;;  %v3242_v31 = vmul.f32 %v6478_v17, %v2648_v35  ;;  %v10510_v56 = vand.u32 15, %v10509_v15  ;;  %v10511_v37 = vmov 0 }
 0x1ab   : > { %v2880_v10 = vadd.f32 %v2848_v38, %v2587_v18  ;;  %v3043_v32 = vadd.f32 %v3011_v3, %v2879_v44  ;;  %v3079_v62 = vmul.f32 %v6457_v61, %v7333_v12  ;;  %v3402_v25 = vsel %vm7070_vm11, %v2190_v39, 0.0  ;;  %v5523_v18 = vld [vmem:[%s10084_s5 + $0x38] sm:$0xff]  }
 0x1ac   : > { %vm7418_vm3 = vcmp.ge.s32.totalorder %v10510_v56, 1  ;;  %v2881_v60 = vadd.f32 %v2849_v45, %v2588_v34  ;;  %v3273_v38 = vadd.f32 %v3241_v11, %v3109_v63  ;;  %v3274_v56 = vadd.f32 %v3242_v31, %v3110_v24  ;;  %v10514_v24 = vld [vmem:[#allocation66_spill] sm:$0xff]  ;;  %5424 = vmatprep.subr.bf16.mxu1 %v5523_v18 }
 0x1ad   : > { %v10512_v37 = vsel %vm7418_vm3, 4294967295, %v10511_v37  ;;  %v3044_v19 = vadd.f32 %v3012_v20, %v2880_v10  ;;  %v3437_v15 = vmul.f32 %v6486_v21, %v2191_v16  ;;  %v3111_v51 = vadd.f32 %v3079_v62, %v3043_v32  ;;  %5425 = vmatpush3.bf16.msra.mxu1 %v5523_v18 }
 0x1ae   : > { %10513 = vst [vmem:[#allocation59_spill] sm:$0xff] %v10512_v37  ;;  %v7430_v59 = vadd.f32 %v3013_v40, %v2881_v60  ;;  %v3243_v45 = vmul.f32 %v6478_v17, %v3207_v13  ;;  %v3438_v44 = vmul.f32 %v6486_v21, %v3402_v25  ;;  %v3601_v39 = vmul.f32 %v6459_v22, %v7333_v12  ;;  %v7443_v13 = vld [vmem:[%s10081_s2] ss:$0 sm:$0xff]  ;;  %v10515_v60 = vld [vmem:[#allocation69_spill] sm:$0xff] }
 0x1af   : > { %v3469_v34 = vadd.f32 %v3437_v15, %v3273_v38  ;;  %v3761_v3 = vsel %vm7097_vm12, %v2647_v50, 0.0  ;;  %v3796_v20 = vmul.f32 %v6786_v48, %v2648_v35  ;;  %v2393_v63 = vmul.f32 %v6439_v54, %v2357_v49 }
 0x1b0   : > { %v3275_v11 = vadd.f32 %v3243_v45, %v3111_v51  ;;  %v3470_v10 = vadd.f32 %v3438_v44, %v3274_v56  ;;  %v7447_v40 = vadd.f32 %v7443_v13, %v10514_v24  ;;  %v2557_v50 = vmul.f32 %v6442_v55, %v7272_v33 }
 0x1b1   : > { %v3633_v12 = vadd.f32 %v3601_v39, %v3469_v34  ;;  %v3797_v16 = vmul.f32 %v6786_v48, %v3761_v3  ;;  %v7453_v35 = vadd.f32 %v3796_v20, %v7348_v1  ;;  %v3603_v7 = vmul.f32 %v6459_v22, %v7329_v47 }
 0x1b2   : > { %v3798_v49 = vmul.f32 %v6786_v48, %v7364_v8  ;;  %v3471_v31 = vadd.f32 %v3439_v53, %v3275_v11  ;;  %v3634_v15 = vadd.f32 %v3602_v6, %v3470_v10  ;;  %v7461_v32 = vadd.f32 %v7116_v36, %v10515_v60 }
 0x1b3   : > { %v3924_v62 = vmul.f32 0.044715, %v7307_v2  ;;  %v7464_v25 = vadd.f32 %v3797_v16, %v3633_v12  ;;  %v10199_v38 = vrot.slane %v7447_v40, 7  ;;  %v2850_v1 = vmul.f32 %v6449_v57, %v7364_v8 }
 0x1b4   : > { %10516 = vst [vmem:[#allocation66_spill] sm:$0xff] %v7461_v32  ;;  %v3635_v56 = vadd.f32 %v3603_v7, %v3471_v31  ;;  %v7469_v51 = vadd.f32 %v3798_v49, %v3634_v15  ;;  %v2589_v45 = vadd.f32 %v2557_v50, %v2393_v63  ;;  %v7472_v6 = vmul.f32 0.044715, %v7313_v41 }
 0x1b5   : > { %v3987_v53 = vmul.f32 %v7354_v28, %v7253_v43  ;;  %v10518_v44 = vrot.slane %v7329_v47, 7  ;;  %v10198_v34 = vrot.slane %v7447_v40, 1  ;;  %v3080_v39 = vmul.f32 %v6457_v61, %v7272_v33  ;;  %v10519_v28 = vld [vmem:[#allocation41_spill] sm:$0xff] }
 0x1b6   : > { %10517 = vst [vmem:[#allocation69_spill] sm:$0xff] %v7472_v6  ;;  %v2882_v20 = vadd.f32 %v2850_v1, %v2589_v45  ;;  %v10520_v11 = vand.u32 15, %v10519_v28  ;;  %v10521_v10 = vmov 0  ;;  %v7497_v24 = vadd.f32 %v7116_v36, %v7209_v5  ;;  %v10529_v1 = vld [vmem:[#allocation64_spill] sm:$0xff] }
 0x1b7   : > { %v2188_v18 = vsel %vm10505_vm10, %v10518_v44, %v10199_v38  ;;  %v2559_v33 = vmul.f32 %v6442_v55, %v7447_v40  ;;  %v10524_v12 = vrot.slane %v7329_v47, 1  ;;  %vm10525_vm10 = vcmp.lt.s32.totalorder %v6432_v52, 7 }
 0x1b8   : > { %v2359_v3 = vsel %vm7418_vm3, %v2188_v18, 0.0  ;;  %v2978_v63 = vsel %vm7320_vm8, %v2188_v18, 0.0  ;;  %vm7491_vm6 = vcmp.lt.s32.totalorder %v10520_v11, 15  ;;  %v7509_v7 = vmul.f32 %v3924_v62, %v7307_v2  ;;  %v10530_v62 = vld [vmem:[#allocation50_spill] sm:$0xff] }
 0x1b9   : > { %v10522_v10 = vsel %vm7491_vm6, 4294967295, %v10521_v10  ;;  %v2395_v50 = vmul.f32 %v6439_v54, %v2359_v3  ;;  %v2645_v16 = vsel %vm10525_vm10, %v10524_v12, %v10198_v34  ;;  %v3244_v49 = vmul.f32 %v6478_v17, %v7364_v8  ;;  %v10535_v12 = vld [vmem:[#allocation49_spill] sm:$0xff] }
 0x1ba   : > { %10523 = vst [vmem:[#allocation98_spill] sm:$0xff] %v10522_v10  ;;  %10526 = vst [vmem:[#allocation99_spill] sm:$0xff] %v7509_v7  ;;  %v3014_v5 = vmul.f32 %v6494_v27, %v2978_v63  ;;  %v3112_v31 = vadd.f32 %v3080_v39, %v3044_v19  ;;  %v7515_v15 = vadd.f32 %v3987_v53, %v7253_v43  ;;  %v10531_v3 = vand.u32 15, %v10530_v62 }
 0x1bb   : > { %v7519_v60 = vadd.f32 %v7116_v36, %v7227_v14  ;;  %v7523_v45 = vadd.f32 %v7443_v13, %v10529_v1  ;;  %v2591_v44 = vadd.f32 %v2559_v33, %v2395_v50  ;;  %v10532_v11 = vmov 0 }
 0x1bc   : > { %10527 = vst [vmem:[#allocation100_spill] sm:$0xff] %v7515_v15  ;;  %vm7527_vm10 = vcmp.ge.s32.totalorder %v10531_v3, 1  ;;  %v3046_v8 = vadd.f32 %v3014_v5, %v2882_v20  ;;  %v3082_v19 = vmul.f32 %v6457_v61, %v7447_v40  ;;  %v3276_v53 = vadd.f32 %v3244_v49, %v3112_v31  ;;  %v10540_v31 = vld [vmem:[#allocation67_spill] sm:$0xff]  ;;  %v10541_v3 = vld [vmem:[#allocation68_spill] sm:$0xff] }
 0x1bd   : > { %10528 = vst [vmem:[#allocation101_spill] sm:$0xff] %v7519_v60  ;;  %v10533_v11 = vsel %vm7527_vm10, 4294967295, %v10532_v11  ;;  %v3404_v14 = vsel %vm7187_vm2, %v2188_v18, 0.0  ;;  %v7536_v39 = vmul.f32 0.044715, %v7497_v24  ;;  %v3081_v63 = vmul.f32 %v6457_v61, %v7329_v47 }
 0x1be   : > { %10534 = vst [vmem:[#allocation64_spill] sm:$0xff] %v10533_v11  ;;  %v3440_v50 = vmul.f32 %v6486_v21, %v3404_v14  ;;  %v3763_v33 = vsel %vm7231_vm0, %v2645_v16, 0.0  ;;  %v10536_v20 = vand.u32 15, %v10535_v12  ;;  %v10537_v5 = vmov 0 }
 0x1bf   : > { %v3114_v49 = vadd.f32 %v3082_v19, %v3046_v8  ;;  %v3799_v18 = vmul.f32 %v6786_v48, %v3763_v33  ;;  %v7552_v1 = vadd.f32 %v7443_v13, %v10540_v31  ;;  %v2099_v47 = vadd.f32 %v7443_v13, %v10541_v3 }
 0x1c0   : > { %vm7545_vm11 = vcmp.lt.s32.totalorder %v10536_v20, 15  ;;  %v2166_v14 = vrot.slane %v7523_v45, 7  ;;  %v3472_v34 = vadd.f32 %v3440_v50, %v3276_v53  ;;  %v3604_v38 = vmul.f32 %v6459_v22, %v7447_v40 }
 0x1c1   : > { %v10538_v5 = vsel %vm7545_vm11, 4294967295, %v10537_v5  ;;  %v3113_v20 = vadd.f32 %v3081_v63, %v7430_v59  ;;  %v2623_v62 = vrot.slane %v7523_v45, 1  ;;  %v7561_v8 = vadd.f32 %v3799_v18, %v3635_v56 }
 0x1c2   : > { %10539 = vst [vmem:[#allocation102_spill] sm:$0xff] %v10538_v5  ;;  %v10203_v19 = vrot.slane %v7552_v1, 7  ;;  %v10205_v33 = vrot.slane %v7552_v1, 1  ;;  %v7567_v31 = vadd.f32 %v7116_v36, %v7240_v9  ;;  %v3209_v53 = vsel %vm7301_vm7, %v2645_v16, 0.0 }
 0x1c3   : > { %10542 = vst [vmem:[#allocation67_spill] sm:$0xff] %v7561_v8  ;;  %v3636_v50 = vadd.f32 %v3604_v38, %v3472_v34  ;;  %v2165_v3 = vrot.slane %v2099_v47, 7  ;;  %v7572_v12 = vmul.f32 0.044715, %v7519_v60  ;;  %v7576_v59 = vmul.f32 %v6442_v55, %v7523_v45 }
 0x1c4   : > { %10543 = vst [vmem:[#allocation68_spill] sm:$0xff] %v7567_v31  ;;  %vm10544_vm2 = vcmp.lt.s32.totalorder %v6432_v52, 1  ;;  %vm10545_vm0 = vcmp.lt.s32.totalorder %v6432_v52, 7  ;;  %v3606_v38 = vmul.f32 %v6459_v22, %v7523_v45  ;;  %v2562_v63 = vmul.f32 %v6442_v55, %v7552_v1 }
 0x1c5   : > { %v2185_v56 = vsel %vm10544_vm2, %v2166_v14, %v10203_v19  ;;  %v7586_v9 = vsel %vm10545_vm0, %v2623_v62, %v10205_v33  ;;  %v2815_v18 = vsel %vm7491_vm6, %v2645_v16, 0.0  ;;  %v3245_v28 = vmul.f32 %v6478_v17, %v3209_v53  ;;  %vm10547_vm0 = vmmov %vm10544_vm2 }
 0x1c6   : > { %v2398_v34 = vmul.f32 %v6439_v54, %v2185_v56  ;;  %v2186_v19 = vsel %vm10544_vm2, %v2165_v3, %v2166_v14  ;;  %v10546_v0 = vrot.slane %v7447_v40, 7  ;;  %v2560_v26 = vmul.f32 %v6442_v55, %v2099_v47 }
 0x1c7   : > { %v3017_v30 = vmul.f32 %v6494_v27, %v2185_v56  ;;  %v2622_v7 = vrot.slane %v2099_v47, 1  ;;  %v2361_v16 = vsel %vm7527_vm10, %v2186_v19, 0.0  ;;  %v2851_v53 = vmul.f32 %v6449_v57, %v2815_v18 }
 0x1c8   : > { %v2187_v33 = vsel %vm10547_vm0, %v10546_v0, %v2165_v3  ;;  %v7603_v23 = vadd.f32 %v2562_v63, %v2398_v34  ;;  %v2980_v14 = vsel %vm7418_vm3, %v2186_v19, 0.0  ;;  %vm10549_vm2 = vcmp.lt.s32.totalorder %v6432_v52, 7 }
 0x1c9   : > { %v2396_v43 = vmul.f32 %v6439_v54, %v2187_v33  ;;  %v3015_v2 = vmul.f32 %v6494_v27, %v2187_v33  ;;  %v2643_v3 = vsel %vm10549_vm2, %v2622_v7, %v2623_v62  ;;  %v10550_v34 = vrot.slane %v7447_v40, 1  ;;  %vm10551_vm0 = vmmov %vm10549_vm2 }
 0x1ca   : > { %10548 = vst [vmem:[#allocation103_spill] sm:$0xff] %v7603_v23  ;;  %v3016_v6 = vmul.f32 %v6494_v27, %v2980_v14  ;;  %v2817_v41 = vsel %vm7545_vm11, %v2643_v3, 0.0  ;;  %v2883_v15 = vadd.f32 %v2851_v53, %v7383_v46  ;;  %v3083_v32 = vmul.f32 %v6457_v61, %v2099_v47 }
 0x1cb   : > { %v2592_v0 = vadd.f32 %v2560_v26, %v2396_v43  ;;  %v2644_v63 = vsel %vm10551_vm0, %v10550_v34, %v2622_v7  ;;  %v2853_v26 = vmul.f32 %v6449_v57, %v2817_v41  ;;  %v3211_v43 = vsel %vm7491_vm6, %v2643_v3, 0.0 }
 0x1cc   : > { %v2852_v18 = vmul.f32 %v6449_v57, %v2644_v63  ;;  %v3246_v40 = vmul.f32 %v6478_v17, %v2644_v63  ;;  %v3277_v62 = vadd.f32 %v3245_v28, %v3113_v20  ;;  %v3047_v34 = vadd.f32 %v3015_v2, %v2883_v15 }
 0x1cd   : > { %v3247_v14 = vmul.f32 %v6478_v17, %v3211_v43  ;;  %v3406_v8 = vsel %vm7320_vm8, %v2186_v19, 0.0  ;;  %v2885_v23 = vadd.f32 %v2853_v26, %v2592_v0  ;;  %v3441_v46 = vmul.f32 %v6486_v21, %v2187_v33 }
 0x1ce   : > { %v2884_v7 = vadd.f32 %v2852_v18, %v2591_v44  ;;  %v3278_v5 = vadd.f32 %v3246_v40, %v3114_v49  ;;  %v3442_v53 = vmul.f32 %v6486_v21, %v3406_v8  ;;  %v3115_v37 = vadd.f32 %v3083_v32, %v3047_v34 }
 0x1cf   : > { %v3605_v10 = vmul.f32 %v6459_v22, %v2099_v47  ;;  %v3765_v28 = vsel %vm7301_vm7, %v2643_v3, 0.0  ;;  %v7637_v44 = vadd.f32 %v3017_v30, %v2885_v23  ;;  %v3473_v2 = vadd.f32 %v3441_v46, %v3277_v62 }
 0x1d0   : > { %v3048_v41 = vadd.f32 %v3016_v6, %v2884_v7  ;;  %v3474_v15 = vadd.f32 %v3442_v53, %v3278_v5  ;;  %v3800_v20 = vmul.f32 %v6786_v48, %v2644_v63  ;;  %v3443_v19 = vmul.f32 %v6486_v21, %v2185_v56 }
 0x1d1   : > { %v3802_v49 = vmul.f32 %v6786_v48, %v7586_v9  ;;  %v2397_v8 = vmul.f32 %v6439_v54, %v2361_v16  ;;  %v3279_v6 = vadd.f32 %v3247_v14, %v3115_v37  ;;  %v3637_v32 = vadd.f32 %v3605_v10, %v3473_v2  ;;  %v10552_v10 = vld [vmem:[#allocation72_spill] sm:$0xff] }
 0x1d2   : > { %v3638_v33 = vadd.f32 %v3606_v38, %v3474_v15  ;;  %v3801_v47 = vmul.f32 %v6786_v48, %v3765_v28  ;;  %v7645_v0 = vadd.f32 %v3800_v20, %v3636_v50  ;;  %v3084_v30 = vmul.f32 %v6457_v61, %v7523_v45  ;;  %v10564_v28 = vld [vmem:[#allocation71_spill] sm:$0xff] }
 0x1d3   : > { %v3607_v23 = vmul.f32 %v6459_v22, %v7552_v1  ;;  %v3475_v5 = vadd.f32 %v3443_v19, %v3279_v6  ;;  %v10223_v56 = vand.u32 15, %v7236_v42  ;;  %v3959_v3 = vmul.f32 %v7536_v39, %v7497_v24 }
 0x1d4   : > { %v7654_v16 = vadd.f32 %v3801_v47, %v3637_v32  ;;  %v7656_v37 = vadd.f32 %v3802_v49, %v3638_v33  ;;  %v7660_v48 = vadd.f32 %v7443_v13, %v10552_v10  ;;  %v2854_v45 = vmul.f32 %v6449_v57, %v7586_v9  ;;  %v7741_v10 = vld [vmem:[%s10082_s3 + $0x8] ss:$0 sm:$0xff] }
 0x1d5   : > { %v3639_v50 = vadd.f32 %v3607_v23, %v3475_v5  ;;  %v2593_v38 = vadd.f32 %v7576_v59, %v2397_v8  ;;  %v3116_v63 = vadd.f32 %v3084_v30, %v3048_v41  ;;  %v7667_v18 = vadd.f32 %v7116_v36, %v7128_v4 }
 0x1d6   : > { %v7670_v39 = vmul.f32 0.044715, %v7567_v31  ;;  %v10226_v26 = vrot.slane %v7660_v48, 7  ;;  %vm7675_vm2 = vcmp.ge.s32.totalorder %v10223_v56, 1  ;;  %v10555_v43 = vmov 0 }
 0x1d7   : > { %10553 = vst [vmem:[#allocation72_spill] sm:$0xff] %v7667_v18  ;;  %v10556_v43 = vsel %vm7675_vm2, 4294967295, %v10555_v43  ;;  %v7681_v40 = vadd.f32 %v7116_v36, %v7453_v35  ;;  %v3248_v59 = vmul.f32 %v6478_v17, %v7586_v9  ;;  %v10224_v4 = vrot.slane %v7660_v48, 1 }
 0x1d8   : > { %10554 = vst [vmem:[#allocation104_spill] sm:$0xff] %v7670_v39  ;;  %10557 = vst [vmem:[#allocation105_spill] sm:$0xff] %v10556_v43  ;;  %v2886_v62 = vadd.f32 %v2854_v45, %v2593_v38  ;;  %v7688_v7 = vmul.f32 %v7572_v12, %v7519_v60  ;;  %v7691_v34 = vmul.f32 %v3959_v3, %v7497_v24  ;;  %v10560_v35 = vrot.slane %v7552_v1, 7  ;;  %v10569_v38 = vld [vmem:[#allocation73_spill] sm:$0xff]  ;;  %v10595_v60 = vld [vmem:[#allocation103_spill] sm:$0xff] }
 0x1d9   : > { %v7695_v14 = vadd.f32 %v7116_v36, %v7464_v25  ;;  %vm10561_vm0 = vcmp.lt.s32.totalorder %v6432_v52, 1  ;;  %v10562_v12 = vrot.slane %v7552_v1, 1  ;;  %vm10563_vm8 = vcmp.lt.s32.totalorder %v6432_v52, 7 }
 0x1da   : > { %10558 = vst [vmem:[#allocation106_spill] sm:$0xff] %v7688_v7  ;;  %v2184_v9 = vsel %vm10561_vm0, %v10560_v35, %v10226_v26  ;;  %v3280_v41 = vadd.f32 %v3248_v59, %v3116_v63  ;;  %v7715_v2 = vadd.f32 %v7443_v13, %v10564_v28  ;;  %v2563_v20 = vmul.f32 %v6442_v55, %v7660_v48 }
 0x1db   : > { %10559 = vst [vmem:[#allocation107_spill] sm:$0xff] %v7695_v14  ;;  %v2363_v46 = vsel %vm7675_vm2, %v2184_v9, 0.0  ;;  %v2641_v53 = vsel %vm10563_vm8, %v10562_v12, %v10224_v4  ;;  %v2982_v25 = vsel %vm7527_vm10, %v2184_v9, 0.0  ;;  %v7723_v49 = vadd.f32 %v7116_v36, %v7469_v51  ;;  %vm10576_vm8 = vmmov %vm10561_vm0 }
 0x1dc   : > { %v2399_v15 = vmul.f32 %v6439_v54, %v2363_v46  ;;  %v3018_v19 = vmul.f32 %v6494_v27, %v2982_v25  ;;  %v7726_v8 = vmul.f32 0.044715, %v7681_v40  ;;  %v3408_v32 = vsel %vm7418_vm3, %v2184_v9, 0.0 }
 0x1dd   : > { %10565 = vst [vmem:[#allocation71_spill] sm:$0xff] %v7723_v49  ;;  %v3767_v47 = vsel %vm7491_vm6, %v2641_v53, 0.0  ;;  %v7733_v30 = vmul.f32 0.044715, %v7695_v14  ;;  %v3086_v3 = vmul.f32 %v6457_v61, %v7660_v48  ;;  %v3444_v51 = vmul.f32 %v6486_v21, %v3408_v32 }
 0x1de   : > { %v2595_v23 = vadd.f32 %v2563_v20, %v2399_v15  ;;  %v3050_v5 = vadd.f32 %v3018_v19, %v2886_v62  ;;  %v3803_v45 = vmul.f32 %v7741_v10, %v3767_v47  ;;  %v7746_v63 = vadd.f32 %v7443_v13, %v10569_v38 }
 0x1df   : > { %10568 = vst [vmem:[#allocation108_spill] sm:$0xff] %v7733_v30  ;;  %v7749_v59 = vadd.s32 200, %v6432_v52  ;;  %v2170_v62 = vrot.slane %v7715_v2, 7  ;;  %v3608_v9 = vmul.f32 %v6459_v22, %v7660_v48  ;;  %v7755_v46 = vadd.s32 216, %v6432_v52 }
 0x1e0   : > { %v3118_v35 = vadd.f32 %v3086_v3, %v3050_v5  ;;  %v3476_v12 = vadd.f32 %v3444_v51, %v3280_v41  ;;  %v7757_v25 = vadd.f32 %v3803_v45, %v3639_v50  ;;  %v10225_v28 = vrot.slane %v7746_v63, 7  ;;  %v10575_v5 = vld [vmem:[#allocation74_spill] sm:$0xff] }
 0x1e1   : > { %10570 = vst [vmem:[#allocation73_spill] sm:$0xff] %v7749_v59  ;;  %10571 = vst [vmem:[#allocation109_spill] sm:$0xff] %v7755_v46  ;;  %v7761_v15 = vadd.s32 224, %v6432_v52  ;;  %v2627_v20 = vrot.slane %v7715_v2, 1  ;;  %v3213_v32 = vsel %vm7545_vm11, %v2641_v53, 0.0  ;;  %v10228_v47 = vrot.slane %v7746_v63, 1 }
 0x1e2   : > { %10572 = vst [vmem:[#allocation110_spill] sm:$0xff] %v7757_v25  ;;  %v2115_v3 = vadd.f32 %v7443_v13, %v10575_v5  ;;  %v3640_v38 = vadd.f32 %v3608_v9, %v3476_v12  ;;  %v2181_v50 = vsel %vm10576_vm8, %v2170_v62, %v10225_v28  ;;  %v3085_v45 = vmul.f32 %v6457_v61, %v7552_v1 }
 0x1e3   : > { %10573 = vst [vmem:[#allocation111_spill] sm:$0xff] %v7761_v15  ;;  %v2402_v56 = vmul.f32 %v6439_v54, %v2181_v50  ;;  %v2566_v4 = vmul.f32 %v6442_v55, %v7746_v63  ;;  %vm10577_vm0 = vcmp.lt.s32.totalorder %v6432_v52, 7  ;;  %v3610_v12 = vmul.f32 %v6459_v22, %v7715_v2 }
 0x1e4   : > { %v7784_v9 = vsel %vm10577_vm0, %v2627_v20, %v10228_v47  ;;  %v3249_v5 = vmul.f32 %v6478_v17, %v3213_v32  ;;  %v3021_v28 = vmul.f32 %v6494_v27, %v2181_v50  ;;  %v10233_v1 = vand.u32 15, %v7761_v15 }
 0x1e5   : > { %v7791_v26 = vadd.f32 %v2566_v4, %v2402_v56  ;;  %v3447_v51 = vmul.f32 %v6486_v21, %v2181_v50  ;;  %v2169_v41 = vrot.slane %v2115_v3, 7  ;;  %v2626_v42 = vrot.slane %v2115_v3, 1 }
 0x1e6   : > { %vm7796_vm8 = vcmp.ge.s32.totalorder %v10233_v1, 1  ;;  %v10578_v47 = vmov 0  ;;  %v2564_v6 = vmul.f32 %v6442_v55, %v2115_v3  ;;  %v10581_v32 = vand.u32 15, %v7749_v59 }
 0x1e7   : > { %v10579_v47 = vsel %vm7796_vm8, 4294967295, %v10578_v47  ;;  %v10582_v29 = vmov 0  ;;  %v10585_v56 = vand.u32 15, %v7755_v46  ;;  %v10586_v4 = vmov 0 }
 0x1e8   : > { %10580 = vst [vmem:[#allocation74_spill] sm:$0xff] %v10579_v47  ;;  %vm7803_vm0 = vcmp.lt.s32.totalorder %v10581_v32, 15  ;;  %vm10589_vm6 = vcmp.lt.s32.totalorder %v6432_v52, 1  ;;  %v10590_v1 = vrot.slane %v7660_v48, 7  ;;  %vm10592_vm12 = vcmp.lt.s32.totalorder %v6432_v52, 7 }
 0x1e9   : > { %v10583_v29 = vsel %vm7803_vm0, 4294967295, %v10582_v29  ;;  %vm7809_vm3 = vcmp.lt.s32.totalorder %v10585_v56, 15  ;;  %v2182_v50 = vsel %vm10589_vm6, %v2169_v41, %v2170_v62  ;;  %vm10591_vm7 = vmmov %vm10589_vm6  ;;  %v2639_v32 = vsel %vm10592_vm12, %v2626_v42, %v2627_v20 }
 0x1ea   : > { %10584 = vst [vmem:[#allocation112_spill] sm:$0xff] %v10583_v29  ;;  %v10587_v4 = vsel %vm7809_vm3, 4294967295, %v10586_v4  ;;  %v2183_v15 = vsel %vm10591_vm7, %v10590_v1, %v2169_v41  ;;  %v10593_v59 = vrot.slane %v7660_v48, 1  ;;  %vm10594_vm14 = vmmov %vm10592_vm12  ;;  %v2819_v33 = vsel %vm7803_vm0, %v2641_v53, 0.0 }
 0x1eb   : > { %10588 = vst [vmem:[#allocation113_spill] sm:$0xff] %v10587_v4  ;;  %v2400_v56 = vmul.f32 %v6439_v54, %v2183_v15  ;;  %v2821_v62 = vsel %vm7809_vm3, %v2639_v32, 0.0  ;;  %v3087_v58 = vmul.f32 %v6457_v61, %v2115_v3  ;;  %v2365_v41 = vsel %vm7796_vm8, %v2182_v50, 0.0  ;;  %vm10601_vm12 = vmmov %vm10589_vm6 }
 0x1ec   : > { %v2640_v46 = vsel %vm10594_vm14, %v10593_v59, %v2626_v42  ;;  %v2855_v20 = vmul.f32 %v6449_v57, %v2819_v33  ;;  %v2857_v1 = vmul.f32 %v6449_v57, %v2821_v62  ;;  %v2984_v59 = vsel %vm7675_vm2, %v2182_v50, 0.0 }
 0x1ed   : > { %v2856_v48 = vmul.f32 %v6449_v57, %v2640_v46  ;;  %v2596_v42 = vadd.f32 %v2564_v6, %v2400_v56  ;;  %v3019_v53 = vmul.f32 %v6494_v27, %v2183_v15  ;;  %v3117_v7 = vadd.f32 %v3085_v45, %v7637_v44 }
 0x1ee   : > { %v2887_v39 = vadd.f32 %v2855_v20, %v10595_v60  ;;  %v3020_v18 = vmul.f32 %v6494_v27, %v2984_v59  ;;  %v3215_v33 = vsel %vm7803_vm0, %v2639_v32, 0.0  ;;  %v3250_v30 = vmul.f32 %v6478_v17, %v2640_v46 }
 0x1ef   : > { %v2888_v31 = vadd.f32 %v2856_v48, %v2595_v23  ;;  %v2889_v25 = vadd.f32 %v2857_v1, %v2596_v42  ;;  %v3251_v6 = vmul.f32 %v6478_v17, %v3215_v33  ;;  %v3281_v56 = vadd.f32 %v3249_v5, %v3117_v7 }
 0x1f0   : > { %v3051_v62 = vadd.f32 %v3019_v53, %v2887_v39  ;;  %v3410_v49 = vsel %vm7527_vm10, %v2182_v50, 0.0  ;;  %v3445_v44 = vmul.f32 %v6486_v21, %v2183_v15  ;;  %v3282_v23 = vadd.f32 %v3250_v30, %v3118_v35 }
 0x1f1   : > { %v3052_v14 = vadd.f32 %v3020_v18, %v2888_v31  ;;  %v7849_v60 = vadd.f32 %v3021_v28, %v2889_v25  ;;  %v3446_v45 = vmul.f32 %v6486_v21, %v3410_v49  ;;  %v3609_v20 = vmul.f32 %v6459_v22, %v2115_v3  ;;  %v10597_v28 = vld [vmem:[#allocation77_spill] sm:$0xff] }
 0x1f2   : > { %v3119_v48 = vadd.f32 %v3087_v58, %v3051_v62  ;;  %v3477_v1 = vadd.f32 %v3445_v44, %v3281_v56  ;;  %v3769_v42 = vsel %vm7545_vm11, %v2639_v32, 0.0  ;;  %v3804_v39 = vmul.f32 %v7741_v10, %v2640_v46 }
 0x1f3   : > { %v2401_v31 = vmul.f32 %v6439_v54, %v2365_v41  ;;  %v3478_v18 = vadd.f32 %v3446_v45, %v3282_v23  ;;  %v3805_v7 = vmul.f32 %v7741_v10, %v3769_v42  ;;  %v7859_v25 = vadd.s32 240, %v6432_v52 }
 0x1f4   : > { %v3283_v30 = vadd.f32 %v3251_v6, %v3119_v48  ;;  %v3641_v35 = vadd.f32 %v3609_v20, %v3477_v1  ;;  %v7861_v49 = vadd.f32 %v3804_v39, %v3640_v38  ;;  %v7865_v58 = vadd.f32 %v7443_v13, %v10597_v28  ;;  %v10599_v6 = vld [vmem:[#allocation76_spill] sm:$0xff] }
 0x1f5   : > { %10596 = vst [vmem:[#allocation103_spill] sm:$0xff] %v7859_v25  ;;  %v7869_v15 = vmul.f32 %v7726_v8, %v7681_v40  ;;  %v2565_v46 = vmul.f32 %v6442_v55, %v7715_v2  ;;  %v3806_v3 = vmul.f32 %v7741_v10, %v7784_v9  ;;  %v3642_v5 = vadd.f32 %v3610_v12, %v3478_v18 }
 0x1f6   : > { %v7877_v50 = vadd.f32 %v7116_v36, %v7645_v0  ;;  %v3611_v38 = vmul.f32 %v6459_v22, %v7746_v63  ;;  %v3479_v32 = vadd.f32 %v3447_v51, %v3283_v30  ;;  %v7881_v41 = vadd.f32 %v3805_v7, %v3641_v35 }
 0x1f7   : > { %v3088_v8 = vmul.f32 %v6457_v61, %v7715_v2  ;;  %v7885_v59 = vadd.f32 %v3806_v3, %v3642_v5  ;;  %v10254_v53 = vand.u32 15, %v7859_v25  ;;  %v10259_v33 = vrot.slane %v7865_v58, 7 }
 0x1f8   : > { %10598 = vst [vmem:[#allocation77_spill] sm:$0xff] %v7877_v50  ;;  %v2858_v12 = vmul.f32 %v6449_v57, %v7784_v9  ;;  %v3643_v0 = vadd.f32 %v3611_v38, %v3479_v32  ;;  %v7893_v56 = vadd.f32 %v7443_v13, %v10599_v6  ;;  %v2597_v51 = vadd.f32 %v2565_v46, %v2401_v31 }
 0x1f9   : > { %v7897_v62 = vadd.f32 %v7116_v36, %v7654_v16  ;;  %v10600_v2 = vrot.slane %v7746_v63, 7  ;;  %vm7907_vm14 = vcmp.ge.s32.totalorder %v10254_v53, 1  ;;  %v10602_v23 = vmov 0 }
 0x1fa   : > { %v10603_v23 = vsel %vm7907_vm14, 4294967295, %v10602_v23  ;;  %v10258_v45 = vrot.slane %v7865_v58, 1  ;;  %v7913_v20 = vmul.f32 0.044715, %v7877_v50  ;;  %v3089_v36 = vmul.f32 %v6457_v61, %v7746_v63 }
 0x1fb   : > { %v2180_v44 = vsel %vm10601_vm12, %v10600_v2, %v10259_v33  ;;  %10604 = vst [vmem:[#allocation76_spill] sm:$0xff] %v10603_v23  ;;  %v2890_v48 = vadd.f32 %v2858_v12, %v2597_v51  ;;  %v2567_v42 = vmul.f32 %v6442_v55, %v7865_v58  ;;  %v10605_v39 = vrot.slane %v7746_v63, 1 }
 0x1fc   : > { %v2367_v16 = vsel %vm7907_vm14, %v2180_v44, 0.0  ;;  %vm10606_vm7 = vcmp.lt.s32.totalorder %v6432_v52, 7  ;;  %v2986_v18 = vsel %vm7796_vm8, %v2180_v44, 0.0  ;;  %v3252_v7 = vmul.f32 %v6478_v17, %v7784_v9 }
 0x1fd   : > { %v2403_v1 = vmul.f32 %v6439_v54, %v2367_v16  ;;  %v2637_v31 = vsel %vm10606_vm7, %v10605_v39, %v10258_v45  ;;  %v2174_v30 = vrot.slane %v7893_v56, 7  ;;  %v2631_v35 = vrot.slane %v7893_v56, 1 }
 0x1fe   : > { %v3022_v28 = vmul.f32 %v6494_v27, %v2986_v18  ;;  %v7937_v46 = vmul.f32 %v6457_v61, %v7893_v56  ;;  %v3120_v3 = vadd.f32 %v3088_v8, %v3052_v14  ;;  %v3412_v5 = vsel %vm7675_vm2, %v2180_v44, 0.0  ;;  %v10610_v18 = vld [vmem:[#allocation79_spill] sm:$0xff]  ;;  %vm10617_vm2 = vmmov %vm10606_vm7 }
 0x1ff   : > { %v2599_v63 = vadd.f32 %v2567_v42, %v2403_v1  ;;  %v3090_v32 = vmul.f32 %v6457_v61, %v7865_v58  ;;  %v3217_v9 = vsel %vm7809_vm3, %v2637_v31, 0.0  ;;  %v3448_v12 = vmul.f32 %v6486_v21, %v3412_v5 }
 0x200   : > { %v3054_v38 = vadd.f32 %v3022_v28, %v2890_v48  ;;  %v3284_v6 = vadd.f32 %v3252_v7, %v3120_v3  ;;  %v3612_v51 = vmul.f32 %v6459_v22, %v7865_v58  ;;  %v3771_v2 = vsel %vm7803_vm0, %v2637_v31, 0.0  ;;  %v10609_v48 = vld [vmem:[#allocation78_spill] sm:$0xff]  ;;  %vm10625_vm0 = vmmov %vm10606_vm7 }
 0x201   : > { %v7951_v14 = vadd.s32 232, %v6432_v52  ;;  %v3807_v44 = vmul.f32 %v7741_v10, %v3771_v2  ;;  %v7955_v16 = vadd.s32 248, %v6432_v52  ;;  %v7959_v1 = vadd.f32 %v7443_v13, %v10609_v48 }
 0x202   : > { %v3122_v8 = vadd.f32 %v3090_v32, %v3054_v38  ;;  %v3480_v42 = vadd.f32 %v3448_v12, %v3284_v6  ;;  %v2131_v7 = vadd.f32 %v7443_v13, %v10610_v18  ;;  %v3121_v28 = vadd.f32 %v3089_v36, %v7849_v60  ;;  %v10615_v36 = vld [vmem:[#allocation27_spill] sm:$0xff] }
 0x203   : > { %10607 = vst [vmem:[#allocation114_spill] sm:$0xff] %v7951_v14  ;;  %10608 = vst [vmem:[#allocation115_spill] sm:$0xff] %v7955_v16  ;;  %v10255_v39 = vand.u32 15, %v7951_v14  ;;  %v7965_v3 = vadd.f32 %v3807_v44, %v3643_v0  ;;  %v10256_v5 = vand.u32 15, %v7955_v16  ;;  %v10257_v38 = vrot.slane %v7959_v1, 7 }
 0x204   : > { %v2632_v32 = vrot.slane %v7959_v1, 1  ;;  %v3614_v2 = vmul.f32 %v6459_v22, %v7893_v56  ;;  %v3253_v12 = vmul.f32 %v6478_v17, %v3217_v9  ;;  %v7973_v6 = vadd.f32 %v3612_v51, %v3480_v42 }
 0x205   : > { %10611 = vst [vmem:[#allocation78_spill] sm:$0xff] %v7965_v3  ;;  %vm7977_vm6 = vcmp.lt.s32.totalorder %v10255_v39, 15  ;;  %v10612_v13 = vmov 0  ;;  %v2177_v60 = vsel %vm10601_vm12, %v2174_v30, %v10257_v38  ;;  %v10616_v56 = vrot.slane %v10615_v36, 1 }
 0x206   : > { %v10613_v13 = vsel %vm7977_vm6, 4294967295, %v10612_v13  ;;  %v2634_v0 = vsel %vm10606_vm7, %v2631_v35, %v2632_v32  ;;  %v3093_v51 = vmul.f32 %v6457_v61, %v7959_v1  ;;  %vm7997_vm10 = vcmp.lt.s32.totalorder %v10256_v5, 15 }
 0x207   : > { %10614 = vst [vmem:[#allocation79_spill] sm:$0xff] %v10613_v13  ;;  %v7991_v9 = vsel %vm10617_vm2, %v2632_v32, %v10616_v56  ;;  %v10618_v44 = vmov 0  ;;  %v3025_v48 = vmul.f32 %v6494_v27, %v2177_v60  ;;  %v3256_v42 = vmul.f32 %v6478_v17, %v2634_v0  ;;  %vm10621_vm2 = vmmov %vm10601_vm12  ;;  %v10693_v13 = vld [vmem:[#allocation95_spill] sm:$0xff] }
 0x208   : > { %v10619_v44 = vsel %vm7997_vm10, 4294967295, %v10618_v44  ;;  %v8005_v18 = vmul.f32 %v6459_v22, %v7959_v1  ;;  %v3221_v32 = vsel %vm7997_vm10, %v7991_v9, 0.0  ;;  %v3451_v56 = vmul.f32 %v6486_v21, %v2177_v60  ;;  %vm10623_vm12 = vmmov %vm10621_vm2 }
 0x209   : > { %10620 = vst [vmem:[#allocation27_spill] sm:$0xff] %v10619_v44  ;;  %v3775_v53 = vsel %vm7977_vm6, %v7991_v9, 0.0  ;;  %v2173_v39 = vrot.slane %v2131_v7, 7  ;;  %v3257_v5 = vmul.f32 %v6478_v17, %v3221_v32  ;;  %v3810_v38 = vmul.f32 %v7741_v10, %v2634_v0 }
 0x20a   : > { %v2568_v45 = vmul.f32 %v6442_v55, %v2131_v7  ;;  %v2630_v33 = vrot.slane %v2131_v7, 1  ;;  %v10622_v14 = vrot.slane %v7865_v58, 7  ;;  %v2823_v43 = vsel %vm7977_vm6, %v2637_v31, 0.0 }
 0x20b   : > { %v2178_v25 = vsel %vm10621_vm2, %v2173_v39, %v2174_v30  ;;  %v3091_v9 = vmul.f32 %v6457_v61, %v2131_v7  ;;  %v10624_v55 = vrot.slane %v7865_v58, 1  ;;  %v2859_v11 = vmul.f32 %v6449_v57, %v2823_v43 }
 0x20c   : > { %v2179_v60 = vsel %vm10623_vm12, %v10622_v14, %v2173_v39  ;;  %v2635_v0 = vsel %vm10606_vm7, %v2630_v33, %v2631_v35  ;;  %v2988_v61 = vsel %vm7907_vm14, %v2178_v25, 0.0  ;;  %v3285_v44 = vadd.f32 %v3253_v12, %v3121_v28 }
 0x20d   : > { %v2404_v32 = vmul.f32 %v6439_v54, %v2179_v60  ;;  %v2636_v30 = vsel %vm10625_vm0, %v10624_v55, %v2630_v33  ;;  %v2825_v14 = vsel %vm7997_vm10, %v2635_v0, 0.0  ;;  %v3023_v31 = vmul.f32 %v6494_v27, %v2179_v60  ;;  %vm10637_vm0 = vmmov %vm10621_vm2 }
 0x20e   : > { %v2860_v39 = vmul.f32 %v6449_v57, %v2636_v30  ;;  %v2861_v35 = vmul.f32 %v6449_v57, %v2825_v14  ;;  %v2891_v58 = vadd.f32 %v2859_v11, %v7791_v26  ;;  %v3024_v29 = vmul.f32 %v6494_v27, %v2988_v61  ;;  %vm10640_vm2 = vmmov %vm10637_vm0 }
 0x20f   : > { %v2600_v16 = vadd.f32 %v2568_v45, %v2404_v32  ;;  %v3219_v43 = vsel %vm7977_vm6, %v2635_v0, 0.0  ;;  %v3254_v55 = vmul.f32 %v6478_v17, %v2636_v30  ;;  %v3414_v45 = vsel %vm7796_vm8, %v2178_v25, 0.0 }
 0x210   : > { %v2892_v33 = vadd.f32 %v2860_v39, %v2599_v63  ;;  %v3055_v3 = vadd.f32 %v3023_v31, %v2891_v58  ;;  %v3255_v23 = vmul.f32 %v6478_v17, %v3219_v43  ;;  %v3449_v11 = vmul.f32 %v6486_v21, %v2179_v60 }
 0x211   : > { %v2893_v19 = vadd.f32 %v2861_v35, %v2600_v16  ;;  %v3286_v57 = vadd.f32 %v3254_v55, %v3122_v8  ;;  %v3450_v26 = vmul.f32 %v6486_v21, %v3414_v45  ;;  %v3452_v39 = vmul.f32 0.0, %v6486_v21  ;;  %v10627_v55 = vld [vmem:[#allocation58_spill] sm:$0xff] }
 0x212   : > { %v3056_v32 = vadd.f32 %v3024_v29, %v2892_v33  ;;  %v3123_v14 = vadd.f32 %v3091_v9, %v3055_v3  ;;  %v3613_v61 = vmul.f32 %v6459_v22, %v2131_v7  ;;  %v3481_v28 = vadd.f32 %v3449_v11, %v3285_v44  ;;  %v10629_v11 = vld [vmem:[#allocation71_spill] sm:$0xff] }
 0x213   : > { %v3057_v63 = vadd.f32 %v3025_v48, %v2893_v19  ;;  %v3482_v12 = vadd.f32 %v3450_v26, %v3286_v57  ;;  %v3616_v31 = vmul.f32 0.0, %v6459_v22  ;;  %v3773_v29 = vsel %vm7809_vm3, %v2635_v0, 0.0  ;;  %v10630_v26 = vld [vmem:[#allocation107_spill] sm:$0xff] }
 0x214   : > { %v3124_v16 = vadd.f32 %v7937_v46, %v3056_v32  ;;  %v3287_v25 = vadd.f32 %v3255_v23, %v3123_v14  ;;  %v3808_v8 = vmul.f32 %v7741_v10, %v2636_v30  ;;  %v3645_v19 = vadd.f32 %v3613_v61, %v3481_v28 }
 0x215   : > { %v3125_v35 = vadd.f32 %v3093_v51, %v3057_v63  ;;  %v3646_v3 = vadd.f32 %v3614_v2, %v3482_v12  ;;  %v3809_v48 = vmul.f32 %v7741_v10, %v3773_v29  ;;  %v3812_v46 = vmul.f32 0.0, %v7741_v10  ;;  %v10631_v63 = vld [vmem:[#allocation108_spill] sm:$0xff] }
 0x216   : > { %v3288_v60 = vadd.f32 %v3256_v42, %v3124_v16  ;;  %v3483_v7 = vadd.f32 %v3451_v56, %v3287_v25  ;;  %v8061_v44 = vadd.f32 %v3808_v8, %v7973_v6  ;;  %v8068_v0 = vadd.s32 8, %v6432_v52  ;;  %v8080_v56 = vld [vmem:[%s10083_s4] ss:$0 sm:$0xff]  ;;  %v10632_v16 = vld [vmem:[#allocation67_spill] sm:$0xff] }
 0x217   : > { %v3289_v9 = vadd.f32 %v3257_v5, %v3125_v35  ;;  %v8063_v51 = vadd.f32 %v3809_v48, %v3645_v19  ;;  %v8065_v23 = vadd.f32 %v3810_v38, %v3646_v3  ;;  %v3811_v42 = vmul.f32 %v7741_v10, %v3775_v53 }
 0x218   : > { %v3484_v22 = vadd.f32 %v3452_v39, %v3288_v60  ;;  %v3647_v30 = vadd.f32 %v8005_v18, %v3483_v7  ;;  %v8073_v5 = vadd.s32 16, %v6432_v52  ;;  %v3995_v6 = vmul.f32 %v7869_v15, %v7681_v40  ;;  %v10635_v60 = vld [vmem:[#allocation28_spill] sm:$0xff] }
 0x219   : > { %v3485_v2 = vadd.f32 %v3452_v39, %v3289_v9  ;;  %v8084_v38 = vadd.f32 %v8080_v56, %v7656_v37  ;;  %v8087_v53 = vadd.s32 32, %v6432_v52  ;;  %v8091_v18 = vadd.f32 %v7691_v34, %v7497_v24 }
 0x21a   : > { %v3648_v58 = vadd.f32 %v3616_v31, %v3484_v22  ;;  %v3936_v33 = vmul.f32 0.044715, %v7897_v62  ;;  %v3967_v15 = vmul.f32 %v7913_v20, %v7877_v50  ;;  %v8096_v43 = vadd.f32 %v3811_v42, %v3647_v30 }
 0x21b   : > { %v8100_v45 = vadd.f32 %v8080_v56, %v10627_v55  ;;  %v10275_v32 = vand.u32 15, %v6432_v52  ;;  %v10276_v57 = vand.u32 15, %v8068_v0  ;;  %v8107_v34 = vmul.f32 0.044715, %v10629_v11 }
 0x21c   : > { %10626 = vst [vmem:[#allocation116_spill] sm:$0xff] %v8096_v43  ;;  %v8102_v37 = vadd.f32 %v3812_v46, %v3648_v58  ;;  %v8111_v14 = vmul.f32 %v10631_v63, %v10630_v26  ;;  %v3649_v20 = vadd.f32 %v3616_v31, %v3485_v2  ;;  %v10274_v39 = vand.u32 15, %v8073_v5  ;;  %v10633_v31 = vld [vmem:[#allocation24_spill] sm:$0xff]  ;;  %v10649_v63 = vld [vmem:[#allocation46_spill] sm:$0xff] }
 0x21d   : > { %v8115_v61 = vadd.f32 %v3995_v6, %v7681_v40  ;;  %v8119_v28 = vadd.f32 %v8080_v56, %v10632_v16  ;;  %v8122_v12 = vmul.f32 0.044715, %v8084_v38  ;;  %v10273_v35 = vand.u32 15, %v8087_v53 }
 0x21e   : > { %10628 = vst [vmem:[#allocation58_spill] sm:$0xff] %v8102_v37  ;;  %v8126_v25 = vmul.f32 %v3936_v33, %v7897_v62  ;;  %v3999_v29 = vmul.f32 %v3967_v15, %v7877_v50  ;;  %v10634_v8 = vrot.slane %v10633_v31, 7  ;;  %v10636_v19 = vrot.slane %v10635_v60, 7  ;;  %v10652_v60 = vld [vmem:[#allocation80_spill] sm:$0xff] }
 0x21f   : > { %v10638_v48 = vrot.slane %v10615_v36, 7  ;;  %v10639_v9 = vrot.slane %v7959_v1, 7  ;;  %vm8143_vm12 = vcmp.ge.s32.totalorder %v10275_v32, 1  ;;  %vm8149_vm7 = vcmp.ge.s32.totalorder %v10274_v39, 1 }
 0x220   : > { %v2206_v3 = vsel %vm10637_vm0, %v10636_v19, %v10634_v8  ;;  %vm8155_vm0 = vcmp.ge.s32.totalorder %v10273_v35, 1  ;;  %v10645_v36 = vmov 0  ;;  %v3845_v2 = vadd.f32 %v3812_v46, %v3649_v20  ;;  %v10651_v8 = vld [vmem:[#allocation34_spill] sm:$0xff] }
 0x221   : > { %v2208_v7 = vsel %vm10640_vm2, %v10639_v9, %v10638_v48  ;;  %v10646_v36 = vsel %vm8155_vm0, 4294967295, %v10645_v36  ;;  %vm8161_vm2 = vcmp.lt.s32.totalorder %v10276_v57, 15  ;;  %v2341_v6 = vsel %vm8155_vm0, %v2206_v3, 0.0  ;;  %v10653_v48 = vld [vmem:[#allocation61_spill] sm:$0xff] }
 0x222   : > { %v2339_v30 = vsel %vm8149_vm7, %v2208_v7, 0.0  ;;  %v2958_v58 = vsel %vm8143_vm12, %v2208_v7, 0.0  ;;  %v2377_v15 = vmul.f32 %v6439_v54, %v2341_v6  ;;  %v2960_v55 = vsel %vm8149_vm7, %v2206_v3, 0.0 }
 0x223   : > { %v2375_v33 = vmul.f32 %v6439_v54, %v2339_v30  ;;  %v2962_v46 = vsel %vm8155_vm0, %v10649_v63, 0.0  ;;  %v8179_v20 = vadd.f32 %v3999_v29, %v7877_v50  ;;  %v8183_v16 = vadd.f32 %v8080_v56, %v7861_v49 }
 0x224   : > { %v2994_v31 = vmul.f32 %v6494_v27, %v2958_v58  ;;  %v3191_v54 = vsel %vm8161_vm2, %v10651_v8, 0.0  ;;  %v2573_v9 = vadd.f32 %v10653_v48, %v2377_v15  ;;  %v2998_v7 = vmul.f32 %v6494_v27, %v2962_v46  ;;  %v10655_v58 = vld [vmem:[#allocation20_spill] sm:$0xff]  ;;  %v10656_v8 = vld [vmem:[#allocation35_spill] sm:$0xff]  ;;  %v10658_v15 = vld [vmem:[#allocation45_spill] sm:$0xff] }
 0x225   : > { %10650 = vst [vmem:[#allocation71_spill] sm:$0xff] %v8183_v16  ;;  %v2571_v19 = vadd.f32 %v10652_v60, %v2375_v33  ;;  %v3227_v30 = vmul.f32 %v6478_v17, %v3191_v54  ;;  %v8195_v29 = vadd.f32 %v8080_v56, %v7881_v41  ;;  %v8198_v49 = vadd.f32 %v8080_v56, %v3845_v2  ;;  %v10657_v33 = vld [vmem:[#allocation82_spill] sm:$0xff]  ;;  %v10660_v46 = vld [vmem:[#allocation81_spill] sm:$0xff] }
 0x226   : > { %v2996_v6 = vmul.f32 %v6494_v27, %v2960_v55  ;;  %v3026_v35 = vadd.f32 %v2994_v31, %v10655_v58  ;;  %v2866_v60 = vadd.f32 %v10657_v33, %v2573_v9  ;;  %v3386_v17 = vsel %vm8143_vm12, %v2206_v3, 0.0  ;;  %v10661_v27 = vld [vmem:[#allocation47_spill] sm:$0xff] }
 0x227   : > { %10654 = vst [vmem:[#allocation107_spill] sm:$0xff] %v8195_v29  ;;  %v2864_v39 = vadd.f32 %v10656_v8, %v2571_v19  ;;  %v3259_v48 = vadd.f32 %v3227_v30, %v10658_v15  ;;  %v8209_v41 = vadd.f32 %v8080_v56, %v7885_v59  ;;  %v3939_v2 = vmul.f32 0.044715, %v8183_v16  ;;  %v10662_v30 = vld [vmem:[#allocation30_spill] sm:$0xff]  ;;  %v10663_v58 = vld [vmem:[#allocation87_spill] sm:$0xff] }
 0x228   : > { %v3094_v54 = vadd.f32 %v10660_v46, %v3026_v35  ;;  %v3747_v55 = vsel %vm8161_vm2, %v10661_v27, 0.0  ;;  %v3030_v19 = vadd.f32 %v2998_v7, %v2866_v60  ;;  %v3388_v9 = vsel %vm8149_vm7, %v10649_v63, 0.0  ;;  %v10664_v59 = vld [vmem:[#allocation51_spill] sm:$0xff]  ;;  %v10665_v46 = vld [vmem:[#allocation65_spill] sm:$0xff] }
 0x229   : > { %10659 = vst [vmem:[#allocation108_spill] sm:$0xff] %v8209_v41  ;;  %v3028_v31 = vadd.f32 %v2996_v6, %v2864_v39  ;;  %v3455_v3 = vadd.f32 %v10662_v30, %v3259_v48  ;;  %v3390_v33 = vsel %vm8155_vm0, %v10664_v59, 0.0  ;;  %v3422_v35 = vmul.f32 %v6486_v21, %v3386_v17  ;;  %v10666_v39 = vld [vmem:[#allocation57_spill] sm:$0xff]  ;;  %v10667_v6 = vld [vmem:[#allocation83_spill] sm:$0xff]  ;;  %v10668_v59 = vld [vmem:[#allocation84_spill] sm:$0xff] }
 0x22a   : > { %v3258_v8 = vadd.f32 %v10663_v58, %v3094_v54  ;;  %v3948_v15 = vmul.f32 0.044715, %v8198_v49  ;;  %v3098_v7 = vadd.f32 %v10666_v39, %v3030_v19  ;;  %v3783_v63 = vmul.f32 %v7741_v10, %v3747_v55  ;;  %v10669_v17 = vld [vmem:[#allocation52_spill] sm:$0xff]  ;;  %v10671_v39 = vld [vmem:[#allocation31_spill] sm:$0xff] }
 0x22b   : > { %v3096_v27 = vadd.f32 %v10665_v46, %v3028_v31  ;;  %v3619_v60 = vadd.f32 %v10667_v6, %v3455_v3  ;;  %v3971_v48 = vmul.f32 %v3939_v2, %v8183_v16  ;;  %v3424_v54 = vmul.f32 %v6486_v21, %v3388_v9  ;;  %v10670_v46 = vld [vmem:[#allocation70_spill] sm:$0xff]  ;;  %v10672_v2 = vld [vmem:[#allocation53_spill] sm:$0xff] }
 0x22c   : > { %v3454_v30 = vadd.f32 %v3422_v35, %v3258_v8  ;;  %v3980_v58 = vmul.f32 %v3948_v15, %v8198_v49  ;;  %v3262_v57 = vadd.f32 %v10669_v17, %v3098_v7  ;;  %v3426_v47 = vmul.f32 %v6486_v21, %v3390_v33  ;;  %v10673_v6 = vld [vmem:[#allocation93_spill] sm:$0xff]  ;;  %v10674_v8 = vld [vmem:[#allocation110_spill] sm:$0xff] }
 0x22d   : > { %v3260_v32 = vadd.f32 %v10668_v59, %v3096_v27  ;;  %v3815_v31 = vadd.f32 %v3783_v63, %v3619_v60  ;;  %v3782_v3 = vmul.f32 %v7741_v10, %v10671_v39  ;;  %v3984_v9 = vmul.f32 %v10673_v6, %v10672_v2  ;;  %v10678_v59 = vld [vmem:[#allocation88_spill] sm:$0xff]  ;;  %v10681_v6 = vld [vmem:[#allocation66_spill] sm:$0xff] }
 0x22e   : > { %v3618_v19 = vadd.f32 %v10670_v46, %v3454_v30  ;;  %v4012_v55 = vmul.f32 %v3980_v58, %v8198_v49  ;;  %v8244_v35 = vadd.f32 %v8080_v56, %v10674_v8  ;;  %v3458_v27 = vadd.f32 %v3426_v47, %v3262_v57  ;;  %v10677_v30 = vld [vmem:[#allocation42_spill] sm:$0xff]  ;;  %v10679_v46 = vld [vmem:[#allocation56_spill] sm:$0xff] }
 0x22f   : > { %v3456_v15 = vadd.f32 %v3424_v54, %v3260_v32  ;;  %v8247_v7 = vadd.f32 %v8080_v56, %v3815_v31  ;;  %v3940_v21 = vmul.f32 0.044715, %v8195_v29  ;;  %v4016_v10 = vadd.f32 %v3984_v9, %v10672_v2  ;;  %v10680_v39 = vld [vmem:[#allocation48_spill] sm:$0xff] }
 0x230   : > { %10675 = vst [vmem:[#allocation67_spill] sm:$0xff] %v8244_v35  ;;  %v3814_v33 = vadd.f32 %v3782_v3, %v3618_v19  ;;  %v4044_v60 = vadd.f32 %v4012_v55, %v8198_v49  ;;  %v8253_v63 = vmul.f32 0.044715, %v8209_v41  ;;  %v3622_v17 = vadd.f32 %v10678_v59, %v3458_v27 }
 0x231   : > { %v3620_v58 = vadd.f32 %v10677_v30, %v3456_v15  ;;  %v3918_v32 = vmul.f32 0.044715, %v8247_v7  ;;  %v4003_v47 = vmul.f32 %v3971_v48, %v8183_v16  ;;  %v4048_v31 = vmul.f32 0.7978846, %v4016_v10  ;;  %v10683_v48 = vld [vmem:[#allocation100_spill] sm:$0xff] }
 0x232   : > { %10676 = vst [vmem:[#allocation24_spill] sm:$0xff] %v8253_v63  ;;  %v8260_v57 = vadd.f32 %v8080_v56, %v3814_v33  ;;  %v4076_v54 = vmul.f32 0.7978846, %v4044_v60  ;;  %v3818_v3 = vadd.f32 %v10680_v39, %v3622_v17  ;;  %v3922_v9 = vmul.f32 0.044715, %v10681_v6 }
 0x233   : > { %v3816_v19 = vadd.f32 %v10679_v46, %v3620_v58  ;;  %v3950_v55 = vmul.f32 %v3918_v32, %v8247_v7  ;;  %v8268_v8 = vadd.f32 %v8080_v56, %v8061_v44  ;;  %v4051_v27 = vmul.f32 0.7978846, %v10683_v48  ;;  %v10687_v46 = vld [vmem:[#allocation78_spill] sm:$0xff] }
 0x234   : > { %v3917_v15 = vmul.f32 0.044715, %v8260_v57  ;;  %5524 = vtanh.f32 %v4076_v54  ;;  %v3857_v60 = vadd.f32 %v8080_v56, %v3818_v3  ;;  %v8276_v30 = vmul.f32 %v3940_v21, %v8195_v29 }
 0x235   : > { %10682 = vst [vmem:[#allocation28_spill] sm:$0xff] %v8268_v8  ;;  %v3855_v33 = vadd.f32 %v8080_v56, %v3816_v19  ;;  %v3982_v10 = vmul.f32 %v3950_v55, %v8247_v7  ;;  %5526 = vtanh.f32 %v4048_v31  ;;  %v3954_v44 = vmul.f32 %v3922_v9, %v10681_v6 }
 0x236   : > { %10684 = vst [vmem:[#allocation46_spill] sm:$0xff] %v8276_v30  ;;  %v3949_v58 = vmul.f32 %v3917_v15, %v8260_v57  ;;  %5528 = vtanh.f32 %v4051_v27  ;;  %v8281_v59 = vadd.f32 %v4003_v47, %v8183_v16  ;;  %v8285_v17 = vadd.f32 %v8080_v56, %v8063_v51  ;;  %v10690_v27 = vld [vmem:[#allocation96_spill] sm:$0xff] }
 0x237   : > { %v3919_v32 = vmul.f32 0.044715, %v3855_v33  ;;  %v4014_v54 = vadd.f32 %v3982_v10, %v8247_v7  ;;  %v8290_v31 = vadd.f32 %v8080_v56, %v10687_v46  ;;  %v3921_v19 = vmul.f32 0.044715, %v3857_v60  ;;  %v10691_v10 = vld [vmem:[#allocation69_spill] sm:$0xff] }
 0x238   : > { %10685 = vst [vmem:[#allocation34_spill] sm:$0xff] %v8281_v59  ;;  %10686 = vst [vmem:[#allocation80_spill] sm:$0xff] %v8285_v17  ;;  %v3981_v21 = vmul.f32 %v3949_v58, %v8260_v57  ;;  %v3986_v39 = vmul.f32 %v3954_v44, %v10681_v6  ;;  %v8296_v47 = vadd.f32 %v8080_v56, %v8065_v23  ;;  %v3943_v3 = vmul.f32 0.044715, %v8268_v8  ;;  %v10694_v23 = vld [vmem:[#allocation99_spill] sm:$0xff] }
 0x239   : > { %10688 = vst [vmem:[#allocation61_spill] sm:$0xff] %v8290_v31  ;;  %v3951_v51 = vmul.f32 %v3919_v32, %v3855_v33  ;;  %v4046_v55 = vmul.f32 0.7978846, %v4014_v54  ;;  %v3953_v15 = vmul.f32 %v3921_v19, %v3857_v60  ;;  %v3957_v46 = vmul.f32 %v10691_v10, %v10690_v27 }
 0x23a   : > { %10689 = vst [vmem:[#allocation20_spill] sm:$0xff] %v8296_v47  ;;  %v4013_v9 = vadd.f32 %v3981_v21, %v8260_v57  ;;  %v4018_v48 = vadd.f32 %v3986_v39, %v10681_v6  ;;  %v8304_v58 = vmul.f32 0.044715, %v8285_v17  ;;  %v3988_v56 = vmul.f32 %v10694_v23, %v10693_v13 }
 0x23b   : > { %v3983_v44 = vmul.f32 %v3951_v51, %v3855_v33  ;;  %5530 = vtanh.f32 %v4046_v55  ;;  %v3985_v31 = vmul.f32 %v3953_v15, %v3857_v60  ;;  %v3989_v54 = vmul.f32 %v3957_v46, %v10690_v27 }
 0x23c   : > { %10692 = vst [vmem:[#allocation35_spill] sm:$0xff] %v8304_v58  ;;  %v4045_v4 = vmul.f32 0.7978846, %v4013_v9  ;;  %v4050_v32 = vmul.f32 0.7978846, %v4018_v48  ;;  %v8313_v19 = vmul.f32 %v3943_v3, %v8268_v8  ;;  %v4020_v10 = vadd.f32 %v3988_v56, %v10693_v13 }
 0x23d   : > { %v8310_v21 = vmul.f32 0.044715, %v8296_v47  ;;  %v4015_v39 = vadd.f32 %v3983_v44, %v3855_v33  ;;  %v3916_v51 = vmul.f32 0.5, %v8198_v49  ;;  %v3888_v55 = vmul.f32 0.5, %v10672_v2 }
 0x23e   : > { %10696 = vst [vmem:[#allocation45_spill] sm:$0xff] %v8313_v19  ;;  %v5525_v37 = vpop.eup %5524  ;;  %5532 = vtanh.f32 %v4045_v4  ;;  %v4017_v9 = vadd.f32 %v3985_v31, %v3857_v60  ;;  %v4052_v46 = vmul.f32 0.7978846, %v4020_v10  ;;  %v8319_v3 = vmul.f32 0.5, %v10681_v6  ;;  %v10698_v4 = vld [vmem:[#allocation92_spill] sm:$0xff] }
 0x23f   : > { %10695 = vst [vmem:[#allocation82_spill] sm:$0xff] %v8310_v21  ;;  %v5527_v15 = vpop.eup %5526  ;;  %v4047_v48 = vmul.f32 0.7978846, %v4015_v39  ;;  %v4140_v23 = vadd.f32 1.0, %v5525_v37  ;;  %5534 = vtanh.f32 %v4050_v32  ;;  %v4021_v44 = vadd.f32 %v3989_v54, %v10690_v27  ;;  %v10699_v32 = vld [vmem:[#allocation72_spill] sm:$0xff] }
 0x240   : > { %v5529_v47 = vpop.eup %5528  ;;  %v4049_v21 = vmul.f32 0.7978846, %v4017_v9  ;;  %v4112_v30 = vadd.f32 1.0, %v5527_v15  ;;  %v3891_v49 = vmul.f32 0.5, %v10698_v4  ;;  %v3886_v31 = vmul.f32 0.5, %v8247_v7  ;;  %v10706_v4 = vld [vmem:[#allocation68_spill] sm:$0xff] }
 0x241   : > { %5536 = vtanh.f32 %v4047_v48  ;;  %v8322_v56 = vmul.f32 %v4140_v23, %v3916_v51  ;;  %v4115_v2 = vadd.f32 1.0, %v5529_v47  ;;  %v3926_v39 = vmul.f32 0.044715, %v10699_v32 }
 0x242   : > { %5538 = vtanh.f32 %v4049_v21  ;;  %v8326_v37 = vmul.f32 %v4112_v30, %v3888_v55  ;;  %v3885_v10 = vmul.f32 0.5, %v8260_v57  ;;  %v3887_v9 = vmul.f32 0.5, %v3855_v33 }
 0x243   : > { %10697 = vst [vmem:[#allocation81_spill] sm:$0xff] %v8322_v56  ;;  %v8330_v6 = vmul.f32 %v4115_v2, %v3891_v49  ;;  %5540 = vtanh.f32 %v4052_v46  ;;  %v8332_v54 = vmul.f32 0.5, %v3857_v60  ;;  %v8335_v51 = vmul.f32 0.5, %v10693_v13  ;;  %v10707_v49 = vld [vmem:[#allocation104_spill] sm:$0xff] }
 0x244   : > { %v8338_v47 = vmul.f32 0.5, %v10690_v27  ;;  %v4053_v7 = vmul.f32 0.7978846, %v4021_v44  ;;  %v10700_v30 = vand.u32 15, %v8068_v0  ;;  %v4055_v13 = vmul.f32 0.7978846, %v8091_v18 }
 0x245   : > { %v5531_v21 = vpop.eup %5530  ;;  %v10703_v27 = vand.u32 15, %v6432_v52  ;;  %v3958_v46 = vmul.f32 %v3926_v39, %v10699_v32  ;;  %v3961_v2 = vmul.f32 %v10707_v49, %v10706_v4  ;;  %v10710_v0 = vld [vmem:[#allocation12_spill] sm:$0xff]  ;;  %vm10723_vm1 = vcmp.lt.s32.totalorder %v6432_v52, 6 }
 0x246   : > { %vm8342_vm14 = vcmp.lt.s32.totalorder %v10700_v30, 14  ;;  %v4110_v15 = vadd.f32 1.0, %v5531_v21  ;;  %v10708_v21 = vld [vmem:[#allocation101_spill] sm:$0xff]  ;;  %v10709_v30 = vld [vmem:[#allocation106_spill] sm:$0xff]  ;;  %v10711_v57 = vand.u32 15, %v10710_v0  ;;  %5542 = vtanh.f32 %v4053_v7 }
 0x247   : > { %vm8353_vm6 = vcmp.ge.s32.totalorder %v10703_v27, 2  ;;  %v3992_v27 = vmul.f32 %v10709_v30, %v10708_v21  ;;  %v3990_v18 = vmul.f32 %v3958_v46, %v10699_v32  ;;  %v3993_v30 = vmul.f32 %v3961_v2, %v10706_v4 }
 0x248   : > { %v5533_v60 = vpop.eup %5532  ;;  %v8367_v33 = vmul.f32 %v4110_v15, %v3886_v31  ;;  %vm8371_vm8 = vcmp.lt.s32.totalorder %v10711_v57, 14  ;;  %5544 = vtanh.f32 %v4055_v13  ;;  %v10714_v2 = vand.u32 15, %v8073_v5 }
 0x249   : > { %v5535_v44 = vpop.eup %5534  ;;  %v4109_v29 = vadd.f32 1.0, %v5533_v60  ;;  %v4024_v31 = vadd.f32 %v3992_v27, %v10708_v21  ;;  %v8394_v16 = vadd.f32 %v3990_v18, %v10699_v32  ;;  %v8397_v13 = vadd.f32 %v3993_v30, %v10706_v4 }
 0x24a   : > { %v4302_v15 = vrot.slane %v8367_v33, 2  ;;  %v4431_v57 = vrot.slane %v8367_v33, 1  ;;  %v4114_v46 = vadd.f32 1.0, %v5535_v44  ;;  %vm8389_vm10 = vcmp.ge.s32.totalorder %v10714_v2, 2  ;;  %v10717_v2 = vld [vmem:[#allocation14_spill] sm:$0xff] }
 0x24b   : > { %v5537_v63 = vpop.eup %5536  ;;  %v8383_v39 = vmul.f32 %v4109_v29, %v3885_v10  ;;  %v8399_v29 = vmul.f32 0.7978846, %v4024_v31  ;;  %v10718_v60 = vand.u32 15, %v10717_v2  ;;  %v10719_v7 = vmov 0 }
 0x24c   : > { %v5539_v49 = vpop.eup %5538  ;;  %v4111_v41 = vadd.f32 1.0, %v5537_v63  ;;  %v8416_v0 = vmul.f32 %v4114_v46, %v8319_v3  ;;  %vm10725_vm0 = vcmp.lt.s32.totalorder %v6432_v52, 7  ;;  %v10727_v3 = vrot.slane %v8367_v33, 7 }
 0x24d   : > { %v5541_v10 = vpop.eup %5540  ;;  %v4590_v63 = vrot.slane %v8383_v39, 7  ;;  %v4814_v5 = vrot.slane %v8383_v39, 6  ;;  %vm8407_vm3 = vcmp.lt.s32.totalorder %v10718_v60, 14  ;;  %v4113_v31 = vadd.f32 1.0, %v5539_v49 }
 0x24e   : > { %v10720_v7 = vsel %vm8407_vm3, 4294967295, %v10719_v7  ;;  %v4143_v18 = vmul.f32 %v4111_v41, %v3887_v9  ;;  %v8418_v44 = vadd.f32 1.0, %v5541_v10  ;;  %v10722_v59 = vrot.slane %v8383_v39, 2  ;;  %vm10730_vm3 = vmmov %vm10728_vm15  ;;  %v10731_v10 = vld [vmem:[#allocation8_spill] sm:$0xff] }
 0x24f   : > { %v10724_v2 = vrot.slane %v8383_v39, 1  ;;  %v4652_v49 = vsel %vm10728_vm15, %v4590_v63, %v10727_v3  ;;  %v10729_v46 = vrot.slane %v8322_v56, 7  ;;  %v10736_v3 = vrot.slane %v8367_v33, 6 }
 0x250   : > { %v4364_v60 = vsel %vm10723_vm1, %v10722_v59, %v4302_v15  ;;  %vm10732_vm1 = vcmp.lt.s32.totalorder %v10731_v10, 26  ;;  %v4303_v35 = vrot.slane %v4143_v18, 2  ;;  %v4432_v19 = vrot.slane %v4143_v18, 1  ;;  %v8471_v17 = vpop.eup %5542 }
 0x251   : > { %v4492_v41 = vsel %vm10725_vm0, %v10724_v2, %v4431_v57  ;;  %v4653_v59 = vsel %vm10730_vm3, %v10729_v46, %v4590_v63  ;;  %vm8444_vm0 = vmand %vm10732_vm1, %vm8342_vm14  ;;  %vm10737_vm15 = vcmp.lt.s32.totalorder %v6432_v52, 2  ;;  %vm10738_vm3 = vcmp.ge.s32.totalorder %v10731_v10, 104 }
 0x252   : > { %vm10735_vm11 = vmmov %vm10732_vm1  ;;  %v4877_v8 = vsel %vm10737_vm15, %v4814_v5, %v10736_v3  ;;  %v10741_v46 = vrot.slane %v8322_v56, 6  ;;  %v8469_v58 = vmul.f32 %v4113_v31, %v8332_v54  ;;  %v4592_v3 = vrot.slane %v4143_v18, 7  ;;  %v8508_v2 = vpop.eup %5544 }
 0x253   : > { %v4366_v50 = vsel %vm10735_vm11, %v4364_v60, 0.0  ;;  %vm8460_vm14 = vmand %vm10738_vm3, %vm8353_vm6  ;;  %vm10743_vm1 = vcmp.lt.s32.totalorder %v6432_v52, 6  ;;  %v10746_v56 = vrot.slane %v8326_v37, 2  ;;  %v10748_v54 = vand.u32 15, %v8087_v53 }
 0x254   : > { %v4494_v63 = vsel %vm5868_vm4, %v4492_v41, %v4366_v50  ;;  %vm10742_vm11 = vmmov %vm10737_vm15  ;;  %v4363_v50 = vsel %vm10743_vm1, %v4302_v15, %v4303_v35  ;;  %vm10744_vm15 = vcmp.lt.s32.totalorder %v6432_v52, 7  ;;  %v4305_v53 = vrot.slane %v8469_v58, 2 }
 0x255   : > { %v4878_v60 = vsel %vm10742_vm11, %v10741_v46, %v4814_v5  ;;  %v4491_v48 = vsel %vm10744_vm15, %v4431_v57, %v4432_v19  ;;  %v4526_v43 = vsel %vm5872_vm5, %v8383_v39, %v4494_v63  ;;  %vm10747_vm6 = vmmov %vm10743_vm1  ;;  %vm8486_vm3 = vcmp.ge.s32.totalorder %v10748_v54, 2 }
 0x256   : > { %v4362_v5 = vsel %vm10747_vm6, %v4303_v35, %v10746_v56  ;;  %v4367_v15 = vsel %vm8444_vm0, %v4363_v50, 0.0  ;;  %vm10751_vm11 = vmand %vm5998_vm9, %vm8143_vm12  ;;  %vm10752_vm1 = vcmp.lt.s32.totalorder %v10731_v10, 26  ;;  %v10758_v63 = vrot.slane %v8326_v37, 1 }
 0x257   : > { %v4654_v57 = vsel %vm10751_vm11, %v4653_v59, %v4526_v43  ;;  %vm8501_vm15 = vmand %vm10752_vm1, %vm8371_vm8  ;;  %v4434_v59 = vrot.slane %v8469_v58, 1  ;;  %vm10759_vm0 = vcmp.lt.s32.totalorder %v6432_v52, 7  ;;  %v10760_v50 = vrot.slane %v8326_v37, 2 }
 0x258   : > { %vm10755_vm6 = vmmov %vm10752_vm1  ;;  %v4879_v22 = vsel %vm8460_vm14, %v4878_v60, %v4654_v57  ;;  %v4490_v46 = vsel %vm10759_vm0, %v4432_v19, %v10758_v63  ;;  %vm10763_vm14 = vcmp.lt.s32.totalorder %v6432_v52, 1  ;;  %v10767_v23 = vrot.slane %v8367_v33, 7 }
 0x259   : > { %v4368_v56 = vsel %vm10755_vm6, %v4362_v5, 0.0  ;;  %vm10756_vm12 = vmand %vm5868_vm4, %vm8161_vm2  ;;  %vm10761_vm2 = vcmp.lt.s32.totalorder %v6432_v52, 6  ;;  %v10790_v35 = vrot.slane %v8330_v6, 1  ;;  %v4595_v27 = vrot.slane %v8416_v0, 7 }
 0x25a   : > { %v4495_v43 = vsel %vm10756_vm12, %v4491_v48, %v4367_v15  ;;  %vm4401_vm8 = vmand %vm5868_vm4, %vm6490_vm13  ;;  %v4361_v55 = vsel %vm10761_vm2, %v10760_v50, %v4305_v53  ;;  %v4496_v60 = vsel %vm5868_vm4, %v4490_v46, %v4368_v56  ;;  %v10762_v48 = vrot.slane %v8326_v37, 7  ;;  %v10772_v46 = vld [vmem:[#allocation15_spill] sm:$0xff] }
 0x25b   : > { %v4527_v1 = vsel %vm5872_vm5, %v8367_v33, %v4495_v43  ;;  %vm4560_vm13 = vmand %vm5998_vm9, %vm8149_vm7  ;;  %v4369_v54 = vsel %vm8501_vm15, %v4361_v55, 0.0  ;;  %v10764_v15 = vmov %v10758_v63  ;;  %v4528_v42 = vsel %vm5872_vm5, %v4143_v18, %v4496_v60 }
 0x25c   : > { %v4650_v19 = vsel %vm10763_vm14, %v4592_v3, %v10762_v48  ;;  %v4655_v5 = vsel %vm5998_vm9, %v4652_v49, %v4527_v1  ;;  %vm10765_vm11 = vmmov %vm10759_vm0  ;;  %vm10766_vm7 = vcmp.ge.s32.totalorder %v10731_v10, 104  ;;  %v4816_v63 = vrot.slane %v4143_v18, 6 }
 0x25d   : > { %v4489_v57 = vsel %vm10765_vm11, %v10764_v15, %v4434_v59  ;;  %v4880_v56 = vsel %vm10766_vm7, %v4877_v8, %v4655_v5  ;;  %vm10768_vm1 = vmmov %vm10763_vm14  ;;  %v10773_v1 = vand.u32 15, %v10772_v46  ;;  %v4306_v18 = vrot.slane %v8416_v0, 2  ;;  %v10792_v46 = vld [vmem:[#allocation13_spill] sm:$0xff] }
 0x25e   : > { %v4497_v43 = vsel %vm4401_vm8, %v4489_v57, %v4369_v54  ;;  %v4651_v49 = vsel %vm10768_vm1, %v10767_v23, %v4592_v3  ;;  %vm10769_vm15 = vmmov %vm10766_vm7  ;;  %v4911_v8 = vpack.c.bf16 %v4880_v56, %v4879_v22  ;;  %vm10776_vm8 = vnez %v10720_v7  ;;  %v10784_v54 = vld [vmem:[#allocation38_spill] sm:$0xff] }
 0x25f   : > { %vm8563_vm6 = vmand %vm10769_vm15, %vm8389_vm10  ;;  %vm8569_vm12 = vcmp.lt.s32.totalorder %v10773_v1, 14  ;;  %v4529_v3 = vsel %vm5872_vm5, %v8326_v37, %v4497_v43  ;;  %v4656_v55 = vsel %vm4560_vm13, %v4651_v49, %v4528_v42  ;;  %vm10777_vm10 = vcmp.lt.s32.totalorder %v10731_v10, 26 }
 0x260   : > { %vm8580_vm0 = vmand %vm10777_vm10, %vm10776_vm8  ;;  %v4657_v60 = vsel %vm5998_vm9, %v4650_v19, %v4529_v3  ;;  %v10780_v22 = vrot.slane %v8326_v37, 6  ;;  %vm10781_vm2 = vcmp.lt.s32.totalorder %v6432_v52, 2  ;;  %v10782_v5 = vrot.slane %v8367_v33, 6  ;;  %5426 = vmatprep.mubr.bf16.mxu1 %v4911_v8 }
 0x261   : > { %vm10783_vm13 = vmmov %vm10781_vm2  ;;  %vm10785_vm14 = vnez %v10784_v54  ;;  %v4435_v15 = vrot.slane %v8416_v0, 1  ;;  %v10786_v42 = vrot.slane %v8330_v6, 2  ;;  %vm10787_vm1 = vcmp.lt.s32.totalorder %v6432_v52, 6 }
 0x262   : > { %v4875_v48 = vsel %vm10781_vm2, %v4816_v63, %v10780_v22  ;;  %v4876_v7 = vsel %vm10783_vm13, %v10782_v5, %v4816_v63  ;;  %vm4403_vm11 = vmand %vm5868_vm4, %vm10785_vm14  ;;  %v10793_v1 = vand.u32 15, %v10792_v46  ;;  %vm10797_vm13 = vnez %v10646_v36 }
 0x263   : > { %v4881_v19 = vsel %vm8563_vm6, %v4876_v7, %v4656_v55  ;;  %v4882_v57 = vsel %vm10766_vm7, %v4875_v48, %v4657_v60  ;;  %v4359_v33 = vsel %vm10787_vm1, %v4306_v18, %v10786_v42  ;;  %vm10788_vm15 = vmmov %vm10787_vm1  ;;  %vm10791_vm6 = vcmp.lt.s32.totalorder %v6432_v52, 7 }
 0x264   : > { %v4360_v56 = vsel %vm10788_vm15, %v4305_v53, %v4306_v18  ;;  %v4912_v43 = vpack.c.bf16 %v4882_v57, %v4881_v19  ;;  %vm10789_vm8 = vmmov %vm10777_vm10  ;;  %v4371_v49 = vsel %vm8580_vm0, %v4359_v33, 0.0  ;;  %v4487_v63 = vsel %vm10791_vm6, %v4435_v15, %v10790_v35 }
 0x265   : > { %v4370_v23 = vsel %vm10789_vm8, %v4360_v56, 0.0  ;;  %vm8620_vm10 = vcmp.ge.s32.totalorder %v10793_v1, 2  ;;  %vm10796_vm2 = vmmov %vm10791_vm6  ;;  %v4499_v3 = vsel %vm4403_vm11, %v4487_v63, %v4371_v49  ;;  %v4594_v55 = vrot.slane %v8469_v58, 7  ;;  %v10813_v1 = vld [vmem:[#allocation44_spill] sm:$0xff] }
 0x266   : > { %v4488_v53 = vsel %vm10796_vm2, %v4434_v59, %v4435_v15  ;;  %vm4562_vm0 = vmand %vm5998_vm9, %vm10797_vm13  ;;  %5427 = vmatmul.mubr.bf16.vlgmr.msra.gmra.mrb[0].mxu1 %v4912_v43  ;;  %v4531_v60 = vsel %vm5872_vm5, %v8416_v0, %v4499_v3  ;;  %v4818_v36 = vrot.slane %v8469_v58, 6  ;;  %v4819_v59 = vrot.slane %v8416_v0, 6 }
 0x267   : > { %v4498_v18 = vsel %vm5868_vm4, %v4488_v53, %v4370_v23  ;;  %vm10798_vm14 = vmmov %vm10766_vm7  ;;  %vm10799_vm7 = vcmp.lt.s32.totalorder %v6432_v52, 1  ;;  %v10800_v5 = vrot.slane %v8326_v37, 7  ;;  %v4117_v31 = vadd.f32 1.0, %v8471_v17 }
 0x268   : > { %vm4786_vm11 = vmand %vm10798_vm14, %vm8486_vm3  ;;  %v4530_v22 = vsel %vm5872_vm5, %v8469_v58, %v4498_v18  ;;  %v4648_v48 = vsel %vm10799_vm7, %v4594_v55, %v4595_v27  ;;  %vm10802_vm3 = vcmp.lt.s32.totalorder %v6432_v52, 2  ;;  %v10803_v19 = vrot.slane %v8326_v37, 6 }
 0x269   : > { %vm10801_vm1 = vmmov %vm10799_vm7  ;;  %v4659_v15 = vsel %vm5998_vm9, %v4648_v48, %v4531_v60  ;;  %v4873_v0 = vsel %vm10802_vm3, %v4818_v36, %v4819_v59  ;;  %v4148_v33 = vmul.f32 %v8418_v44, %v8335_v51  ;;  %v8666_v17 = vmul.f32 %v4117_v31, %v8338_v47  ;;  %v10822_v48 = vld [vmem:[#allocation32_spill] sm:$0xff] }
 0x26a   : > { %v4649_v7 = vsel %vm10801_vm1, %v10800_v5, %v4594_v55  ;;  %vm10804_vm15 = vmmov %vm10802_vm3  ;;  %v10806_v43 = vrot.slane %v8330_v6, 7  ;;  %v10808_v37 = vrot.slane %v8330_v6, 6  ;;  %v4054_v35 = vmul.f32 0.7978846, %v8394_v16 }
 0x26b   : > { %v4658_v54 = vsel %vm4562_vm0, %v4649_v7, %v4530_v22  ;;  %v4874_v58 = vsel %vm10804_vm15, %v10803_v19, %v4818_v36  ;;  %vm10805_vm8 = vmmov %vm10798_vm14  ;;  %vm10810_vm13 = vcmp.lt.s32.totalorder %v10731_v10, 26  ;;  %v4308_v47 = vrot.slane %v4148_v33, 2 }
 0x26c   : > { %v4883_v57 = vsel %vm4786_vm11, %v4874_v58, %v4658_v54  ;;  %v4884_v42 = vsel %vm10805_vm8, %v4873_v0, %v4659_v15  ;;  %vm10807_vm6 = vmmov %vm10801_vm1  ;;  %v4309_v44 = vrot.slane %v8666_v17, 2  ;;  %v4437_v63 = vrot.slane %v4148_v33, 1 }
 0x26d   : > { %v4913_v56 = vpack.c.bf16 %v4884_v42, %v4883_v57  ;;  %v4647_v23 = vsel %vm10807_vm6, %v4595_v27, %v10806_v43  ;;  %vm10809_vm2 = vmmov %vm10802_vm3  ;;  %v4438_v46 = vrot.slane %v8666_v17, 1  ;;  %vm10814_vm14 = vnez %v10813_v1 }
 0x26e   : > { %v4872_v49 = vsel %vm10809_vm2, %v4819_v59, %v10808_v37  ;;  %vm8681_vm0 = vmand %vm10810_vm13, %vm8569_vm12  ;;  %v4597_v16 = vrot.slane %v4148_v33, 7  ;;  %v4821_v50 = vrot.slane %v4148_v33, 6  ;;  %5546 = vtanh.f32 %v4054_v35 }
 0x26f   : > { %5430 = vmatprep.mubr.bf16.mxu1 %v4913_v56  ;;  %vm4405_vm11 = vmand %vm5868_vm4, %vm10814_vm14  ;;  %v3930_v53 = vmul.f32 0.044715, %v8100_v45  ;;  %vm10815_vm12 = vcmp.lt.s32.totalorder %v6432_v52, 6  ;;  %v10816_v55 = vrot.slane %v8330_v6, 2  ;;  %vm10818_vm1 = vcmp.lt.s32.totalorder %v6432_v52, 7 }
 0x270   : > { %v4357_v3 = vsel %vm10815_vm12, %v4308_v47, %v4309_v44  ;;  %vm10817_vm7 = vmmov %vm10815_vm12  ;;  %v4485_v18 = vsel %vm10818_vm1, %v4437_v63, %v4438_v46  ;;  %v10819_v60 = vrot.slane %v8330_v6, 1  ;;  %vm10823_vm8 = vnez %v10822_v48  ;;  %v10840_v48 = vld [vmem:[#allocation21_spill] sm:$0xff] }
 0x271   : > { %v4358_v27 = vsel %vm10817_vm7, %v10816_v55, %v4308_v47  ;;  %vm10820_vm3 = vmmov %vm10818_vm1  ;;  %v4373_v22 = vsel %vm8681_vm0, %v4357_v3, 0.0  ;;  %v10824_v5 = vmov %v10806_v43  ;;  %vm10825_vm2 = vcmp.lt.s32.totalorder %v6432_v52, 1 }
 0x272   : > { %v4486_v36 = vsel %vm10820_vm3, %v10819_v60, %v4437_v63  ;;  %vm10821_vm15 = vmmov %vm10810_vm13  ;;  %v4646_v7 = vsel %vm10825_vm2, %v10824_v5, %v4597_v16  ;;  %v10826_v31 = vmov %v10808_v37  ;;  %vm10827_vm13 = vcmp.lt.s32.totalorder %v6432_v52, 2  ;;  %v10836_v63 = vld [vmem:[#allocation16_spill] sm:$0xff] }
 0x273   : > { %v4372_v59 = vsel %vm10821_vm15, %v4358_v27, 0.0  ;;  %vm4564_vm6 = vmand %vm5998_vm9, %vm10823_vm8  ;;  %v4871_v54 = vsel %vm10827_vm13, %v10826_v31, %v4821_v50  ;;  %v4501_v0 = vsel %vm4405_vm11, %v4485_v18, %v4373_v22  ;;  %vm10828_vm0 = vcmp.ge.s32.totalorder %v10731_v10, 104 }
 0x274   : > { %v4500_v15 = vsel %vm5868_vm4, %v4486_v36, %v4372_v59  ;;  %vm4788_vm14 = vmand %vm10828_vm0, %vm8620_vm10  ;;  %v4119_v19 = vadd.f32 1.0, %v8508_v2  ;;  %v4598_v58 = vrot.slane %v8666_v17, 7  ;;  %v4533_v42 = vsel %vm5872_vm5, %v4148_v33, %v4501_v0 }
 0x275   : > { %v4532_v57 = vsel %vm5872_vm5, %v8330_v6, %v4500_v15  ;;  %v4822_v56 = vrot.slane %v8666_v17, 6  ;;  %v4057_v43 = vmul.f32 0.7978846, %v8397_v13  ;;  %v4661_v8 = vsel %vm5998_vm9, %v4646_v7, %v4533_v42  ;;  %vm10829_vm10 = vmmov %vm10828_vm0 }
 0x276   : > { %v4660_v37 = vsel %vm4564_vm6, %v4647_v23, %v4532_v57  ;;  %v3894_v35 = vmul.f32 0.5, %v10699_v32  ;;  %v3895_v2 = vmul.f32 0.5, %v7497_v24  ;;  %v4886_v47 = vsel %vm10829_vm10, %v4871_v54, %v4661_v8  ;;  %vm10830_vm11 = vmmov %vm10825_vm2  ;;  %v10832_v24 = vld [vmem:[#allocation19_spill] sm:$0xff] }
 0x277   : > { %v4885_v51 = vsel %vm4788_vm14, %v4872_v49, %v4660_v37  ;;  %v8749_v6 = vsel %vm10830_vm11, %v4597_v16, %v4598_v58  ;;  %vm10831_vm12 = vmmov %vm10827_vm13  ;;  %v10833_v23 = vand.u32 15, %v10832_v24  ;;  %5548 = vtanh.f32 %v8399_v29 }
 0x278   : > { %v8755_v13 = vsel %vm10831_vm12, %v4821_v50, %v4822_v56  ;;  %v4914_v33 = vpack.c.bf16 %v4886_v47, %v4885_v51  ;;  %v8757_v32 = vmul.f32 %v4119_v19, %v3895_v2  ;;  %v10837_v1 = vand.u32 15, %v10836_v63  ;;  %v5547_v60 = vpop.eup %5546  ;;  %v10846_v51 = vld [vmem:[#allocation60_spill] sm:$0xff]  ;;  %vm10856_vm12 = vmmov %vm10821_vm15 }
 0x279   : > { %vm8761_vm7 = vcmp.lt.s32.totalorder %v10833_v23, 14  ;;  %5550 = vtanh.f32 %v4057_v43  ;;  %v3962_v50 = vmul.f32 %v3930_v53, %v8100_v45  ;;  %v4059_v3 = vmul.f32 0.7978846, %v8115_v61 }
 0x27a   : > { %vm8768_vm1 = vcmp.ge.s32.totalorder %v10837_v1, 2  ;;  %5431 = vmatmul.mubr.bf16.gmra.mrb[4].mxu1 %v4914_v33  ;;  %v3896_v55 = vmul.f32 0.5, %v10708_v21  ;;  %v3897_v27 = vmul.f32 0.5, %v10706_v4  ;;  %v8777_v18 = vmul.f32 0.5, %v8100_v45  ;;  %vm8816_vm8 = vmand %vm10821_vm15, %vm8761_vm7 }
 0x27b   : > { %v3965_v29 = vmul.f32 %v8107_v34, %v10629_v11  ;;  %v8782_v36 = vmul.f32 0.5, %v7681_v40  ;;  %v3994_v59 = vmul.f32 %v3962_v50, %v8100_v45  ;;  %5552 = vtanh.f32 %v4059_v3 }
 0x27c   : > { %v3996_v61 = vmul.f32 %v8111_v14, %v10630_v26  ;;  %v4118_v53 = vadd.f32 1.0, %v5547_v60  ;;  %v4311_v21 = vrot.slane %v8757_v32, 2  ;;  %v4440_v4 = vrot.slane %v8757_v32, 1 }
 0x27d   : > { %v3997_v22 = vmul.f32 %v3965_v29, %v10629_v11  ;;  %v10841_v5 = vand.u32 15, %v10840_v48  ;;  %v4600_v40 = vrot.slane %v8757_v32, 7  ;;  %v4026_v7 = vadd.f32 %v3994_v59, %v8100_v45 }
 0x27e   : > { %v4028_v31 = vadd.f32 %v3996_v61, %v10630_v26  ;;  %v3934_v14 = vmul.f32 0.044715, %v8119_v28  ;;  %v4150_v54 = vmul.f32 %v4118_v53, %v3894_v35  ;;  %v4824_v15 = vrot.slane %v8757_v32, 6  ;;  %v10857_v61 = vld [vmem:[#allocation43_spill] sm:$0xff] }
 0x27f   : > { %vm8792_vm3 = vcmp.lt.s32.totalorder %v10841_v5, 14  ;;  %v8802_v0 = vmul.f32 0.5, %v10630_v26  ;;  %v4029_v19 = vadd.f32 %v3997_v22, %v10629_v11  ;;  %v4058_v57 = vmul.f32 0.7978846, %v4026_v7 }
 0x280   : > { %v8806_v42 = vmul.f32 0.5, %v10629_v11  ;;  %v3966_v43 = vmul.f32 %v3934_v14, %v8119_v28  ;;  %v8810_v45 = vmul.f32 0.7978846, %v8179_v20  ;;  %v4310_v26 = vrot.slane %v4150_v54, 2  ;;  %v10848_v11 = vld [vmem:[#allocation17_spill] sm:$0xff] }
 0x281   : > { %v4439_v8 = vrot.slane %v4150_v54, 1  ;;  %v4599_v35 = vrot.slane %v4150_v54, 7  ;;  %v4823_v2 = vrot.slane %v4150_v54, 6  ;;  %vm10847_vm6 = vnez %v10846_v51  ;;  %v5549_v49 = vpop.eup %5548 }
 0x282   : > { %vm4407_vm2 = vmand %vm5868_vm4, %vm10847_vm6  ;;  %v10849_v20 = vand.u32 15, %v10848_v11  ;;  %5554 = vtanh.f32 %v4058_v57  ;;  %v4060_v33 = vmul.f32 0.7978846, %v4028_v31  ;;  %v8830_v24 = vmul.f32 0.7978846, %v4029_v19  ;;  %v10866_v19 = vld [vmem:[#allocation25_spill] sm:$0xff] }
 0x283   : > { %v8833_v23 = vmul.f32 %v3966_v43, %v8119_v28  ;;  %vm10852_vm0 = vcmp.lt.s32.totalorder %v6432_v52, 6  ;;  %vm10854_vm10 = vcmp.lt.s32.totalorder %v6432_v52, 7  ;;  %v5551_v29 = vpop.eup %5550  ;;  %vm10858_vm7 = vnez %v10857_v61 }
 0x284   : > { %vm8826_vm13 = vcmp.ge.s32.totalorder %v10849_v20, 2  ;;  %v4355_v63 = vsel %vm10852_vm0, %v4310_v26, %v4311_v21  ;;  %vm10853_vm14 = vmmov %vm10852_vm0  ;;  %v4483_v50 = vsel %vm10854_vm10, %v4439_v8, %v4440_v4  ;;  %vm10859_vm0 = vcmp.lt.s32.totalorder %v6432_v52, 1  ;;  %v10873_v20 = vld [vmem:[#allocation63_spill] sm:$0xff] }
 0x285   : > { %v4356_v1 = vsel %vm10853_vm14, %v4309_v44, %v4310_v26  ;;  %vm10855_vm11 = vmmov %vm10854_vm10  ;;  %v4375_v59 = vsel %vm8816_vm8, %v4355_v63, 0.0  ;;  %v4644_v44 = vsel %vm10859_vm0, %v4598_v58, %v4599_v35  ;;  %vm10860_vm14 = vcmp.lt.s32.totalorder %v6432_v52, 2  ;;  %v10875_v63 = vld [vmem:[#allocation22_spill] sm:$0xff] }
 0x286   : > { %v4484_v3 = vsel %vm10855_vm11, %v4438_v46, %v4439_v8  ;;  %v4374_v60 = vsel %vm10856_vm12, %v4356_v1, 0.0  ;;  %vm4566_vm15 = vmand %vm5998_vm9, %vm10858_vm7  ;;  %v4869_v46 = vsel %vm10860_vm14, %v4822_v56, %v4823_v2  ;;  %v4503_v22 = vsel %vm4407_vm2, %v4483_v50, %v4375_v59  ;;  %v5553_v56 = vpop.eup %5552 }
 0x287   : > { %v4502_v53 = vsel %vm5868_vm4, %v4484_v3, %v4374_v60  ;;  %vm10861_vm8 = vcmp.ge.s32.totalorder %v10731_v10, 104  ;;  %v4120_v48 = vadd.f32 1.0, %v5549_v49  ;;  %v4121_v5 = vadd.f32 1.0, %v5551_v29  ;;  %vm10864_vm6 = vmmov %vm10859_vm0 }
 0x288   : > { %vm8878_vm10 = vmand %vm10861_vm8, %vm8768_vm1  ;;  %v4534_v7 = vsel %vm5872_vm5, %v8666_v17, %v4502_v53  ;;  %v4535_v31 = vsel %vm5872_vm5, %v4150_v54, %v4503_v22  ;;  %v4643_v16 = vsel %vm10864_vm6, %v4599_v35, %v4600_v40  ;;  %v10867_v57 = vand.u32 15, %v10866_v19  ;;  %v10884_v53 = vld [vmem:[#allocation55_spill] sm:$0xff] }
 0x289   : > { %vm10865_vm1 = vmmov %vm10860_vm14  ;;  %v4662_v17 = vsel %vm4566_vm15, %v8749_v6, %v4534_v7  ;;  %v4663_v54 = vsel %vm5998_vm9, %v4644_v44, %v4535_v31  ;;  %v4152_v37 = vmul.f32 %v4120_v48, %v3896_v55  ;;  %v8904_v26 = vmul.f32 %v4121_v5, %v3897_v27 }
 0x28a   : > { %v4868_v14 = vsel %vm10865_vm1, %v4823_v2, %v4824_v15  ;;  %vm8897_vm2 = vcmp.lt.s32.totalorder %v10867_v57, 14  ;;  %v4887_v8 = vsel %vm8878_vm10, %v8755_v13, %v4662_v17  ;;  %vm10870_vm11 = vmmov %vm10861_vm8  ;;  %v4123_v2 = vadd.f32 1.0, %v5553_v56 }
 0x28b   : > { %v4888_v35 = vsel %vm10870_vm11, %v4869_v46, %v4663_v54  ;;  %5556 = vtanh.f32 %v4060_v33  ;;  %vm8915_vm7 = vmand %vm10856_vm12, %vm8792_vm3  ;;  %v4312_v55 = vrot.slane %v4152_v37, 2  ;;  %v4313_v27 = vrot.slane %v8904_v26, 2 }
 0x28c   : > { %v4915_v51 = vpack.c.bf16 %v4888_v35, %v4887_v8  ;;  %v4441_v11 = vrot.slane %v4152_v37, 1  ;;  %vm10874_vm15 = vnez %v10873_v20  ;;  %v4442_v13 = vrot.slane %v8904_v26, 1  ;;  %v5555_v59 = vpop.eup %5554  ;;  %vm10882_vm6 = vmmov %vm10856_vm12  ;;  %v10894_v35 = vld [vmem:[#allocation85_spill] sm:$0xff] }
 0x28d   : > { %vm4409_vm0 = vmand %vm5868_vm4, %vm10874_vm15  ;;  %v4601_v33 = vrot.slane %v4152_v37, 7  ;;  %v4825_v49 = vrot.slane %v4152_v37, 6  ;;  %v8926_v34 = vmul.f32 %v4123_v2, %v8782_v36  ;;  %v10876_v1 = vand.u32 15, %v10875_v63  ;;  %v10902_v63 = vld [vmem:[#allocation62_spill] sm:$0xff] }
 0x28e   : > { %5434 = vmatprep.mubr.bf16.mxu1 %v4915_v51  ;;  %vm10879_vm14 = vcmp.lt.s32.totalorder %v6432_v52, 6  ;;  %vm10881_vm10 = vcmp.lt.s32.totalorder %v6432_v52, 7  ;;  %v4602_v60 = vrot.slane %v8904_v26, 7  ;;  %vm10885_vm11 = vnez %v10884_v53 }
 0x28f   : > { %vm8930_vm3 = vcmp.ge.s32.totalorder %v10876_v1, 2  ;;  %v4353_v3 = vsel %vm10879_vm14, %v4312_v55, %v4313_v27  ;;  %vm10880_vm8 = vmmov %vm10879_vm14  ;;  %v4482_v36 = vsel %vm10881_vm10, %v4440_v4, %v4441_v11  ;;  %vm10886_vm14 = vcmp.lt.s32.totalorder %v6432_v52, 1 }
 0x290   : > { %v4354_v29 = vsel %vm10880_vm8, %v4311_v21, %v4312_v55  ;;  %v4377_v44 = vsel %vm8915_vm7, %v4353_v3, 0.0  ;;  %vm10883_vm1 = vmmov %vm10881_vm10  ;;  %v4642_v21 = vsel %vm10886_vm14, %v4600_v40, %v4601_v33  ;;  %vm10887_vm7 = vcmp.ge.s32.totalorder %v10731_v10, 104  ;;  %v10905_v3 = vld [vmem:[#allocation26_spill] sm:$0xff] }
 0x291   : > { %v4376_v61 = vsel %vm10882_vm6, %v4354_v29, 0.0  ;;  %v4481_v46 = vsel %vm10883_vm1, %v4441_v11, %v4442_v13  ;;  %vm4568_vm12 = vmand %vm5998_vm9, %vm10885_vm11  ;;  %vm10888_vm10 = vcmp.lt.s32.totalorder %v6432_v52, 2  ;;  %v4122_v40 = vadd.f32 1.0, %v5555_v59 }
 0x292   : > { %v4504_v4 = vsel %vm5868_vm4, %v4482_v36, %v4376_v61  ;;  %v4505_v22 = vsel %vm4409_vm0, %v4481_v46, %v4377_v44  ;;  %vm4792_vm8 = vmand %vm10887_vm7, %vm8826_vm13  ;;  %v4867_v58 = vsel %vm10888_vm10, %v4824_v15, %v4825_v49  ;;  %v4315_v56 = vrot.slane %v8926_v34, 2 }
 0x293   : > { %v4536_v48 = vsel %vm5872_vm5, %v8757_v32, %v4504_v4  ;;  %v4537_v5 = vsel %vm5872_vm5, %v4152_v37, %v4505_v22  ;;  %v4444_v47 = vrot.slane %v8926_v34, 1  ;;  %v4154_v19 = vmul.f32 %v4122_v40, %v8777_v18  ;;  %vm10889_vm13 = vmmov %vm10886_vm14  ;;  %v10913_v40 = vld [vmem:[#allocation23_spill] sm:$0xff] }
 0x294   : > { %v4664_v7 = vsel %vm4568_vm12, %v4643_v16, %v4536_v48  ;;  %v4665_v31 = vsel %vm5998_vm9, %v4642_v21, %v4537_v5  ;;  %v4641_v15 = vsel %vm10889_vm13, %v4601_v33, %v4602_v60  ;;  %vm10890_vm15 = vmmov %vm10887_vm7  ;;  %v4826_v17 = vrot.slane %v8904_v26, 6  ;;  %v10939_v5 = vld [vmem:[#allocation67_spill] sm:$0xff] }
 0x295   : > { %v4889_v57 = vsel %vm4792_vm8, %v4868_v14, %v4664_v7  ;;  %v4890_v32 = vsel %vm10890_vm15, %v4867_v58, %v4665_v31  ;;  %5558 = vtanh.f32 %v8830_v24  ;;  %vm10891_vm0 = vmmov %vm10882_vm6  ;;  %v4314_v18 = vrot.slane %v4154_v19, 2  ;;  %v5557_v14 = vpop.eup %5556 }
 0x296   : > { %v4916_v54 = vpack.c.bf16 %v4890_v32, %v4889_v57  ;;  %vm8994_vm6 = vmand %vm10891_vm0, %vm8897_vm2  ;;  %v4443_v37 = vrot.slane %v4154_v19, 1  ;;  %v4603_v8 = vrot.slane %v4154_v19, 7  ;;  %vm10895_vm1 = vnez %v10894_v35 }
 0x297   : > { %vm4411_vm11 = vmand %vm5868_vm4, %vm10895_vm1  ;;  %v4827_v2 = vrot.slane %v4154_v19, 6  ;;  %v4604_v43 = vrot.slane %v8926_v34, 7  ;;  %v4828_v51 = vrot.slane %v8926_v34, 6  ;;  %vm10897_vm2 = vcmp.lt.s32.totalorder %v6432_v52, 6 }
 0x298   : > { %vm10896_vm12 = vmmov %vm10888_vm10  ;;  %5435 = vmatmul.mubr.bf16.gmra.mrb[8].mxu1 %v4916_v54  ;;  %v4351_v6 = vsel %vm10897_vm2, %v4314_v18, %v4315_v56  ;;  %vm10899_vm7 = vcmp.lt.s32.totalorder %v6432_v52, 7  ;;  %vm10903_vm13 = vnez %v10902_v63  ;;  %v10906_v29 = vand.u32 15, %v10905_v3 }
 0x299   : > { %v4866_v24 = vsel %vm10896_vm12, %v4825_v49, %v4826_v17  ;;  %vm10898_vm14 = vmmov %vm10897_vm2  ;;  %v4479_v11 = vsel %vm10899_vm7, %v4443_v37, %v4444_v47  ;;  %v4379_v49 = vsel %vm8994_vm6, %v4351_v6, 0.0  ;;  %v4865_v1 = vsel %vm10896_vm12, %v4826_v17, %v4827_v2 }
 0x29a   : > { %v4352_v55 = vsel %vm10898_vm14, %v4313_v27, %v4314_v18  ;;  %vm10900_vm8 = vmmov %vm10899_vm7  ;;  %vm9028_vm2 = vcmp.lt.s32.totalorder %v10906_v29, 14  ;;  %v4507_v59 = vsel %vm4411_vm11, %v4479_v11, %v4379_v49  ;;  %vm10909_vm6 = vcmp.ge.s32.totalorder %v10731_v10, 104  ;;  %v10930_v11 = vld [vmem:[#allocation28_spill] sm:$0xff] }
 0x29b   : > { %v4480_v20 = vsel %vm10900_vm8, %v4442_v13, %v4443_v37  ;;  %vm10901_vm10 = vmmov %vm10891_vm0  ;;  %vm10904_vm0 = vcmp.lt.s32.totalorder %v6432_v52, 1  ;;  %v4539_v46 = vsel %vm5872_vm5, %v4154_v19, %v4507_v59  ;;  %v4030_v50 = vadd.f32 %v8833_v23, %v8119_v28 }
 0x29c   : > { %v4378_v33 = vsel %vm10901_vm10, %v4352_v55, 0.0  ;;  %vm4570_vm15 = vmand %vm5998_vm9, %vm10903_vm13  ;;  %v4640_v27 = vsel %vm10904_vm0, %v4602_v60, %v4603_v8  ;;  %v4124_v60 = vadd.f32 1.0, %v5557_v14  ;;  %5560 = vtanh.f32 %v8810_v45  ;;  %v10924_v14 = vld [vmem:[#allocation116_spill] sm:$0xff] }
 0x29d   : > { %v4506_v36 = vsel %vm5868_vm4, %v4480_v20, %v4378_v33  ;;  %vm4794_vm14 = vmand %vm10909_vm6, %vm8930_vm3  ;;  %v4667_v4 = vsel %vm5998_vm9, %v4640_v27, %v4539_v46  ;;  %v10914_v48 = vand.u32 15, %v10913_v40  ;;  %v4062_v23 = vmul.f32 0.7978846, %v4030_v50  ;;  %v10931_v20 = vld [vmem:[#allocation45_spill] sm:$0xff] }
 0x29e   : > { %vm10910_vm7 = vmmov %vm10904_vm0  ;;  %v4538_v44 = vsel %vm5872_vm5, %v8904_v26, %v4506_v36  ;;  %v9059_v22 = vmul.f32 %v4124_v60, %v8802_v0  ;;  %v3969_v57 = vmul.f32 %v8122_v12, %v8084_v38  ;;  %v4000_v32 = vmul.f32 %v8126_v25, %v7897_v62  ;;  %v10935_v36 = vld [vmem:[#allocation89_spill] sm:$0xff] }
 0x29f   : > { %v4639_v61 = vsel %vm10910_vm7, %v4603_v8, %v4604_v43  ;;  %vm10911_vm8 = vmmov %vm10896_vm12  ;;  %v4666_v21 = vsel %vm4570_vm15, %v4641_v15, %v4538_v44  ;;  %vm9066_vm1 = vcmp.ge.s32.totalorder %v10914_v48, 2  ;;  %v5559_v15 = vpop.eup %5558  ;;  %5562 = vtanh.f32 %v4062_v23  ;;  %v10921_v8 = vld [vmem:[#allocation75_spill] sm:$0xff]  ;;  %v10937_v50 = vld [vmem:[#allocation77_spill] sm:$0xff] }
 0x2a0   : > { %v9052_v53 = vsel %vm10911_vm8, %v4827_v2, %v4828_v51  ;;  %v4891_v26 = vsel %vm4794_vm14, %v4866_v24, %v4666_v21  ;;  %vm10912_vm3 = vmmov %vm10909_vm6  ;;  %v4316_v31 = vrot.slane %v9059_v22, 2  ;;  %v4445_v19 = vrot.slane %v9059_v22, 1  ;;  %v10925_v2 = vld [vmem:[#allocation80_spill] sm:$0xff]  ;;  %v10926_v24 = vld [vmem:[#allocation35_spill] sm:$0xff] }
 0x2a1   : > { %v4892_v58 = vsel %vm10912_vm3, %v4865_v1, %v4667_v4  ;;  %v4605_v0 = vrot.slane %v9059_v22, 7  ;;  %v4829_v45 = vrot.slane %v9059_v22, 6  ;;  %v4125_v17 = vadd.f32 1.0, %v5559_v15  ;;  %vm10919_vm13 = vmmov %vm10904_vm0 }
 0x2a2   : > { %v4917_v7 = vpack.c.bf16 %v4892_v58, %v4891_v26  ;;  %vm10917_vm11 = vcmp.lt.s32.totalorder %v6432_v52, 6  ;;  %vm10918_vm10 = vcmp.lt.s32.totalorder %v6432_v52, 7  ;;  %vm10920_vm15 = vcmp.lt.s32.totalorder %v10731_v10, 26  ;;  %vm10923_vm6 = vmmov %vm10911_vm8 }
 0x2a3   : > { %v4350_v54 = vsel %vm10917_vm11, %v4315_v56, %v4316_v31  ;;  %v4478_v16 = vsel %vm10918_vm10, %v4444_v47, %v4445_v19  ;;  %v4638_v18 = vsel %vm10919_vm13, %v4604_v43, %v4605_v0  ;;  %vm10922_vm0 = vnez %v10921_v8  ;;  %v9097_v47 = vld [vmem:[%s10083_s4] ss:$0 sm:$0xff]  ;;  %vm10927_vm14 = vmmov %vm10912_vm3 }
 0x2a4   : > { %5438 = vmatprep.mubr.bf16.mxu1 %v4917_v7  ;;  %v4380_v37 = vsel %vm10920_vm15, %v4350_v54, 0.0  ;;  %vm4572_vm12 = vmand %vm5998_vm9, %vm10922_vm0  ;;  %v4863_v12 = vsel %vm10923_vm6, %v4828_v51, %v4829_v45  ;;  %v4001_v25 = vmul.f32 %v3969_v57, %v8084_v38  ;;  %v4032_v56 = vadd.f32 %v4000_v32, %v7897_v62  ;;  %v10940_v7 = vld [vmem:[#allocation34_spill] sm:$0xff]  ;;  %v10941_v57 = vld [vmem:[#allocation36_spill] sm:$0xff] }
 0x2a5   : > { %v9101_v35 = vadd.f32 %v9097_v47, %v10924_v14  ;;  %v9105_v43 = vmul.f32 %v10926_v24, %v10925_v2  ;;  %v9108_v6 = vmul.f32 %v4125_v17, %v8806_v42  ;;  %v4508_v51 = vsel %vm5868_vm4, %v4478_v16, %v4380_v37  ;;  %vm9116_vm7 = vmand %vm10927_vm14, %vm9066_vm1  ;;  %v10945_v17 = vld [vmem:[#allocation29_spill] sm:$0xff] }
 0x2a6   : > { %v9122_v33 = vmul.f32 %v10931_v20, %v10930_v11  ;;  %v4540_v42 = vsel %vm5872_vm5, %v8926_v34, %v4508_v51  ;;  %v4033_v49 = vadd.f32 %v4001_v25, %v8084_v38  ;;  %v4064_v63 = vmul.f32 0.7978846, %v4032_v56  ;;  %vm10932_vm8 = vmmov %vm10920_vm15  ;;  %v5561_v44 = vpop.eup %5560 }
 0x2a7   : > { %vm9132_vm3 = vmand %vm10932_vm8, %vm9028_vm2  ;;  %v4317_v1 = vrot.slane %v9108_v6, 2  ;;  %v4446_v3 = vrot.slane %v9108_v6, 1  ;;  %v4668_v34 = vsel %vm4572_vm12, %v4639_v61, %v4540_v42  ;;  %v4606_v29 = vrot.slane %v9108_v6, 7 }
 0x2a8   : > { %vm10936_vm1 = vnez %v10935_v36  ;;  %v4893_v13 = vsel %vm9116_vm7, %v9052_v53, %v4668_v34  ;;  %v4830_v59 = vrot.slane %v9108_v6, 6  ;;  %v4065_v60 = vmul.f32 0.7978846, %v4033_v49  ;;  %vm10938_vm15 = vmmov %vm10923_vm6  ;;  %v10956_v34 = vld [vmem:[#allocation24_spill] sm:$0xff] }
 0x2a9   : > { %vm4413_vm2 = vmand %vm5868_vm4, %vm10936_vm1  ;;  %5564 = vtanh.f32 %v4064_v63  ;;  %v4349_v46 = vsel %vm10917_vm11, %v4316_v31, %v4317_v1  ;;  %v4477_v61 = vsel %vm10918_vm10, %v4445_v19, %v4446_v3  ;;  %v3903_v21 = vmul.f32 0.5, %v10937_v50  ;;  %v5563_v19 = vpop.eup %5562  ;;  %v10954_v63 = vld [vmem:[#allocation71_spill] sm:$0xff]  ;;  %v10960_v50 = vld [vmem:[#allocation90_spill] sm:$0xff] }
 0x2aa   : > { %v9159_v4 = vsel %vm10919_vm13, %v4605_v0, %v4606_v29  ;;  %v4381_v53 = vsel %vm9132_vm3, %v4349_v46, 0.0  ;;  %v4127_v26 = vadd.f32 1.0, %v5561_v44  ;;  %v9165_v58 = vsel %vm10938_vm15, %v4829_v45, %v4830_v59  ;;  %vm10949_vm6 = vmmov %vm10927_vm14 }
 0x2ab   : > { %5566 = vtanh.f32 %v4065_v60  ;;  %v4509_v40 = vsel %vm4413_vm2, %v4477_v61, %v4381_v53  ;;  %v3902_v48 = vmul.f32 0.5, %v8119_v28  ;;  %v3938_v23 = vmul.f32 0.044715, %v10939_v5  ;;  %vm10957_vm7 = vmmov %vm10932_vm8 }
 0x2ac   : > { %v4067_v31 = vmul.f32 0.7978846, %v10940_v7  ;;  %v4541_v0 = vsel %vm5872_vm5, %v9059_v22, %v4509_v40  ;;  %v9173_v15 = vmul.f32 %v4127_v26, %v3903_v21  ;;  %v10942_v32 = vand.u32 15, %v10941_v57  ;;  %v10962_v21 = vld [vmem:[#allocation33_spill] sm:$0xff]  ;;  %v10967_v7 = vld [vmem:[#allocation46_spill] sm:$0xff]  ;;  %vm10968_vm10 = vmmov %vm10917_vm11 }
 0x2ad   : > { %v10946_v54 = vand.u32 15, %v10945_v17  ;;  %v4669_v16 = vsel %vm5998_vm9, %v4638_v18, %v4541_v0  ;;  %v4126_v37 = vadd.f32 1.0, %v5563_v19  ;;  %v3970_v22 = vmul.f32 %v3938_v23, %v10939_v5  ;;  %v10950_v18 = vld [vmem:[#allocation37_spill] sm:$0xff]  ;;  %v10966_v23 = vld [vmem:[#allocation107_spill] sm:$0xff] }
 0x2ae   : > { %vm9177_vm0 = vcmp.lt.s32.totalorder %v10942_v32, 14  ;;  %5568 = vtanh.f32 %v4067_v31  ;;  %v4894_v8 = vsel %vm10949_vm6, %v4863_v12, %v4669_v16  ;;  %v4319_v25 = vrot.slane %v9173_v15, 2 }
 0x2af   : > { %vm9183_vm12 = vcmp.ge.s32.totalorder %v10946_v54, 2  ;;  %v3904_v56 = vmul.f32 0.5, %v7897_v62  ;;  %v3905_v14 = vmul.f32 0.5, %v8084_v38  ;;  %v4918_v24 = vpack.c.bf16 %v4894_v8, %v4893_v13  ;;  %v10955_v62 = vld [vmem:[#allocation108_spill] sm:$0xff]  ;;  %vm9213_vm8 = vmand %vm10957_vm7, %vm9177_vm0 }
 0x2b0   : > { %v4158_v51 = vmul.f32 %v4126_v37, %v3902_v48  ;;  %v4448_v55 = vrot.slane %v9173_v15, 1  ;;  %v4002_v20 = vmul.f32 %v3970_v22, %v10939_v5  ;;  %v10951_v42 = vand.u32 15, %v10950_v18  ;;  %vm10971_vm0 = vmmov %vm10957_vm7  ;;  %v10972_v37 = vld [vmem:[#allocation86_spill] sm:$0xff] }
 0x2b1   : > { %v4608_v12 = vrot.slane %v9173_v15, 7  ;;  %v9205_v27 = vmul.f32 0.5, %v10954_v63  ;;  %v3973_v38 = vmul.f32 %v10956_v34, %v10955_v62  ;;  %5439 = vmatmul.mubr.bf16.gmra.mrb[12].mxu1 %v4918_v24  ;;  %vm10961_vm3 = vnez %v10960_v50  ;;  %v10985_v50 = vld [vmem:[#allocation94_spill] sm:$0xff] }
 0x2b2   : > { %vm9199_vm14 = vcmp.lt.s32.totalorder %v10951_v42, 14  ;;  %v4318_v13 = vrot.slane %v4158_v51, 2  ;;  %v4447_v60 = vrot.slane %v4158_v51, 1  ;;  %v4607_v44 = vrot.slane %v4158_v51, 7  ;;  %vm4415_vm1 = vmand %vm5868_vm4, %vm10961_vm3 }
 0x2b3   : > { %v4831_v46 = vrot.slane %v4158_v51, 6  ;;  %v5565_v61 = vpop.eup %5564  ;;  %v10963_v53 = vand.u32 15, %v10962_v21  ;;  %v4832_v40 = vrot.slane %v9173_v15, 6  ;;  %v4034_v48 = vadd.f32 %v4002_v20, %v10939_v5 }
 0x2b4   : > { %v4004_v31 = vmul.f32 %v10967_v7, %v10966_v23  ;;  %v4005_v19 = vmul.f32 %v3973_v38, %v10955_v62  ;;  %v4347_v0 = vsel %vm10917_vm11, %v4318_v13, %v4319_v25  ;;  %v4348_v57 = vsel %vm10968_vm10, %v4317_v1, %v4318_v13 }
 0x2b5   : > { %vm9223_vm2 = vcmp.ge.s32.totalorder %v10963_v53, 2  ;;  %vm10969_vm13 = vcmp.lt.s32.totalorder %v6432_v52, 7  ;;  %v5567_v17 = vpop.eup %5566  ;;  %v4382_v54 = vsel %vm10971_vm0, %v4348_v57, 0.0  ;;  %v4383_v16 = vsel %vm9213_vm8, %v4347_v0, 0.0 }
 0x2b6   : > { %v4475_v32 = vsel %vm10969_vm13, %v4447_v60, %v4448_v55  ;;  %vm10970_vm15 = vmmov %vm10969_vm13  ;;  %vm10973_vm6 = vnez %v10972_v37  ;;  %vm10974_vm11 = vcmp.lt.s32.totalorder %v6432_v52, 1  ;;  %vm10975_vm10 = vcmp.lt.s32.totalorder %v6432_v52, 2 }
 0x2b7   : > { %v4476_v45 = vsel %vm10970_vm15, %v4446_v3, %v4447_v60  ;;  %vm4574_vm7 = vmand %vm5998_vm9, %vm10973_vm6  ;;  %v4636_v1 = vsel %vm10974_vm11, %v4606_v29, %v4607_v44  ;;  %v4861_v22 = vsel %vm10975_vm10, %v4830_v59, %v4831_v46  ;;  %v4511_v8 = vsel %vm4415_vm1, %v4475_v32, %v4383_v16 }
 0x2b8   : > { %v4510_v3 = vsel %vm5868_vm4, %v4476_v45, %v4382_v54  ;;  %vm10976_vm8 = vcmp.ge.s32.totalorder %v10731_v10, 104  ;;  %v4128_v29 = vadd.f32 1.0, %v5565_v61  ;;  %v4129_v20 = vadd.f32 1.0, %v5567_v17  ;;  %vm10979_vm3 = vmmov %vm10974_vm11  ;;  %v5569_v63 = vpop.eup %5568  ;;  %v10992_v17 = vld [vmem:[#allocation54_spill] sm:$0xff] }
 0x2b9   : > { %vm9265_vm13 = vmand %vm10976_vm8, %vm9183_vm12  ;;  %v4542_v59 = vsel %vm5872_vm5, %v9108_v6, %v4510_v3  ;;  %v4543_v18 = vsel %vm5872_vm5, %v4158_v51, %v4511_v8  ;;  %v4635_v28 = vsel %vm10979_vm3, %v4607_v44, %v4608_v12  ;;  %v4066_v60 = vmul.f32 0.7978846, %v4034_v48 }
 0x2ba   : > { %vm10980_vm1 = vmmov %vm10975_vm10  ;;  %v4670_v34 = vsel %vm4574_vm7, %v9159_v4, %v4542_v59  ;;  %v4671_v38 = vsel %vm5998_vm9, %v4636_v1, %v4543_v18  ;;  %v4160_v36 = vmul.f32 %v4128_v29, %v3904_v56  ;;  %v9283_v13 = vmul.f32 %v4129_v20, %v3905_v14  ;;  %v10999_v29 = vld [vmem:[#allocation20_spill] sm:$0xff]  ;;  %v11000_v20 = vld [vmem:[#allocation82_spill] sm:$0xff] }
 0x2bb   : > { %v4860_v42 = vsel %vm10980_vm1, %v4831_v46, %v4832_v40  ;;  %v4895_v6 = vsel %vm9265_vm13, %v9165_v58, %v4670_v34  ;;  %vm10981_vm12 = vmmov %vm10976_vm8  ;;  %v4131_v44 = vadd.f32 1.0, %v5569_v63  ;;  %vm10986_vm6 = vnez %v10985_v50 }
 0x2bc   : > { %v4896_v51 = vsel %vm10981_vm12, %v4861_v22, %v4671_v38  ;;  %vm10982_vm15 = vmmov %vm10971_vm0  ;;  %v4320_v56 = vrot.slane %v4160_v36, 2  ;;  %v4321_v14 = vrot.slane %v9283_v13, 2  ;;  %v4449_v46 = vrot.slane %v4160_v36, 1  ;;  %v11003_v38 = vld [vmem:[#allocation41_spill] sm:$0xff] }
 0x2bd   : > { %v4919_v61 = vpack.c.bf16 %v4896_v51, %v4895_v6  ;;  %vm9294_vm0 = vmand %vm10982_vm15, %vm9199_vm14  ;;  %v4450_v58 = vrot.slane %v9283_v13, 1  ;;  %v4609_v21 = vrot.slane %v4160_v36, 7  ;;  %v4833_v53 = vrot.slane %v4160_v36, 6  ;;  %v11007_v51 = vld [vmem:[#allocation39_spill] sm:$0xff] }
 0x2be   : > { %vm4417_vm7 = vmand %vm5868_vm4, %vm10986_vm6  ;;  %5570 = vtanh.f32 %v4066_v60  ;;  %vm10987_vm14 = vcmp.lt.s32.totalorder %v6432_v52, 6  ;;  %vm10989_vm10 = vcmp.lt.s32.totalorder %v6432_v52, 7  ;;  %v4036_v0 = vadd.f32 %v4004_v31, %v10966_v23 }
 0x2bf   : > { %5442 = vmatprep.mubr.bf16.mxu1 %v4919_v61  ;;  %v4345_v49 = vsel %vm10987_vm14, %v4320_v56, %v4321_v14  ;;  %vm10988_vm11 = vmmov %vm10987_vm14  ;;  %v4474_v7 = vsel %vm10989_vm10, %v4448_v55, %v4449_v46  ;;  %vm10993_vm3 = vnez %v10992_v17  ;;  %vm10994_vm12 = vcmp.lt.s32.totalorder %v6432_v52, 1  ;;  %v11011_v61 = vld [vmem:[#allocation61_spill] sm:$0xff] }
 0x2c0   : > { %v4346_v48 = vsel %vm10988_vm11, %v4319_v25, %v4320_v56  ;;  %vm10990_vm8 = vmmov %vm10982_vm15  ;;  %v4385_v32 = vsel %vm9294_vm0, %v4345_v49, 0.0  ;;  %v4634_v25 = vsel %vm10994_vm12, %v4608_v12, %v4609_v21  ;;  %v4039_v55 = vadd.f32 %v9122_v33, %v10930_v11 }
 0x2c1   : > { %v4384_v57 = vsel %vm10990_vm8, %v4346_v48, 0.0  ;;  %vm10991_vm13 = vmmov %vm10989_vm10  ;;  %vm10995_vm15 = vcmp.ge.s32.totalorder %v10731_v10, 104  ;;  %vm10996_vm14 = vcmp.lt.s32.totalorder %v6432_v52, 2  ;;  %v9352_v37 = vmul.f32 %v4131_v44, %v9205_v27 }
 0x2c2   : > { %v4473_v45 = vsel %vm10991_vm13, %v4449_v46, %v4450_v58  ;;  %vm4576_vm1 = vmand %vm5998_vm9, %vm10993_vm3  ;;  %v4512_v31 = vsel %vm5868_vm4, %v4474_v7, %v4384_v57  ;;  %v4859_v12 = vsel %vm10996_vm14, %v4832_v40, %v4833_v53  ;;  %v4610_v1 = vrot.slane %v9283_v13, 7 }
 0x2c3   : > { %v4513_v54 = vsel %vm4417_vm7, %v4473_v45, %v4385_v32  ;;  %vm4800_vm0 = vmand %vm10995_vm15, %vm9223_vm2  ;;  %v4544_v33 = vsel %vm5872_vm5, %v9173_v15, %v4512_v31  ;;  %v4834_v3 = vrot.slane %v9283_v13, 6  ;;  %v4037_v40 = vadd.f32 %v4005_v19, %v10955_v62  ;;  %v11012_v45 = vld [vmem:[#allocation49_spill] sm:$0xff] }
 0x2c4   : > { %v4545_v16 = vsel %vm5872_vm5, %v4160_v36, %v4513_v54  ;;  %v4672_v22 = vsel %vm4576_vm1, %v4635_v28, %v4544_v33  ;;  %vm10997_vm2 = vmmov %vm10995_vm15  ;;  %v4068_v24 = vmul.f32 0.7978846, %v4036_v0  ;;  %v3977_v59 = vmul.f32 %v11000_v20, %v10999_v29 }
 0x2c5   : > { %v4673_v26 = vsel %vm5998_vm9, %v4634_v25, %v4545_v16  ;;  %v4897_v8 = vsel %vm4800_vm0, %v4860_v42, %v4672_v22  ;;  %vm10998_vm6 = vmmov %vm10994_vm12  ;;  %v4069_v19 = vmul.f32 0.7978846, %v4037_v40  ;;  %v11002_v42 = vld [vmem:[#allocation58_spill] sm:$0xff]  ;;  %v3906_v34 = vmul.f32 0.5, %v10939_v5 }
 0x2c6   : > { %v4898_v15 = vsel %vm10997_vm2, %v4859_v12, %v4673_v26  ;;  %v9365_v27 = vsel %vm10998_vm6, %v4609_v21, %v4610_v1  ;;  %vm11001_vm7 = vmmov %vm10996_vm14  ;;  %v9375_v63 = vadd.f32 %v9097_v47, %v11002_v42  ;;  %v11004_v36 = vand.u32 15, %v11003_v38 }
 0x2c7   : > { %v4920_v18 = vpack.c.bf16 %v4898_v15, %v4897_v8  ;;  %v9371_v28 = vsel %vm11001_vm7, %v4833_v53, %v4834_v3  ;;  %5572 = vtanh.f32 %v4068_v24  ;;  %v11008_v60 = vand.u32 15, %v11007_v51 }
 0x2c8   : > { %vm9380_vm11 = vcmp.lt.s32.totalorder %v11004_v36, 14  ;;  %5574 = vtanh.f32 %v4069_v19  ;;  %v3942_v47 = vmul.f32 0.044715, %v11011_v61  ;;  %v4071_v4 = vmul.f32 0.7978846, %v4039_v55  ;;  %v5571_v56 = vpop.eup %5570 }
 0x2c9   : > { %5443 = vmatmul.mubr.bf16.gmra.mrb[16].mxu1 %v4920_v18  ;;  %vm9386_vm10 = vcmp.ge.s32.totalorder %v11008_v60, 2  ;;  %v4323_v5 = vrot.slane %v9352_v37, 2  ;;  %v3908_v46 = vmul.f32 0.5, %v10966_v23  ;;  %v3909_v50 = vmul.f32 0.5, %v10955_v62  ;;  %v11030_v60 = vld [vmem:[#allocation97_spill] sm:$0xff] }
 0x2ca   : > { %v4008_v21 = vmul.f32 %v9105_v43, %v10925_v2  ;;  %v4130_v53 = vadd.f32 1.0, %v5571_v56  ;;  %v3974_v49 = vmul.f32 %v3942_v47, %v11011_v61  ;;  %5576 = vtanh.f32 %v4071_v4 }
 0x2cb   : > { %v4009_v48 = vmul.f32 %v3977_v59, %v10999_v29  ;;  %v4452_v7 = vrot.slane %v9352_v37, 1  ;;  %v4612_v0 = vrot.slane %v9352_v37, 7  ;;  %v4836_v57 = vrot.slane %v9352_v37, 6 }
 0x2cc   : > { %v4040_v32 = vadd.f32 %v4008_v21, %v10925_v2  ;;  %v4162_v23 = vmul.f32 %v4130_v53, %v3906_v34  ;;  %v11013_v62 = vand.u32 15, %v11012_v45  ;;  %v9409_v43 = vmul.f32 0.5, %v11011_v61 }
 0x2cd   : > { %v4006_v25 = vmul.f32 %v3974_v49, %v11011_v61  ;;  %v4041_v55 = vadd.f32 %v4009_v48, %v10999_v29  ;;  %v3911_v31 = vmul.f32 0.5, %v10930_v11  ;;  %v9415_v54 = vmul.f32 0.5, %v10925_v2  ;;  %v11019_v11 = vld [vmem:[#allocation98_spill] sm:$0xff]  ;;  %v11021_v2 = vld [vmem:[#allocation40_spill] sm:$0xff] }
 0x2ce   : > { %vm9404_vm8 = vcmp.lt.s32.totalorder %v11013_v62, 14  ;;  %v4072_v12 = vmul.f32 0.7978846, %v4040_v32  ;;  %v9418_v33 = vmul.f32 0.044715, %v9101_v35  ;;  %vm11016_vm13 = vcmp.lt.s32.totalorder %v10731_v10, 26 }
 0x2cf   : > { %vm9424_vm3 = vmand %vm11016_vm13, %vm9380_vm11  ;;  %v4322_v22 = vrot.slane %v4162_v23, 2  ;;  %v4451_v26 = vrot.slane %v4162_v23, 1  ;;  %v4611_v40 = vrot.slane %v4162_v23, 7  ;;  %v4835_v8 = vrot.slane %v4162_v23, 6 }
 0x2d0   : > { %vm11020_vm1 = vnez %v11019_v11  ;;  %v11022_v15 = vand.u32 15, %v11021_v2  ;;  %v4038_v20 = vadd.f32 %v4006_v25, %v11011_v61  ;;  %v9439_v59 = vmul.f32 0.7978846, %v4041_v55  ;;  %vm11029_vm7 = vmmov %vm11016_vm13  ;;  %v11044_v11 = vld [vmem:[#allocation102_spill] sm:$0xff] }
 0x2d1   : > { %vm4419_vm12 = vmand %vm5868_vm4, %vm11020_vm1  ;;  %5578 = vtanh.f32 %v4072_v12  ;;  %v9442_v18 = vmul.f32 0.044715, %v9375_v63  ;;  %vm11025_vm0 = vcmp.lt.s32.totalorder %v6432_v52, 6  ;;  %vm11027_vm2 = vcmp.lt.s32.totalorder %v6432_v52, 7  ;;  %v5573_v36 = vpop.eup %5572 }
 0x2d2   : > { %vm9434_vm15 = vcmp.ge.s32.totalorder %v11022_v15, 2  ;;  %v4343_v19 = vsel %vm11025_vm0, %v4322_v22, %v4323_v5  ;;  %vm11026_vm14 = vmmov %vm11025_vm0  ;;  %v4471_v34 = vsel %vm11027_vm2, %v4451_v26, %v4452_v7  ;;  %vm11031_vm11 = vnez %v11030_v60  ;;  %v5575_v61 = vpop.eup %5574  ;;  %v11057_v60 = vld [vmem:[#allocation73_spill] sm:$0xff] }
 0x2d3   : > { %v4344_v42 = vsel %vm11026_vm14, %v4321_v14, %v4322_v22  ;;  %vm11028_vm6 = vmmov %vm11027_vm2  ;;  %v4387_v51 = vsel %vm9424_vm3, %v4343_v19, 0.0  ;;  %vm11032_vm0 = vcmp.lt.s32.totalorder %v6432_v52, 1  ;;  %vm11033_vm14 = vcmp.lt.s32.totalorder %v6432_v52, 2 }
 0x2d4   : > { %v4472_v38 = vsel %vm11028_vm6, %v4450_v58, %v4451_v26  ;;  %v4386_v6 = vsel %vm11029_vm7, %v4344_v42, 0.0  ;;  %vm4578_vm13 = vmand %vm5998_vm9, %vm11031_vm11  ;;  %v4632_v14 = vsel %vm11032_vm0, %v4610_v1, %v4611_v40  ;;  %v4857_v58 = vsel %vm11033_vm14, %v4834_v3, %v4835_v8  ;;  %v5577_v48 = vpop.eup %5576  ;;  %v11051_v42 = vld [vmem:[#allocation59_spill] sm:$0xff] }
 0x2d5   : > { %v4514_v47 = vsel %vm5868_vm4, %v4472_v38, %v4386_v6  ;;  %v4515_v4 = vsel %vm4419_vm12, %v4471_v34, %v4387_v51  ;;  %vm11034_vm3 = vcmp.ge.s32.totalorder %v10731_v10, 104  ;;  %v4132_v1 = vadd.f32 1.0, %v5573_v36  ;;  %vm11037_vm6 = vmmov %vm11032_vm0 }
 0x2d6   : > { %vm9485_vm2 = vmand %vm11034_vm3, %vm9386_vm10  ;;  %v4631_v3 = vsel %vm11037_vm6, %v4611_v40, %v4612_v0  ;;  %v4546_v21 = vsel %vm5872_vm5, %v9283_v13, %v4514_v47  ;;  %v4547_v53 = vsel %vm5872_vm5, %v4162_v23, %v4515_v4  ;;  %v4133_v44 = vadd.f32 1.0, %v5575_v61 }
 0x2d7   : > { %vm11038_vm10 = vmmov %vm11033_vm14  ;;  %v4674_v32 = vsel %vm4578_vm13, %v9365_v27, %v4546_v21  ;;  %v4675_v45 = vsel %vm5998_vm9, %v4632_v14, %v4547_v53  ;;  %v4164_v62 = vmul.f32 %v4132_v1, %v3908_v46  ;;  %v4070_v25 = vmul.f32 0.7978846, %v4038_v20  ;;  %v11064_v53 = vld [vmem:[#allocation50_spill] sm:$0xff] }
 0x2d8   : > { %v4856_v49 = vsel %vm11038_vm10, %v4835_v8, %v4836_v57  ;;  %v4899_v13 = vsel %vm9485_vm2, %v9371_v28, %v4674_v32  ;;  %vm11039_vm1 = vmmov %vm11034_vm3  ;;  %v9510_v55 = vmul.f32 %v4133_v44, %v3909_v50  ;;  %v4135_v12 = vadd.f32 1.0, %v5577_v48 }
 0x2d9   : > { %v4900_v23 = vsel %vm11039_vm1, %v4857_v58, %v4675_v45  ;;  %v4324_v22 = vrot.slane %v4164_v62, 2  ;;  %v4453_v26 = vrot.slane %v4164_v62, 1  ;;  %v4613_v40 = vrot.slane %v4164_v62, 7  ;;  %vm11040_vm12 = vmmov %vm11029_vm7 }
 0x2da   : > { %v4921_v16 = vpack.c.bf16 %v4900_v23, %v4899_v13  ;;  %vm9516_vm7 = vmand %vm11040_vm12, %vm9404_vm8  ;;  %v4325_v28 = vrot.slane %v9510_v55, 2  ;;  %v4454_v46 = vrot.slane %v9510_v55, 1  ;;  %v4837_v8 = vrot.slane %v4164_v62, 6 }
 0x2db   : > { %5580 = vtanh.f32 %v4070_v25  ;;  %vm11043_vm11 = vcmp.lt.s32.totalorder %v6432_v52, 6  ;;  %vm11045_vm13 = vnez %v11044_v11  ;;  %vm11046_vm0 = vcmp.lt.s32.totalorder %v6432_v52, 7  ;;  %vm11047_vm14 = vmmov %vm11037_vm6  ;;  %v5579_v20 = vpop.eup %5578 }
 0x2dc   : > { %5446 = vmatprep.mubr.bf16.mxu1 %v4921_v16  ;;  %v4342_v50 = vsel %vm11043_vm11, %v4323_v5, %v4324_v22  ;;  %vm4421_vm8 = vmand %vm5868_vm4, %vm11045_vm13  ;;  %v4470_v17 = vsel %vm11046_vm0, %v4452_v7, %v4453_v26  ;;  %v4630_v2 = vsel %vm11047_vm14, %v4612_v0, %v4613_v40  ;;  %v9538_v15 = vmul.f32 %v4135_v12, %v3911_v31 }
 0x2dd   : > { %vm11048_vm3 = vmmov %vm11043_vm11  ;;  %vm11052_vm10 = vnez %v11051_v42  ;;  %vm11054_vm11 = vcmp.ge.s32.totalorder %v10731_v10, 104  ;;  %v3978_v6 = vmul.f32 %v9418_v33, %v9101_v35  ;;  %v11058_v14 = vand.u32 15, %v11057_v60 }
 0x2de   : > { %v4341_v5 = vsel %vm11048_vm3, %v4324_v22, %v4325_v28  ;;  %vm11049_vm2 = vmmov %vm11040_vm12  ;;  %vm11053_vm12 = vcmp.lt.s32.totalorder %v6432_v52, 2  ;;  %v4327_v36 = vrot.slane %v9538_v15, 2  ;;  %v4614_v58 = vrot.slane %v9510_v55, 7 }
 0x2df   : > { %v4388_v19 = vsel %vm11049_vm2, %v4342_v50, 0.0  ;;  %vm11050_vm6 = vmmov %vm11046_vm0  ;;  %v4855_v0 = vsel %vm11053_vm12, %v4836_v57, %v4837_v8  ;;  %v4389_v31 = vsel %vm9516_vm7, %v4341_v5, 0.0  ;;  %vm9578_vm7 = vcmp.lt.s32.totalorder %v11058_v14, 14  ;;  %v11083_v14 = vld [vmem:[#allocation115_spill] sm:$0xff] }
 0x2e0   : > { %v4469_v7 = vsel %vm11050_vm6, %v4453_v26, %v4454_v46  ;;  %vm4580_vm1 = vmand %vm5998_vm9, %vm11052_vm10  ;;  %v4516_v34 = vsel %vm5868_vm4, %v4470_v17, %v4388_v19  ;;  %v4838_v61 = vrot.slane %v9510_v55, 6  ;;  %5582 = vtanh.f32 %v9439_v59 }
 0x2e1   : > { %vm9566_vm13 = vmand %vm11054_vm11, %vm9434_vm15  ;;  %v4517_v57 = vsel %vm4421_vm8, %v4469_v7, %v4389_v31  ;;  %v4548_v51 = vsel %vm5872_vm5, %v9352_v37, %v4516_v34  ;;  %v4136_v33 = vadd.f32 1.0, %v5579_v20  ;;  %v4456_v21 = vrot.slane %v9538_v15, 1  ;;  %v11076_v31 = vld [vmem:[#allocation91_spill] sm:$0xff] }
 0x2e2   : > { %v4549_v47 = vsel %vm5872_vm5, %v4164_v62, %v4517_v57  ;;  %v4676_v4 = vsel %vm4580_vm1, %v4631_v3, %v4548_v51  ;;  %vm11061_vm15 = vmmov %vm11047_vm14  ;;  %v11065_v44 = vand.u32 15, %v11064_v53  ;;  %v4616_v32 = vrot.slane %v9538_v15, 7  ;;  %v11081_v51 = vld [vmem:[#allocation112_spill] sm:$0xff] }
 0x2e3   : > { %v4677_v37 = vsel %vm5998_vm9, %v4630_v2, %v4549_v47  ;;  %v4901_v56 = vsel %vm9566_vm13, %v4856_v49, %v4676_v4  ;;  %v9595_v1 = vsel %vm11061_vm15, %v4613_v40, %v4614_v58  ;;  %vm11062_vm8 = vmmov %vm11053_vm12  ;;  %v9613_v48 = vmul.f32 %v4136_v33, %v9415_v54  ;;  %v11068_v40 = vld [vmem:[#allocation109_spill] sm:$0xff] }
 0x2e4   : > { %v9601_v3 = vsel %vm11062_vm8, %v4837_v8, %v4838_v61  ;;  %vm11063_vm0 = vmmov %vm11054_vm11  ;;  %vm9608_vm14 = vcmp.ge.s32.totalorder %v11065_v44, 2  ;;  %v4840_v62 = vrot.slane %v9538_v15, 6  ;;  %v3979_v25 = vmul.f32 %v9442_v18, %v9375_v63 }
 0x2e5   : > { %v4902_v59 = vsel %vm11063_vm0, %v4855_v0, %v4677_v37  ;;  %v4010_v13 = vmul.f32 %v3978_v6, %v9101_v35  ;;  %v4328_v23 = vrot.slane %v9613_v48, 2  ;;  %v4457_v12 = vrot.slane %v9613_v48, 1  ;;  %v5581_v54 = vpop.eup %5580  ;;  %vm11073_vm10 = vmmov %vm11061_vm15  ;;  %v11080_v6 = vld [vmem:[#allocation81_spill] sm:$0xff] }
 0x2e6   : > { %v4922_v45 = vpack.c.bf16 %v4902_v59, %v4901_v56  ;;  %v4617_v16 = vrot.slane %v9613_v48, 7  ;;  %v4841_v22 = vrot.slane %v9613_v48, 6  ;;  %v3913_v26 = vmul.f32 0.5, %v10999_v29  ;;  %vm11075_vm12 = vmmov %vm11062_vm8 }
 0x2e7   : > { %v11069_v27 = vand.u32 15, %v11068_v40  ;;  %v4011_v18 = vmul.f32 %v3979_v25, %v9375_v63  ;;  %v4042_v50 = vadd.f32 %v4010_v13, %v9101_v35  ;;  %v4134_v11 = vadd.f32 1.0, %v5581_v54 }
 0x2e8   : > { %5447 = vmatmul.mubr.bf16.gmra.mrb[20].mxu1 %v4922_v45  ;;  %vm11072_vm2 = vcmp.lt.s32.totalorder %v6432_v52, 6  ;;  %v4466_v29 = vsel %vm11050_vm6, %v4456_v21, %v4457_v12  ;;  %v9647_v2 = vsel %vm11073_vm10, %v4616_v32, %v4617_v16  ;;  %vm11074_vm1 = vcmp.lt.s32.totalorder %v10731_v10, 26  ;;  %v11090_v45 = vld [vmem:[#allocation64_spill] sm:$0xff] }
 0x2e9   : > { %vm9627_vm3 = vcmp.lt.s32.totalorder %v11069_v27, 14  ;;  %v4338_v17 = vsel %vm11072_vm2, %v4327_v36, %v4328_v23  ;;  %v9655_v5 = vsel %vm11075_vm12, %v4840_v62, %v4841_v22  ;;  %v4043_v19 = vadd.f32 %v4011_v18, %v9375_v63  ;;  %vm11087_vm0 = vmmov %vm11074_vm1 }
 0x2ea   : > { %v4392_v20 = vsel %vm11074_vm1, %v4338_v17, 0.0  ;;  %v4074_v7 = vmul.f32 0.7978846, %v4042_v50  ;;  %v4166_v42 = vmul.f32 %v4134_v11, %v9409_v43  ;;  %v11077_v34 = vand.u32 15, %v11076_v31  ;;  %v5583_v33 = vpop.eup %5582  ;;  %vm9685_vm2 = vmand %vm11087_vm0, %vm9578_vm7  ;;  %v11098_v11 = vld [vmem:[#allocation105_spill] sm:$0xff] }
 0x2eb   : > { %v4520_v0 = vsel %vm5868_vm4, %v4466_v29, %v4392_v20  ;;  %v4332_v57 = vrot.slane %v11080_v6, 2  ;;  %vm11082_vm13 = vnez %v11081_v51  ;;  %v4075_v60 = vmul.f32 0.7978846, %v4043_v19 }
 0x2ec   : > { %vm9663_vm11 = vcmp.ge.s32.totalorder %v11077_v34, 2  ;;  %v4552_v43 = vsel %vm5872_vm5, %v9538_v15, %v4520_v0  ;;  %5584 = vtanh.f32 %v4074_v7  ;;  %v11084_v47 = vand.u32 15, %v11083_v14  ;;  %v11120_v34 = vld [vmem:[#allocation113_spill] sm:$0xff] }
 0x2ed   : > { %v4326_v56 = vrot.slane %v4166_v42, 2  ;;  %v4455_v59 = vrot.slane %v4166_v42, 1  ;;  %v4615_v53 = vrot.slane %v4166_v42, 7  ;;  %v4839_v44 = vrot.slane %v4166_v42, 6 }
 0x2ee   : > { %vm9677_vm8 = vcmp.lt.s32.totalorder %v11084_v47, 14  ;;  %vm11091_vm6 = vnez %v11090_v45  ;;  %v4137_v25 = vadd.f32 1.0, %v5583_v33  ;;  %5586 = vtanh.f32 %v4075_v60 }
 0x2ef   : > { %v11092_v13 = vrot.slane %v8383_v39, 2  ;;  %vm11093_vm7 = vcmp.lt.s32.totalorder %v6432_v52, 6  ;;  %v4461_v54 = vrot.slane %v11080_v6, 1  ;;  %vm11096_vm0 = vcmp.lt.s32.totalorder %v6432_v52, 7 }
 0x2f0   : > { %vm11094_vm1 = vmmov %vm11093_vm7  ;;  %v4467_v18 = vsel %vm11096_vm0, %v4455_v59, %v4456_v21  ;;  %v9745_v49 = vmul.f32 %v4137_v25, %v3913_v26  ;;  %v3915_v25 = vmul.f32 0.5, %v9375_v63 }
 0x2f1   : > { %v4365_v24 = vsel %vm11093_vm7, %v4332_v57, %v11092_v13  ;;  %v4339_v40 = vsel %vm11094_vm1, %v4326_v56, %v4327_v36  ;;  %vm11095_vm12 = vmmov %vm11094_vm1  ;;  %vm11099_vm7 = vnez %v11098_v11  ;;  %vm11100_vm1 = vcmp.lt.s32.totalorder %v10731_v10, 26 }
 0x2f2   : > { %v4340_v27 = vsel %vm11095_vm12, %v4325_v28, %v4326_v56  ;;  %vm11097_vm10 = vmmov %vm11096_vm0  ;;  %v4391_v36 = vsel %vm9685_vm2, %v4339_v40, 0.0  ;;  %vm11101_vm12 = vcmp.lt.s32.totalorder %v6432_v52, 1  ;;  %v4458_v0 = vrot.slane %v9745_v49, 1 }
 0x2f3   : > { %v4468_v50 = vsel %vm11097_vm10, %v4454_v46, %v4455_v59  ;;  %vm4584_vm15 = vmand %vm5998_vm9, %vm11099_vm7  ;;  %v4390_v15 = vsel %vm11100_vm1, %v4340_v27, 0.0  ;;  %v4628_v28 = vsel %vm11101_vm12, %v4614_v58, %v4615_v53  ;;  %vm11102_vm10 = vcmp.ge.s32.totalorder %v10731_v10, 104 }
 0x2f4   : > { %vm9730_vm0 = vmand %vm11102_vm10, %vm9608_vm14  ;;  %vm11105_vm7 = vcmp.lt.s32.totalorder %v6432_v52, 2  ;;  %v4518_v17 = vsel %vm5868_vm4, %v4468_v50, %v4390_v15  ;;  %v4618_v51 = vrot.slane %v9745_v49, 7  ;;  %v4842_v14 = vrot.slane %v9745_v49, 6  ;;  %v11133_v50 = vld [vmem:[#allocation111_spill] sm:$0xff] }
 0x2f5   : > { %v4853_v21 = vsel %vm11105_vm7, %v4838_v61, %v4839_v44  ;;  %vm11106_vm2 = vmand %vm5868_vm4, %vm11082_vm13  ;;  %v4550_v20 = vsel %vm5872_vm5, %v9510_v55, %v4518_v17  ;;  %vm11111_vm13 = vcmp.lt.s32.totalorder %v10731_v10, 26  ;;  %v11134_v11 = vand.u32 15, %v11133_v50  ;;  %v11139_v17 = vld [vmem:[#allocation103_spill] sm:$0xff] }
 0x2f6   : > { %v4519_v58 = vsel %vm11106_vm2, %v4467_v18, %v4391_v36  ;;  %vm11107_vm14 = vmmov %vm11101_vm12  ;;  %vm11121_vm2 = vnez %v11120_v34  ;;  %v5585_v47 = vpop.eup %5584  ;;  %v11131_v18 = vld [vmem:[#allocation114_spill] sm:$0xff] }
 0x2f7   : > { %v4627_v29 = vsel %vm11107_vm14, %v4615_v53, %v4616_v32  ;;  %vm11108_vm1 = vmmov %vm11102_vm10  ;;  %v4551_v19 = vsel %vm5872_vm5, %v4166_v42, %v4519_v58  ;;  %v4329_v42 = vrot.slane %v9745_v49, 2  ;;  %v3914_v53 = vmul.f32 0.5, %v9101_v35 }
 0x2f8   : > { %vm9753_vm12 = vmand %vm11108_vm1, %vm9663_vm11  ;;  %v4680_v26 = vsel %vm4584_vm15, %v4627_v29, %v4552_v43  ;;  %v4679_v8 = vsel %vm5998_vm9, %v4628_v28, %v4551_v19  ;;  %v5587_v45 = vpop.eup %5586  ;;  %v11137_v28 = vld [vmem:[#allocation79_spill] sm:$0xff]  ;;  %v11140_v58 = vand.u32 15, %v11139_v17 }
 0x2f9   : > { %vm9766_vm10 = vmand %vm11111_vm13, %vm9627_vm3 }
 0x2fa   : > { %vm11114_vm11 = vmmov %vm11105_vm7 }
 0x2fb   : > { %v4852_v7 = vsel %vm11114_vm11, %v4839_v44, %v4840_v62  ;;  %vm11115_vm7 = vmand %vm5998_vm9, %vm11091_vm6 }
 0x2fc   : > { %v4678_v55 = vsel %vm11115_vm7, %v9595_v1, %v4550_v20  ;;  %vm11116_vm3 = vmmov %vm11111_vm13  ;;  %v4905_v38 = vsel %vm9753_vm12, %v4852_v7, %v4680_v26 }
 0x2fd   : > { %vm9786_vm15 = vmand %vm11116_vm3, %vm9677_vm8  ;;  %v4903_v31 = vsel %vm9730_vm0, %v9601_v3, %v4678_v55  ;;  %vm11122_vm8 = vcmp.lt.s32.totalorder %v6432_v52, 6  ;;  %vm11123_vm0 = vcmp.lt.s32.totalorder %v6432_v52, 7  ;;  %v11149_v55 = vld [vmem:[#allocation74_spill] sm:$0xff] }
 0x2fe   : > { %vm11119_vm6 = vmmov %vm11108_vm1  ;;  %v4337_v60 = vsel %vm11122_vm8, %v4328_v23, %v4329_v42  ;;  %v4465_v3 = vsel %vm11123_vm0, %v4457_v12, %v4458_v0  ;;  %vm11124_vm1 = vcmp.lt.s32.totalorder %v6432_v52, 1  ;;  %v4397_v37 = vsel %vm9786_vm15, %v4365_v24, 0.0  ;;  %v11125_v23 = vld [vmem:[#allocation27_spill] sm:$0xff] }
 0x2ff   : > { %v4904_v1 = vsel %vm11119_vm6, %v4853_v21, %v4679_v8  ;;  %vm4425_vm14 = vmand %vm5868_vm4, %vm11121_vm2  ;;  %v4393_v4 = vsel %vm9766_vm10, %v4337_v60, 0.0  ;;  %v4625_v33 = vsel %vm11124_vm1, %v4617_v16, %v4618_v51  ;;  %vm11126_vm12 = vnez %v11125_v23 }
 0x300   : > { %v4923_v43 = vpack.c.bf16 %v4904_v1, %v4903_v31  ;;  %vm4429_vm13 = vmand %vm5868_vm4, %vm11126_vm12  ;;  %v11127_v12 = vrot.slane %v8383_v39, 1  ;;  %v4521_v59 = vsel %vm4425_vm14, %v4465_v3, %v4393_v4  ;;  %v4138_v16 = vadd.f32 1.0, %v5585_v47 }
 0x301   : > { %vm11128_vm11 = vmmov %vm11123_vm0  ;;  %vm11129_vm10 = vcmp.lt.s32.totalorder %v6432_v52, 2  ;;  %v4553_v39 = vsel %vm5872_vm5, %v9613_v48, %v4521_v59  ;;  %v4139_v24 = vadd.f32 1.0, %v5587_v45  ;;  %vm9848_vm15 = vcmp.ge.s32.totalorder %v11134_v11, 2 }
 0x302   : > { %v4493_v56 = vsel %vm11128_vm11, %v4461_v54, %v11127_v12  ;;  %5450 = vmatprep.mubr.bf16.mxu1 %v4923_v43  ;;  %v4850_v44 = vsel %vm11129_vm10, %v4841_v22, %v4842_v14  ;;  %v4681_v13 = vsel %vm5998_vm9, %v9647_v2, %v4553_v39  ;;  %v4170_v40 = vmul.f32 %v4138_v16, %v3914_v53  ;;  %vm11130_vm7 = vmmov %vm11119_vm6 }
 0x303   : > { %v4525_v35 = vsel %vm4429_vm13, %v4493_v56, %v4397_v37  ;;  %v4906_v27 = vsel %vm11130_vm7, %v9655_v5, %v4681_v13  ;;  %v11132_v22 = vand.u32 15, %v11131_v18  ;;  %v4171_v15 = vmul.f32 %v4139_v24, %v3915_v25  ;;  %vm11147_vm12 = vmmov %vm11128_vm11  ;;  %v9958_v24 = vld [vmem:[%s10085_s6] ss:$0 sm:$0xff] }
 0x304   : > { %v4924_v63 = vpack.c.bf16 %v4906_v27, %v4905_v38  ;;  %v4330_v36 = vrot.slane %v4170_v40, 2  ;;  %v4459_v2 = vrot.slane %v4170_v40, 1  ;;  %vm11138_vm6 = vnez %v11137_v28 }
 0x305   : > { %vm4202_vm3 = vcmp.lt.s32.totalorder %v11132_v22, 14  ;;  %vm4427_vm2 = vmand %vm5868_vm4, %vm11138_vm6  ;;  %v4619_v46 = vrot.slane %v4170_v40, 7  ;;  %v4843_v5 = vrot.slane %v4170_v40, 6  ;;  %v4557_v21 = vsel %vm5872_vm5, %v11080_v6, %v4525_v35 }
 0x306   : > { %vm9861_vm14 = vcmp.ge.s32.totalorder %v11140_v58, 2  ;;  %5451 = vmatmul.mubr.bf16.gmra.mrb[24].mxu1 %v4924_v63  ;;  %vm11143_vm8 = vcmp.lt.s32.totalorder %v10731_v10, 26  ;;  %v4331_v20 = vrot.slane %v4171_v15, 2  ;;  %vm11146_vm1 = vcmp.lt.s32.totalorder %v6432_v52, 6 }
 0x307   : > { %vm9867_vm0 = vmand %vm11143_vm8, %vm4202_vm3  ;;  %v4336_v19 = vsel %vm11146_vm1, %v4329_v42, %v4330_v36  ;;  %v4460_v32 = vrot.slane %v4171_v15, 1  ;;  %v4464_v26 = vsel %vm11147_vm12, %v4458_v0, %v4459_v2  ;;  %vm11150_vm11 = vnez %v11149_v55 }
 0x308   : > { %vm11148_vm13 = vmmov %vm11143_vm8  ;;  %vm11151_vm7 = vcmp.lt.s32.totalorder %v6432_v52, 1  ;;  %vm11152_vm3 = vcmp.lt.s32.totalorder %v6432_v52, 2  ;;  %v4620_v31 = vrot.slane %v4171_v15, 7  ;;  %v11163_v4 = vrot.slane %v11080_v6, 7 }
 0x309   : > { %v4394_v7 = vsel %vm11148_vm13, %v4336_v19, 0.0  ;;  %vm4586_vm10 = vmand %vm5998_vm9, %vm11150_vm11  ;;  %v4624_v8 = vsel %vm11151_vm7, %v4618_v51, %v4619_v46  ;;  %v4849_v62 = vsel %vm11152_vm3, %v4842_v14, %v4843_v5  ;;  %vm11159_vm7 = vcmp.lt.s32.totalorder %v10731_v10, 26  ;;  %v11161_v14 = vld [vmem:[#allocation76_spill] sm:$0xff] }
 0x30a   : > { %vm11153_vm8 = vmmov %vm11146_vm1  ;;  %v4522_v1 = vsel %vm5868_vm4, %v4464_v26, %v4394_v7  ;;  %vm11162_vm3 = vnez %v11161_v14  ;;  %v4844_v53 = vrot.slane %v4171_v15, 6 }
 0x30b   : > { %v4335_v42 = vsel %vm11153_vm8, %v4330_v36, %v4331_v20  ;;  %vm11154_vm1 = vmmov %vm11147_vm12  ;;  %vm11155_vm12 = vcmp.ge.s32.totalorder %v10731_v10, 104  ;;  %v4554_v43 = vsel %vm5872_vm5, %v9745_v49, %v4522_v1 }
 0x30c   : > { %v4463_v0 = vsel %vm11154_vm1, %v4459_v2, %v4460_v32  ;;  %vm9895_vm13 = vmand %vm11155_vm12, %vm9848_vm15  ;;  %v4395_v51 = vsel %vm9867_vm0, %v4335_v42, 0.0  ;;  %v4682_v49 = vsel %vm4586_vm10, %v4625_v33, %v4554_v43  ;;  %vm11164_vm0 = vcmp.lt.s32.totalorder %v6432_v52, 1 }
 0x30d   : > { %vm11158_vm11 = vmmov %vm11153_vm8  ;;  %v4907_v23 = vsel %vm9895_vm13, %v4850_v44, %v4682_v49  ;;  %v11168_v44 = vrot.slane %v11080_v6, 6 }
 0x30e   : > { %v4334_v38 = vsel %vm11158_vm11, %v4331_v20, %v4332_v57  ;;  %vm11160_vm15 = vmmov %vm11154_vm1  ;;  %v4523_v57 = vsel %vm4427_vm2, %v4463_v0, %v4395_v51 }
 0x30f   : > { %v4396_v60 = vsel %vm11159_vm7, %v4334_v38, 0.0  ;;  %v4462_v3 = vsel %vm11160_vm15, %v4460_v32, %v4461_v54  ;;  %vm4588_vm8 = vmand %vm5998_vm9, %vm11162_vm3  ;;  %v4622_v54 = vsel %vm11164_vm0, %v4620_v31, %v11163_v4  ;;  %v4555_v37 = vsel %vm5872_vm5, %v4170_v40, %v4523_v57 }
 0x310   : > { %v4524_v47 = vsel %vm5868_vm4, %v4462_v3, %v4396_v60  ;;  %vm11165_vm6 = vmmov %vm11164_vm0  ;;  %v4683_v30 = vsel %vm5998_vm9, %v4624_v8, %v4555_v37  ;;  %v4685_v59 = vsel %vm5998_vm9, %v4622_v54, %v4557_v21 }
 0x311   : > { %v4556_v12 = vsel %vm5872_vm5, %v4171_v15, %v4524_v47  ;;  %v4623_v33 = vsel %vm11165_vm6, %v4619_v46, %v4620_v31  ;;  %vm11166_vm4 = vmmov %vm11155_vm12  ;;  %vm11169_vm5 = vcmp.lt.s32.totalorder %v6432_v52, 2 }
 0x312   : > { %v4684_v56 = vsel %vm4588_vm8, %v4623_v33, %v4556_v12  ;;  %vm4812_vm2 = vmand %vm11166_vm4, %vm9861_vm14  ;;  %v4847_v45 = vsel %vm11169_vm5, %v4844_v53, %v11168_v44 }
 0x313   : > { %vm11167_vm10 = vmmov %vm11166_vm4 }
 0x314   : > { %v4908_v41 = vsel %vm11167_vm10, %v4849_v62, %v4683_v30  ;;  %vm11170_vm1 = vmmov %vm11169_vm5 }
 0x315   : > { %v4925_v16 = vpack.c.bf16 %v4908_v41, %v4907_v23  ;;  %v4848_v9 = vsel %vm11170_vm1, %v4843_v5, %v4844_v53  ;;  %vm11171_vm9 = vmmov %vm11166_vm4 }
 0x316   : > { %v4909_v39 = vsel %vm4812_vm2, %v4848_v9, %v4684_v56  ;;  %v4910_v25 = vsel %vm11171_vm9, %v4847_v45, %v4685_v59 }
 0x317   : > { %5454 = vmatprep.mubr.bf16.mxu1 %v4925_v16  ;;  %v4926_v13 = vpack.c.bf16 %v4910_v25, %v4909_v39 }
 0x319   : > { %5455 = vmatmul.mubr.bf16.gmra.mrb[28].mxu1 %v4926_v13 }
 0x339   : > { %v5428_v40 = vpop.f32.mrb[0].mxu1 }
 0x33a   : > { %v5041_v6 = vadd.f32 %v5428_v40, %v9958_v24  ;;  %v5032_v35 = vpop.f32.mrb[1].mxu1 }
 0x33b   : > { %v5033_v27 = vadd.f32 %v9958_v24, %v5032_v35  ;;  %v5429_v52 = vpop.f32.mrb[2].mxu1 }
 0x33c   : > { %5161 = vst [vmem:[%s9964_s29 + $0x10] sm:$0xff] %v5041_v6  ;;  %v5044_v10 = vadd.f32 %v5429_v52, %v9958_v24  ;;  %v5035_v18 = vpop.f32.mrb[3].mxu1 }
 0x33d   : > { %5159 = vst [vmem:[%s9964_s29] sm:$0xff] %v5033_v27  ;;  %v5036_v22 = vadd.f32 %v9958_v24, %v5035_v18 }
 0x33e   : > { %5162 = vst [vmem:[%s9964_s29 + $0x18] sm:$0xff] %v5044_v10 }
 0x33f   : > { %5160 = vst [vmem:[%s9964_s29 + $0x8] sm:$0xff] %v5036_v22 }
 0x34d   : > { %v5432_v50 = vpop.f32.mrb[4].mxu1 }
 0x34e   : > { %v5057_v11 = vadd.f32 %v5432_v50, %v9958_v24  ;;  %v5048_v48 = vpop.f32.mrb[5].mxu1 }
 0x34f   : > { %v5049_v63 = vadd.f32 %v9958_v24, %v5048_v48  ;;  %v5433_v15 = vpop.f32.mrb[6].mxu1 }
 0x350   : > { %5165 = vst [vmem:[%s9964_s29 + $0x30] sm:$0xff] %v5057_v11  ;;  %v5060_v36 = vadd.f32 %v5433_v15, %v9958_v24  ;;  %v5051_v2 = vpop.f32.mrb[7].mxu1 }
 0x351   : > { %5163 = vst [vmem:[%s9964_s29 + $0x20] sm:$0xff] %v5049_v63  ;;  %v5052_v28 = vadd.f32 %v9958_v24, %v5051_v2 }
 0x352   : > { %5166 = vst [vmem:[%s9964_s29 + $0x38] sm:$0xff] %v5060_v36 }
 0x353   : > { %5164 = vst [vmem:[%s9964_s29 + $0x28] sm:$0xff] %v5052_v28 }
 0x36b   : > { %v5436_v46 = vpop.f32.mrb[8].mxu1 }
 0x36c   : > { %v5073_v5 = vadd.f32 %v5436_v46, %v9958_v24  ;;  %v5064_v21 = vpop.f32.mrb[9].mxu1 }
 0x36d   : > { %v5065_v17 = vadd.f32 %v9958_v24, %v5064_v21  ;;  %v5437_v58 = vpop.f32.mrb[10].mxu1 }
 0x36e   : > { %5169 = vst [vmem:[%s9964_s29 + $0x50] sm:$0xff] %v5073_v5  ;;  %v5076_v29 = vadd.f32 %v5437_v58, %v9958_v24  ;;  %v5067_v61 = vpop.f32.mrb[11].mxu1 }
 0x36f   : > { %5167 = vst [vmem:[%s9964_s29 + $0x40] sm:$0xff] %v5065_v17  ;;  %v5068_v20 = vadd.f32 %v9958_v24, %v5067_v61 }
 0x370   : > { %5170 = vst [vmem:[%s9964_s29 + $0x58] sm:$0xff] %v5076_v29 }
 0x371   : > { %5168 = vst [vmem:[%s9964_s29 + $0x48] sm:$0xff] %v5068_v20 }
 0x384   : > { %v5440_v19 = vpop.f32.mrb[12].mxu1 }
 0x385   : > { %v5089_v32 = vadd.f32 %v5440_v19, %v9958_v24  ;;  %v5080_v26 = vpop.f32.mrb[13].mxu1 }
 0x386   : > { %v5081_v7 = vadd.f32 %v9958_v24, %v5080_v26  ;;  %v5441_v55 = vpop.f32.mrb[14].mxu1 }
 0x387   : > { %5173 = vst [vmem:[%s9964_s29 + $0x70] sm:$0xff] %v5089_v32  ;;  %v5092_v8 = vadd.f32 %v5441_v55, %v9958_v24  ;;  %v5083_v62 = vpop.f32.mrb[15].mxu1 }
 0x388   : > { %5171 = vst [vmem:[%s9964_s29 + $0x60] sm:$0xff] %v5081_v7  ;;  %v5084_v31 = vadd.f32 %v9958_v24, %v5083_v62 }
 0x389   : > { %5174 = vst [vmem:[%s9964_s29 + $0x78] sm:$0xff] %v5092_v8 }
 0x38a   : > { %5172 = vst [vmem:[%s9964_s29 + $0x68] sm:$0xff] %v5084_v31 }
 0x39c   : > { %v5444_v42 = vpop.f32.mrb[16].mxu1 }
 0x39d   : > { %v5105_v0 = vadd.f32 %v5444_v42, %v9958_v24  ;;  %v5096_v1 = vpop.f32.mrb[17].mxu1 }
 0x39e   : > { %v5097_v34 = vadd.f32 %v9958_v24, %v5096_v1  ;;  %v5445_v38 = vpop.f32.mrb[18].mxu1 }
 0x39f   : > { %5177 = vst [vmem:[%s9964_s29 + $0x90] sm:$0xff] %v5105_v0  ;;  %v5108_v51 = vadd.f32 %v5445_v38, %v9958_v24  ;;  %v5099_v43 = vpop.f32.mrb[19].mxu1 }
 0x3a0   : > { %5175 = vst [vmem:[%s9964_s29 + $0x80] sm:$0xff] %v5097_v34  ;;  %v5100_v60 = vadd.f32 %v9958_v24, %v5099_v43 }
 0x3a1   : > { %5178 = vst [vmem:[%s9964_s29 + $0x98] sm:$0xff] %v5108_v51 }
 0x3a2   : > { %5176 = vst [vmem:[%s9964_s29 + $0x88] sm:$0xff] %v5100_v60 }
 0x3bb   : > { %v5448_v3 = vpop.f32.mrb[20].mxu1 }
 0x3bc   : > { %v5121_v14 = vadd.f32 %v5448_v3, %v9958_v24  ;;  %v5112_v57 = vpop.f32.mrb[21].mxu1 }
 0x3bd   : > { %v5113_v49 = vadd.f32 %v9958_v24, %v5112_v57  ;;  %v5449_v47 = vpop.f32.mrb[22].mxu1 }
 0x3be   : > { %5181 = vst [vmem:[%s9964_s29 + $0xb0] sm:$0xff] %v5121_v14  ;;  %v5124_v4 = vadd.f32 %v5449_v47, %v9958_v24  ;;  %v5115_v54 = vpop.f32.mrb[23].mxu1 }
 0x3bf   : > { %5179 = vst [vmem:[%s9964_s29 + $0xa0] sm:$0xff] %v5113_v49  ;;  %v5116_v37 = vadd.f32 %v9958_v24, %v5115_v54 }
 0x3c0   : > { %5182 = vst [vmem:[%s9964_s29 + $0xb8] sm:$0xff] %v5124_v4 }
 0x3c1   : > { %5180 = vst [vmem:[%s9964_s29 + $0xa8] sm:$0xff] %v5116_v37 }
 0x3d9   : > { %v5452_v23 = vpop.f32.mrb[24].mxu1 }
 0x3da   : > { %v5137_v12 = vadd.f32 %v5452_v23, %v9958_v24  ;;  %v5128_v33 = vpop.f32.mrb[25].mxu1 }
 0x3db   : > { %v5129_v30 = vadd.f32 %v9958_v24, %v5128_v33  ;;  %v5453_v56 = vpop.f32.mrb[26].mxu1 }
 0x3dc   : > { %5185 = vst [vmem:[%s9964_s29 + $0xd0] sm:$0xff] %v5137_v12  ;;  %v5140_v59 = vadd.f32 %v5453_v56, %v9958_v24  ;;  %v5131_v53 = vpop.f32.mrb[27].mxu1 }
 0x3dd   : > { %5183 = vst [vmem:[%s9964_s29 + $0xc0] sm:$0xff] %v5129_v30  ;;  %v5132_v41 = vadd.f32 %v9958_v24, %v5131_v53 }
 0x3de   : > { %5186 = vst [vmem:[%s9964_s29 + $0xd8] sm:$0xff] %v5140_v59 }
 0x3df   : > { %5184 = vst [vmem:[%s9964_s29 + $0xc8] sm:$0xff] %v5132_v41 }
 0x3ec   : > { %v5456_v16 = vpop.f32.mrb[28].mxu1 }
 0x3ed   : > { %v5153_v44 = vadd.f32 %v5456_v16, %v9958_v24  ;;  %v5144_v45 = vpop.f32.mrb[29].mxu1 }
 0x3ee   : > { %v5145_v9 = vadd.f32 %v9958_v24, %v5144_v45  ;;  %v5457_v39 = vpop.f32.mrb[30].mxu1 }
 0x3ef   : > { %5189 = vst [vmem:[%s9964_s29 + $0xf0] sm:$0xff] %v5153_v44  ;;  %v5156_v25 = vadd.f32 %v5457_v39, %v9958_v24  ;;  %v5147_v13 = vpop.f32.mrb[31].mxu1 }
 0x3f0   : > { %5187 = vst [vmem:[%s9964_s29 + $0xe0] sm:$0xff] %v5145_v9  ;;  %v5148_v40 = vadd.f32 %v9958_v24, %v5147_v13 }
 0x3f1   : > { %5190 = vst [vmem:[%s9964_s29 + $0xf8] sm:$0xff] %v5156_v25 }
 0x3f2   : > { %5188 = vst [vmem:[%s9964_s29 + $0xe8] sm:$0xff] %v5148_v40 }
 0x3f3   : > { %5635 = shalt.err (!%p5632_p2)
}
 0x3f4   : > { %s5636_s20 = scalar_lea.hbm %s10029_s21, 4096  ;;  %s5640_s29 = scalar_lea.hbm %s10086_s7, 8192 }
 0x3f5   : > { %p5637_p4 = scmp.ne.s32.totalorder %s10029_s21, %s5636_s20  ;;  %p5641_p9 = scmp.lt.u32.totalorder %s10029_s21, %s10086_s7 }
 0x3f6   : > { %p5642_p1 = scmp.lt.u32.totalorder %s5640_s29, %s5636_s20  ;;  %p5644_p6 = scmp.lt.u32.totalorder %s5636_s20, %s10029_s21 }
 0x3f7   : > { %p5638_p5 = pnand %p5637_p4, %p11172_p11 }
 0x3f8   : > { %p5643_p3 = por %p5642_p1, %p5641_p9 }
 0x3f9   : > { %p5639_p7 = pneg %p5638_p5 }
 0x3fa   : > { %p5645_p12 = por %p5644_p6, %p5643_p3 }
 0x3fc   : > { %p5646_p13 = pnand %p5645_p12, %p5639_p7 }
 0x3fe   : > { %5649 = shalt.err (!%p5646_p13)
}
 0x3ff   : > { %s5694_s19 = smov 128   ;;  %s5695_s9 = smov 8  }
 0x400   : > { %5460 = dma.vmem_to_hbm [thread:$0]  (%p11172_p11), %s10031_s12, 4096, %s10029_s21, %s5192_s28, %s5694_s19, %s5694_s19, %s5695_s9  }
 0x401 PF: > { %s5220_s8 = sand.u32 1, %s5676_s24   ;;  %p11173_p8 = scmp.ne.s32.totalorder %s10310_s14, 0 }
 0x402   : > { %p11174_p10 = scmp.ge.s32.totalorder %s5688_s27, 2  ;;  %s5221_s11 = scalar_lea.sflag [#allocation4], %s5220_s8 }
 0x404   : > { %p5467_p0 = pnand %p11174_p10, %p11173_p8 }
 0x406   : > { %5671 = dma.done.wait (!%p5467_p0), %s5221_s11, 4096  }
 0x407   : > { %5673 = vsyncadd (!%p5467_p0), %s5221_s11, 4294963200  ;;  %p20_p2 = scmp.ge.s32.totalorder %s5761_s30, 4   ;;  %s11175_s24 = smov %s5680_s25 }
 0x408   : > { %s11176_s25 = smov %s5684_s26  ;;  %s11177_s26 = smov %s5773_s10 }
 0x409   : > { %s11178_s27 = smov %s5761_s30  ;;  %22 = sbr.rel (!%p20_p2) target bundleno = 5 (0x5), region = 93 }
 0x410   :  { %5226 = vsyncpa [#allocation3], 1 }
 0x411   :  { %5228 = vsyncpa [#allocation3 + $0x1], 1 }
 0x412   :  { %5229 = vsyncpa [#allocation4], 1 }
 0x413   :  { %5231 = vsyncpa [#allocation4 + $0x1], 1 }

</bundles_post_ra>
